<compile_context>
chip_gen: v7x
topology: tpu7x:2x2x1
jax: 0.10.0
libtpu: 0.0.40
codegen_flags: <defaults>
</compile_context>

<pallas_src>
import functools

import jax
import jax.numpy as jnp
from jax import lax
from jax.experimental import pallas as pl
from jax.experimental.pallas import tpu as pltpu


def _round_up(n, m):
    return ((n + m - 1) // m) * m


# ----------------------------------------------------------------------------
# Pallas kernel: hoisted (bf16) input projection + unrolled f32 LSTM recurrence
# + hoisted (bf16) output Linear.  Whole problem lives in VMEM (no grid).
# ----------------------------------------------------------------------------
def lstm_linear_kernel(x2d_ref,    # (T*Bp, Kp)   bf16 flattened time-major input; lane D_in == 1.0 (bias lane)
                       wih_ref,    # (Kp, 4*HP)   bf16 W_ih^T, gate-block padded; row D_in holds (b_ih+b_hh)
                       whh_ref,    # (HP, 4*HP)   f32  W_hh^T, gate-block padded (recurrent dot stays f32)
                       wlin_ref,   # (HP, OP)     bf16 linear weight^T, zero padded
                       blin_ref,   # (1, OP)      f32  linear bias, zero padded
                       out_ref,    # (T*Bp, OP)   f32  lane-dense output slab
                       xp_sc,      # scratch (T*Bp, 4*HP) f32: precomputed input projection (+bias)
                       hall_sc,    # scratch (T*Bp, HP)   f32: all hidden states
                       *, T, Bp, HP):
    # --- hoisted input projection (bias folded via the constant-1 lane) -------
    # One bf16 MXU matmul for all timesteps, f32 accumulation.           [R2][R5]
    xp_sc[...] = jnp.dot(x2d_ref[...], wih_ref[...],
                         preferred_element_type=jnp.float32)

    # --- serial recurrence; h/c carried in registers, time loop unrolled ------
    h0 = jnp.zeros((Bp, HP), jnp.float32)   # PyTorch init_hidden(): zeros
    c0 = jnp.zeros((Bp, HP), jnp.float32)

    def sigmoid_eup(x):
        # sigmoid(x) == 0.5*tanh(x/2) + 0.5 : one EUP push instead of two.  [R1]
        return 0.5 * jnp.tanh(0.5 * x) + 0.5

    def step(t, carry):
        h, c = carry
        row = pl.multiple_of(t * Bp, 8)                       # Bp % 8 == 0
        # recurrent dot kept in f32 (accuracy over 8 serial steps).        [R2]
        gates = (xp_sc[pl.ds(row, Bp), :]
                 + jnp.dot(h, whh_ref[...],
                           preferred_element_type=jnp.float32))  # (Bp, 4*HP)

        # 128-lane-aligned gate slices (gate order [i, f, g, o]); padding lanes
        # carry zero weights/bias so padded h/c lanes stay exactly zero.
        i_g = sigmoid_eup(gates[:, 0 * HP:1 * HP])
        f_g = sigmoid_eup(gates[:, 1 * HP:2 * HP])
        g_g = jnp.tanh(gates[:, 2 * HP:3 * HP])
        o_g = sigmoid_eup(gates[:, 3 * HP:4 * HP])

        c_new = f_g * c + i_g * g_g
        h_new = o_g * jnp.tanh(c_new)

        hall_sc[pl.ds(row, Bp), :] = h_new                    # single 128-lane store
        return (h_new, c_new)

    lax.fori_loop(0, T, step, (h0, c0), unroll=True)

    # --- hoisted output Linear over all (T*Bp) hidden states (bf16 MXU) -------
    out_ref[...] = (jnp.dot(hall_sc[...].astype(jnp.bfloat16), wlin_ref[...],
                            preferred_element_type=jnp.float32)
                    + blin_ref[...]).astype(out_ref.dtype)


# ----------------------------------------------------------------------------
# One-time weight preparation (hoisted out of the forward path).          [R4]
# ----------------------------------------------------------------------------
HP = 128   # per-gate / hidden lane-block width (H=50 zero-padded to 128)
OP = 128   # padded output width (lane-dense output slab)


def prepare_lstm_params(w_ih, w_hh, b_ih, b_hh, w_lin, b_lin):
    """Pad/transpose/cast all weights ONCE; returns (params_tuple, d_out)."""
    four_h, d_in = w_ih.shape
    h = four_h // 4
    d_out = w_lin.shape[0]
    kp = _round_up(d_in + 1, 8)          # +1 lane for the folded bias

    def pad_gate_cols(m):                # (..., 4H) -> (..., 4*HP), one block per gate
        blocks = [
            jnp.pad(m[..., k * h:(k + 1) * h],
                    [(0, 0)] * (m.ndim - 1) + [(0, HP - h)])
            for k in range(4)
        ]
        return jnp.concatenate(blocks, axis=-1)

    # W_ih^T with (b_ih + b_hh) folded in as row d_in (matches the 1.0 lane of x2d).
    wih_p = pad_gate_cols(jnp.transpose(w_ih).astype(jnp.float32))   # (d_in, 4*HP)
    bias_row = pad_gate_cols((b_ih + b_hh).astype(jnp.float32)[None, :])
    wih_p = jnp.concatenate([wih_p, bias_row], axis=0)               # (d_in+1, 4*HP)
    wih_p = jnp.pad(wih_p, ((0, kp - d_in - 1), (0, 0)))             # (kp, 4*HP)
    wih_p = wih_p.astype(jnp.bfloat16)                               # bf16 MXU operand

    whh_p = pad_gate_cols(jnp.transpose(w_hh).astype(jnp.float32))   # (h, 4*HP)
    whh_p = jnp.pad(whh_p, ((0, HP - h), (0, 0)))                    # (HP, 4*HP) f32

    wlin_p = jnp.pad(jnp.transpose(w_lin).astype(jnp.float32),
                     ((0, HP - h), (0, OP - d_out))).astype(jnp.bfloat16)   # (HP, OP)
    blin_p = jnp.pad(b_lin.astype(jnp.float32)[None, :],
                     ((0, 0), (0, OP - d_out)))                      # (1, OP) f32

    return (wih_p, whh_p, wlin_p, blin_p), d_out


# ----------------------------------------------------------------------------
# Jitted forward: only x layout + pallas_call (no weight prep per call).  [R4]
# ----------------------------------------------------------------------------
@functools.partial(jax.jit, static_argnames=("d_out",))
def lstm_model_forward(x, params, *, d_out):
    """x: (B, T, D_in) batch-first (like the PyTorch module). Returns (B, T, d_out)."""
    wih_p, whh_p, wlin_p, blin_p = params
    B, T, D_in = x.shape
    Kp = wih_p.shape[0]

    # The module's init_hidden(dim*3*3) pins the batch size to dim*9 = 3*(dim*3).
    if B != 3 * D_in:
        raise ValueError(
            f"LSTMModel requires batch == dim*9 == 3*input_size "
            f"(got batch={B}, input_size={D_in}).")

    Bp = _round_up(B, 8)           # 8-aligned sublane rows per timestep

    # time-major, batch-padded input with a constant-1 bias lane at column D_in,
    # flattened to (T*Bp, Kp) and cast to bf16 for the hoisted MXU matmul.  [R2][R5]
    x_tm = jnp.transpose(x, (1, 0, 2)).astype(jnp.bfloat16)          # (T, B, D_in)
    x_tm = jnp.pad(x_tm, ((0, 0), (0, Bp - B), (0, 0)))              # (T, Bp, D_in)
    ones = jnp.ones((T, Bp, 1), jnp.bfloat16)
    x_tm = jnp.concatenate([x_tm, ones], axis=-1)                    # bias lane
    x_tm = jnp.pad(x_tm, ((0, 0), (0, 0), (0, Kp - D_in - 1)))       # (T, Bp, Kp)
    x2d = x_tm.reshape(T * Bp, Kp)

    kernel = functools.partial(lstm_linear_kernel, T=T, Bp=Bp, HP=HP)

    out2d = pl.pallas_call(
        kernel,
        out_shape=jax.ShapeDtypeStruct((T * Bp, OP), jnp.float32),
        in_specs=[pl.BlockSpec(memory_space=pltpu.MemorySpace.VMEM)] * 5,
        out_specs=pl.BlockSpec(memory_space=pltpu.MemorySpace.VMEM),
        scratch_shapes=[pltpu.VMEM((T * Bp, 4 * HP), jnp.float32),
                        pltpu.VMEM((T * Bp, HP), jnp.float32)],
    )(x2d, wih_p, whh_p, wlin_p, blin_p)

    out = out2d.reshape(T, Bp, OP)[:, :B, :d_out]                    # strip padding
    return jnp.transpose(out, (1, 0, 2)).astype(x.dtype)             # (B, T, d_out)


# ----------------------------------------------------------------------------
# Pure-JAX f32 reference (mirrors PyTorch nn.LSTM + nn.Linear semantics).
# ----------------------------------------------------------------------------
def reference_forward(x, w_ih, w_hh, b_ih, b_hh, w_lin, b_lin):
    B, T, D_in = x.shape
    H = w_hh.shape[1]
    h = jnp.zeros((B, H), jnp.float32)
    c = jnp.zeros((B, H), jnp.float32)

    def step(carry, x_t):
        h, c = carry
        gates = x_t @ w_ih.T + b_ih + h @ w_hh.T + b_hh
        i_g = jax.nn.sigmoid(gates[:, 0 * H:1 * H])
        f_g = jax.nn.sigmoid(gates[:, 1 * H:2 * H])
        g_g = jnp.tanh(gates[:, 2 * H:3 * H])
        o_g = jax.nn.sigmoid(gates[:, 3 * H:4 * H])
        c_new = f_g * c + i_g * g_g
        h_new = o_g * jnp.tanh(c_new)
        return (h_new, c_new), h_new

    (_, _), hs = lax.scan(step, (h, c), jnp.transpose(x, (1, 0, 2)))
    hs = jnp.transpose(hs, (1, 0, 2))             # (B, T, H)
    return hs @ w_lin.T + b_lin


if __name__ == "__main__":
    # Module hyper-parameters: dim=2 -> input/output size 6, hidden 50,
    # batch = dim*3*3 = 18 (forced by init_hidden), sequence length 8.
    dim = 2
    D_in = dim * 3
    D_out = dim * 3
    H = 50
    B = dim * 3 * 3
    T = 8

    key = jax.random.PRNGKey(0)
    ks = jax.random.split(key, 7)
    bound = 1.0 / jnp.sqrt(jnp.float32(H))   # PyTorch default uniform init range

    w_ih = jax.random.uniform(ks[0], (4 * H, D_in), jnp.float32, -bound, bound)
    w_hh = jax.random.uniform(ks[1], (4 * H, H), jnp.float32, -bound, bound)
    b_ih = jax.random.uniform(ks[2], (4 * H,), jnp.float32, -bound, bound)
    b_hh = jax.random.uniform(ks[3], (4 * H,), jnp.float32, -bound, bound)
    w_lin = jax.random.uniform(ks[4], (D_out, H), jnp.float32, -bound, bound)
    b_lin = jax.random.uniform(ks[5], (D_out,), jnp.float32, -bound, bound)

    x = jax.random.normal(ks[6], (B, T, D_in), jnp.float32)

    # Weight prep runs ONCE, outside the jitted forward path.            [R4]
    params, d_out = prepare_lstm_params(w_ih, w_hh, b_ih, b_hh, w_lin, b_lin)
    params = jax.block_until_ready(params)

    out = lstm_model_forward(x, params, d_out=d_out)
    out = jax.block_until_ready(out)

    ref = reference_forward(x, w_ih, w_hh, b_ih, b_hh, w_lin, b_lin)
    assert out.shape == (B, T, D_out), out.shape
    # bf16 operands on the two hoisted matmuls (per perf review) shift numerics by
    # ~1e-3 vs the pure-f32 reference; 1e-2 is the standard bf16-matmul tolerance.
    err = float(jnp.max(jnp.abs(out - ref)))
    assert jnp.allclose(out, ref, atol=1e-2, rtol=1e-2), err

    print("KERNEL_OK")
</pallas_src>

<mosaic_0001>
module attributes {stable_mosaic.version = 11 : i64} {
  func.func @lstm_linear_kernel(%arg0: memref<192x8xbf16, #tpu.memory_space<vmem>>, %arg1: memref<8x512xbf16, #tpu.memory_space<vmem>>, %arg2: memref<128x512xf32, #tpu.memory_space<vmem>>, %arg3: memref<128x128xbf16, #tpu.memory_space<vmem>>, %arg4: memref<1x128xf32, #tpu.memory_space<vmem>>, %arg5: memref<192x128xf32, #tpu.memory_space<vmem>>, %arg6: memref<192x512xf32, #tpu.memory_space<vmem>>, %arg7: memref<192x128xf32, #tpu.memory_space<vmem>>) attributes {dimension_semantics = [], scalar_prefetch = 0 : i64, scratch_operands = 2 : i64, tpu.core_type = #tpu.core_type<tc>} {
    %c0 = arith.constant 0 : index
    %c0_0 = arith.constant 0 : index
    %0 = vector.load %arg0[%c0, %c0_0] : memref<192x8xbf16, #tpu.memory_space<vmem>>, vector<192x8xbf16>
    %c0_1 = arith.constant 0 : index
    %c0_2 = arith.constant 0 : index
    %1 = vector.load %arg1[%c0_1, %c0_2] : memref<8x512xbf16, #tpu.memory_space<vmem>>, vector<8x512xbf16>
    %cst = arith.constant dense<0.000000e+00> : vector<192x512xf32>
    %2 = tpu.matmul %0, %1, %cst {dimension_numbers = #tpu.dot_dimension_numbers<[1], [0], [0], [1], [0, 0, 1, 1], [], []>} : vector<192x8xbf16>, vector<8x512xbf16>, vector<192x512xf32> -> vector<192x512xf32>
    %c0_3 = arith.constant 0 : index
    %c0_4 = arith.constant 0 : index
    %3 = vector.load %arg6[%c0_3, %c0_4] : memref<192x512xf32, #tpu.memory_space<vmem>>, vector<192x512xf32>
    tpu.vector_store %arg6[%c0_3, %c0_4], %2 {strides = array<i32>} : memref<192x512xf32, #tpu.memory_space<vmem>>, vector<192x512xf32>,
    %cst_5 = arith.constant 0.000000e+00 : f32
    %4 = vector.broadcast %cst_5 : f32 to vector<24x128xf32>
    %cst_6 = arith.constant 0.000000e+00 : f32
    %5 = vector.broadcast %cst_6 : f32 to vector<24x128xf32>
    %c0_i32 = arith.constant 0 : i32
    %c24_i32 = arith.constant 24 : i32
    %6 = arith.muli %c0_i32, %c24_i32 : i32
    %7 = tpu.assume_multiple %6, 8 : i32
    %8 = arith.index_cast %7 : i32 to index
    %c0_7 = arith.constant 0 : index
    %9 = vector.load %arg6[%8, %c0_7] : memref<192x512xf32, #tpu.memory_space<vmem>>, vector<24x512xf32>
    %c0_8 = arith.constant 0 : index
    %c0_9 = arith.constant 0 : index
    %10 = vector.load %arg2[%c0_8, %c0_9] : memref<128x512xf32, #tpu.memory_space<vmem>>, vector<128x512xf32>
    %cst_10 = arith.constant dense<0.000000e+00> : vector<24x512xf32>
    %11 = tpu.matmul %4, %10, %cst_10 {dimension_numbers = #tpu.dot_dimension_numbers<[1], [0], [0], [1], [0, 0, 1, 1], [], []>} : vector<24x128xf32>, vector<128x512xf32>, vector<24x512xf32> -> vector<24x512xf32>
    %12 = arith.addf %9, %11 : vector<24x512xf32>
    %13 = vector.extract_strided_slice %12 {offsets = [0, 0], sizes = [24, 128], strides = [1, 1]} : vector<24x512xf32> to vector<24x128xf32>
    %cst_11 = arith.constant 5.000000e-01 : f32
    %14 = vector.broadcast %cst_11 : f32 to vector<24x128xf32>
    %15 = arith.mulf %14, %13 : vector<24x128xf32>
    %16 = math.tanh %15 : vector<24x128xf32>
    %cst_12 = arith.constant 5.000000e-01 : f32
    %17 = vector.broadcast %cst_12 : f32 to vector<24x128xf32>
    %18 = arith.mulf %17, %16 : vector<24x128xf32>
    %cst_13 = arith.constant 5.000000e-01 : f32
    %19 = vector.broadcast %cst_13 : f32 to vector<24x128xf32>
    %20 = arith.addf %18, %19 : vector<24x128xf32>
    %21 = vector.extract_strided_slice %12 {offsets = [0, 128], sizes = [24, 128], strides = [1, 1]} : vector<24x512xf32> to vector<24x128xf32>
    %cst_14 = arith.constant 5.000000e-01 : f32
    %22 = vector.broadcast %cst_14 : f32 to vector<24x128xf32>
    %23 = arith.mulf %22, %21 : vector<24x128xf32>
    %24 = math.tanh %23 : vector<24x128xf32>
    %cst_15 = arith.constant 5.000000e-01 : f32
    %25 = vector.broadcast %cst_15 : f32 to vector<24x128xf32>
    %26 = arith.mulf %25, %24 : vector<24x128xf32>
    %cst_16 = arith.constant 5.000000e-01 : f32
    %27 = vector.broadcast %cst_16 : f32 to vector<24x128xf32>
    %28 = arith.addf %26, %27 : vector<24x128xf32>
    %29 = vector.extract_strided_slice %12 {offsets = [0, 256], sizes = [24, 128], strides = [1, 1]} : vector<24x512xf32> to vector<24x128xf32>
    %30 = math.tanh %29 : vector<24x128xf32>
    %31 = vector.extract_strided_slice %12 {offsets = [0, 384], sizes = [24, 128], strides = [1, 1]} : vector<24x512xf32> to vector<24x128xf32>
    %cst_17 = arith.constant 5.000000e-01 : f32
    %32 = vector.broadcast %cst_17 : f32 to vector<24x128xf32>
    %33 = arith.mulf %32, %31 : vector<24x128xf32>
    %34 = math.tanh %33 : vector<24x128xf32>
    %cst_18 = arith.constant 5.000000e-01 : f32
    %35 = vector.broadcast %cst_18 : f32 to vector<24x128xf32>
    %36 = arith.mulf %35, %34 : vector<24x128xf32>
    %cst_19 = arith.constant 5.000000e-01 : f32
    %37 = vector.broadcast %cst_19 : f32 to vector<24x128xf32>
    %38 = arith.addf %36, %37 : vector<24x128xf32>
    %39 = arith.mulf %28, %5 : vector<24x128xf32>
    %40 = arith.mulf %20, %30 : vector<24x128xf32>
    %41 = arith.addf %39, %40 : vector<24x128xf32>
    %42 = math.tanh %41 : vector<24x128xf32>
    %43 = arith.mulf %38, %42 : vector<24x128xf32>
    %44 = arith.index_cast %7 : i32 to index
    %c0_20 = arith.constant 0 : index
    %45 = vector.load %arg7[%44, %c0_20] : memref<192x128xf32, #tpu.memory_space<vmem>>, vector<24x128xf32>
    tpu.vector_store %arg7[%44, %c0_20], %43 {strides = array<i32>} : memref<192x128xf32, #tpu.memory_space<vmem>>, vector<24x128xf32>,
    %c1_i32 = arith.constant 1 : i32
    %c24_i32_21 = arith.constant 24 : i32
    %46 = arith.muli %c1_i32, %c24_i32_21 : i32
    %47 = tpu.assume_multiple %46, 8 : i32
    %48 = arith.index_cast %47 : i32 to index
    %c0_22 = arith.constant 0 : index
    %49 = vector.load %arg6[%48, %c0_22] : memref<192x512xf32, #tpu.memory_space<vmem>>, vector<24x512xf32>
    %c0_23 = arith.constant 0 : index
    %c0_24 = arith.constant 0 : index
    %50 = vector.load %arg2[%c0_23, %c0_24] : memref<128x512xf32, #tpu.memory_space<vmem>>, vector<128x512xf32>
    %cst_25 = arith.constant dense<0.000000e+00> : vector<24x512xf32>
    %51 = tpu.matmul %43, %50, %cst_25 {dimension_numbers = #tpu.dot_dimension_numbers<[1], [0], [0], [1], [0, 0, 1, 1], [], []>} : vector<24x128xf32>, vector<128x512xf32>, vector<24x512xf32> -> vector<24x512xf32>
    %52 = arith.addf %49, %51 : vector<24x512xf32>
    %53 = vector.extract_strided_slice %52 {offsets = [0, 0], sizes = [24, 128], strides = [1, 1]} : vector<24x512xf32> to vector<24x128xf32>
    %cst_26 = arith.constant 5.000000e-01 : f32
    %54 = vector.broadcast %cst_26 : f32 to vector<24x128xf32>
    %55 = arith.mulf %54, %53 : vector<24x128xf32>
    %56 = math.tanh %55 : vector<24x128xf32>
    %cst_27 = arith.constant 5.000000e-01 : f32
    %57 = vector.broadcast %cst_27 : f32 to vector<24x128xf32>
    %58 = arith.mulf %57, %56 : vector<24x128xf32>
    %cst_28 = arith.constant 5.000000e-01 : f32
    %59 = vector.broadcast %cst_28 : f32 to vector<24x128xf32>
    %60 = arith.addf %58, %59 : vector<24x128xf32>
    %61 = vector.extract_strided_slice %52 {offsets = [0, 128], sizes = [24, 128], strides = [1, 1]} : vector<24x512xf32> to vector<24x128xf32>
    %cst_29 = arith.constant 5.000000e-01 : f32
    %62 = vector.broadcast %cst_29 : f32 to vector<24x128xf32>
    %63 = arith.mulf %62, %61 : vector<24x128xf32>
    %64 = math.tanh %63 : vector<24x128xf32>
    %cst_30 = arith.constant 5.000000e-01 : f32
    %65 = vector.broadcast %cst_30 : f32 to vector<24x128xf32>
    %66 = arith.mulf %65, %64 : vector<24x128xf32>
    %cst_31 = arith.constant 5.000000e-01 : f32
    %67 = vector.broadcast %cst_31 : f32 to vector<24x128xf32>
    %68 = arith.addf %66, %67 : vector<24x128xf32>
    %69 = vector.extract_strided_slice %52 {offsets = [0, 256], sizes = [24, 128], strides = [1, 1]} : vector<24x512xf32> to vector<24x128xf32>
    %70 = math.tanh %69 : vector<24x128xf32>
    %71 = vector.extract_strided_slice %52 {offsets = [0, 384], sizes = [24, 128], strides = [1, 1]} : vector<24x512xf32> to vector<24x128xf32>
    %cst_32 = arith.constant 5.000000e-01 : f32
    %72 = vector.broadcast %cst_32 : f32 to vector<24x128xf32>
    %73 = arith.mulf %72, %71 : vector<24x128xf32>
    %74 = math.tanh %73 : vector<24x128xf32>
    %cst_33 = arith.constant 5.000000e-01 : f32
    %75 = vector.broadcast %cst_33 : f32 to vector<24x128xf32>
    %76 = arith.mulf %75, %74 : vector<24x128xf32>
    %cst_34 = arith.constant 5.000000e-01 : f32
    %77 = vector.broadcast %cst_34 : f32 to vector<24x128xf32>
    %78 = arith.addf %76, %77 : vector<24x128xf32>
    %79 = arith.mulf %68, %41 : vector<24x128xf32>
    %80 = arith.mulf %60, %70 : vector<24x128xf32>
    %81 = arith.addf %79, %80 : vector<24x128xf32>
    %82 = math.tanh %81 : vector<24x128xf32>
    %83 = arith.mulf %78, %82 : vector<24x128xf32>
    %84 = arith.index_cast %47 : i32 to index
    %c0_35 = arith.constant 0 : index
    %85 = vector.load %arg7[%84, %c0_35] : memref<192x128xf32, #tpu.memory_space<vmem>>, vector<24x128xf32>
    tpu.vector_store %arg7[%84, %c0_35], %83 {strides = array<i32>} : memref<192x128xf32, #tpu.memory_space<vmem>>, vector<24x128xf32>,
    %c2_i32 = arith.constant 2 : i32
    %c24_i32_36 = arith.constant 24 : i32
    %86 = arith.muli %c2_i32, %c24_i32_36 : i32
    %87 = tpu.assume_multiple %86, 8 : i32
    %88 = arith.index_cast %87 : i32 to index
    %c0_37 = arith.constant 0 : index
    %89 = vector.load %arg6[%88, %c0_37] : memref<192x512xf32, #tpu.memory_space<vmem>>, vector<24x512xf32>
    %c0_38 = arith.constant 0 : index
    %c0_39 = arith.constant 0 : index
    %90 = vector.load %arg2[%c0_38, %c0_39] : memref<128x512xf32, #tpu.memory_space<vmem>>, vector<128x512xf32>
    %cst_40 = arith.constant dense<0.000000e+00> : vector<24x512xf32>
    %91 = tpu.matmul %83, %90, %cst_40 {dimension_numbers = #tpu.dot_dimension_numbers<[1], [0], [0], [1], [0, 0, 1, 1], [], []>} : vector<24x128xf32>, vector<128x512xf32>, vector<24x512xf32> -> vector<24x512xf32>
    %92 = arith.addf %89, %91 : vector<24x512xf32>
    %93 = vector.extract_strided_slice %92 {offsets = [0, 0], sizes = [24, 128], strides = [1, 1]} : vector<24x512xf32> to vector<24x128xf32>
    %cst_41 = arith.constant 5.000000e-01 : f32
    %94 = vector.broadcast %cst_41 : f32 to vector<24x128xf32>
    %95 = arith.mulf %94, %93 : vector<24x128xf32>
    %96 = math.tanh %95 : vector<24x128xf32>
    %cst_42 = arith.constant 5.000000e-01 : f32
    %97 = vector.broadcast %cst_42 : f32 to vector<24x128xf32>
    %98 = arith.mulf %97, %96 : vector<24x128xf32>
    %cst_43 = arith.constant 5.000000e-01 : f32
    %99 = vector.broadcast %cst_43 : f32 to vector<24x128xf32>
    %100 = arith.addf %98, %99 : vector<24x128xf32>
    %101 = vector.extract_strided_slice %92 {offsets = [0, 128], sizes = [24, 128], strides = [1, 1]} : vector<24x512xf32> to vector<24x128xf32>
    %cst_44 = arith.constant 5.000000e-01 : f32
    %102 = vector.broadcast %cst_44 : f32 to vector<24x128xf32>
    %103 = arith.mulf %102, %101 : vector<24x128xf32>
    %104 = math.tanh %103 : vector<24x128xf32>
    %cst_45 = arith.constant 5.000000e-01 : f32
    %105 = vector.broadcast %cst_45 : f32 to vector<24x128xf32>
    %106 = arith.mulf %105, %104 : vector<24x128xf32>
    %cst_46 = arith.constant 5.000000e-01 : f32
    %107 = vector.broadcast %cst_46 : f32 to vector<24x128xf32>
    %108 = arith.addf %106, %107 : vector<24x128xf32>
    %109 = vector.extract_strided_slice %92 {offsets = [0, 256], sizes = [24, 128], strides = [1, 1]} : vector<24x512xf32> to vector<24x128xf32>
    %110 = math.tanh %109 : vector<24x128xf32>
    %111 = vector.extract_strided_slice %92 {offsets = [0, 384], sizes = [24, 128], strides = [1, 1]} : vector<24x512xf32> to vector<24x128xf32>
    %cst_47 = arith.constant 5.000000e-01 : f32
    %112 = vector.broadcast %cst_47 : f32 to vector<24x128xf32>
    %113 = arith.mulf %112, %111 : vector<24x128xf32>
    %114 = math.tanh %113 : vector<24x128xf32>
    %cst_48 = arith.constant 5.000000e-01 : f32
    %115 = vector.broadcast %cst_48 : f32 to vector<24x128xf32>
    %116 = arith.mulf %115, %114 : vector<24x128xf32>
    %cst_49 = arith.constant 5.000000e-01 : f32
    %117 = vector.broadcast %cst_49 : f32 to vector<24x128xf32>
    %118 = arith.addf %116, %117 : vector<24x128xf32>
    %119 = arith.mulf %108, %81 : vector<24x128xf32>
    %120 = arith.mulf %100, %110 : vector<24x128xf32>
    %121 = arith.addf %119, %120 : vector<24x128xf32>
    %122 = math.tanh %121 : vector<24x128xf32>
    %123 = arith.mulf %118, %122 : vector<24x128xf32>
    %124 = arith.index_cast %87 : i32 to index
    %c0_50 = arith.constant 0 : index
    %125 = vector.load %arg7[%124, %c0_50] : memref<192x128xf32, #tpu.memory_space<vmem>>, vector<24x128xf32>
    tpu.vector_store %arg7[%124, %c0_50], %123 {strides = array<i32>} : memref<192x128xf32, #tpu.memory_space<vmem>>, vector<24x128xf32>,
    %c3_i32 = arith.constant 3 : i32
    %c24_i32_51 = arith.constant 24 : i32
    %126 = arith.muli %c3_i32, %c24_i32_51 : i32
    %127 = tpu.assume_multiple %126, 8 : i32
    %128 = arith.index_cast %127 : i32 to index
    %c0_52 = arith.constant 0 : index
    %129 = vector.load %arg6[%128, %c0_52] : memref<192x512xf32, #tpu.memory_space<vmem>>, vector<24x512xf32>
    %c0_53 = arith.constant 0 : index
    %c0_54 = arith.constant 0 : index
    %130 = vector.load %arg2[%c0_53, %c0_54] : memref<128x512xf32, #tpu.memory_space<vmem>>, vector<128x512xf32>
    %cst_55 = arith.constant dense<0.000000e+00> : vector<24x512xf32>
    %131 = tpu.matmul %123, %130, %cst_55 {dimension_numbers = #tpu.dot_dimension_numbers<[1], [0], [0], [1], [0, 0, 1, 1], [], []>} : vector<24x128xf32>, vector<128x512xf32>, vector<24x512xf32> -> vector<24x512xf32>
    %132 = arith.addf %129, %131 : vector<24x512xf32>
    %133 = vector.extract_strided_slice %132 {offsets = [0, 0], sizes = [24, 128], strides = [1, 1]} : vector<24x512xf32> to vector<24x128xf32>
    %cst_56 = arith.constant 5.000000e-01 : f32
    %134 = vector.broadcast %cst_56 : f32 to vector<24x128xf32>
    %135 = arith.mulf %134, %133 : vector<24x128xf32>
    %136 = math.tanh %135 : vector<24x128xf32>
    %cst_57 = arith.constant 5.000000e-01 : f32
    %137 = vector.broadcast %cst_57 : f32 to vector<24x128xf32>
    %138 = arith.mulf %137, %136 : vector<24x128xf32>
    %cst_58 = arith.constant 5.000000e-01 : f32
    %139 = vector.broadcast %cst_58 : f32 to vector<24x128xf32>
    %140 = arith.addf %138, %139 : vector<24x128xf32>
    %141 = vector.extract_strided_slice %132 {offsets = [0, 128], sizes = [24, 128], strides = [1, 1]} : vector<24x512xf32> to vector<24x128xf32>
    %cst_59 = arith.constant 5.000000e-01 : f32
    %142 = vector.broadcast %cst_59 : f32 to vector<24x128xf32>
    %143 = arith.mulf %142, %141 : vector<24x128xf32>
    %144 = math.tanh %143 : vector<24x128xf32>
    %cst_60 = arith.constant 5.000000e-01 : f32
    %145 = vector.broadcast %cst_60 : f32 to vector<24x128xf32>
    %146 = arith.mulf %145, %144 : vector<24x128xf32>
    %cst_61 = arith.constant 5.000000e-01 : f32
    %147 = vector.broadcast %cst_61 : f32 to vector<24x128xf32>
    %148 = arith.addf %146, %147 : vector<24x128xf32>
    %149 = vector.extract_strided_slice %132 {offsets = [0, 256], sizes = [24, 128], strides = [1, 1]} : vector<24x512xf32> to vector<24x128xf32>
    %150 = math.tanh %149 : vector<24x128xf32>
    %151 = vector.extract_strided_slice %132 {offsets = [0, 384], sizes = [24, 128], strides = [1, 1]} : vector<24x512xf32> to vector<24x128xf32>
    %cst_62 = arith.constant 5.000000e-01 : f32
    %152 = vector.broadcast %cst_62 : f32 to vector<24x128xf32>
    %153 = arith.mulf %152, %151 : vector<24x128xf32>
    %154 = math.tanh %153 : vector<24x128xf32>
    %cst_63 = arith.constant 5.000000e-01 : f32
    %155 = vector.broadcast %cst_63 : f32 to vector<24x128xf32>
    %156 = arith.mulf %155, %154 : vector<24x128xf32>
    %cst_64 = arith.constant 5.000000e-01 : f32
    %157 = vector.broadcast %cst_64 : f32 to vector<24x128xf32>
    %158 = arith.addf %156, %157 : vector<24x128xf32>
    %159 = arith.mulf %148, %121 : vector<24x128xf32>
    %160 = arith.mulf %140, %150 : vector<24x128xf32>
    %161 = arith.addf %159, %160 : vector<24x128xf32>
    %162 = math.tanh %161 : vector<24x128xf32>
    %163 = arith.mulf %158, %162 : vector<24x128xf32>
    %164 = arith.index_cast %127 : i32 to index
    %c0_65 = arith.constant 0 : index
    %165 = vector.load %arg7[%164, %c0_65] : memref<192x128xf32, #tpu.memory_space<vmem>>, vector<24x128xf32>
    tpu.vector_store %arg7[%164, %c0_65], %163 {strides = array<i32>} : memref<192x128xf32, #tpu.memory_space<vmem>>, vector<24x128xf32>,
    %c4_i32 = arith.constant 4 : i32
    %c24_i32_66 = arith.constant 24 : i32
    %166 = arith.muli %c4_i32, %c24_i32_66 : i32
    %167 = tpu.assume_multiple %166, 8 : i32
    %168 = arith.index_cast %167 : i32 to index
    %c0_67 = arith.constant 0 : index
    %169 = vector.load %arg6[%168, %c0_67] : memref<192x512xf32, #tpu.memory_space<vmem>>, vector<24x512xf32>
    %c0_68 = arith.constant 0 : index
    %c0_69 = arith.constant 0 : index
    %170 = vector.load %arg2[%c0_68, %c0_69] : memref<128x512xf32, #tpu.memory_space<vmem>>, vector<128x512xf32>
    %cst_70 = arith.constant dense<0.000000e+00> : vector<24x512xf32>
    %171 = tpu.matmul %163, %170, %cst_70 {dimension_numbers = #tpu.dot_dimension_numbers<[1], [0], [0], [1], [0, 0, 1, 1], [], []>} : vector<24x128xf32>, vector<128x512xf32>, vector<24x512xf32> -> vector<24x512xf32>
    %172 = arith.addf %169, %171 : vector<24x512xf32>
    %173 = vector.extract_strided_slice %172 {offsets = [0, 0], sizes = [24, 128], strides = [1, 1]} : vector<24x512xf32> to vector<24x128xf32>
    %cst_71 = arith.constant 5.000000e-01 : f32
    %174 = vector.broadcast %cst_71 : f32 to vector<24x128xf32>
    %175 = arith.mulf %174, %173 : vector<24x128xf32>
    %176 = math.tanh %175 : vector<24x128xf32>
    %cst_72 = arith.constant 5.000000e-01 : f32
    %177 = vector.broadcast %cst_72 : f32 to vector<24x128xf32>
    %178 = arith.mulf %177, %176 : vector<24x128xf32>
    %cst_73 = arith.constant 5.000000e-01 : f32
    %179 = vector.broadcast %cst_73 : f32 to vector<24x128xf32>
    %180 = arith.addf %178, %179 : vector<24x128xf32>
    %181 = vector.extract_strided_slice %172 {offsets = [0, 128], sizes = [24, 128], strides = [1, 1]} : vector<24x512xf32> to vector<24x128xf32>
    %cst_74 = arith.constant 5.000000e-01 : f32
    %182 = vector.broadcast %cst_74 : f32 to vector<24x128xf32>
    %183 = arith.mulf %182, %181 : vector<24x128xf32>
    %184 = math.tanh %183 : vector<24x128xf32>
    %cst_75 = arith.constant 5.000000e-01 : f32
    %185 = vector.broadcast %cst_75 : f32 to vector<24x128xf32>
    %186 = arith.mulf %185, %184 : vector<24x128xf32>
    %cst_76 = arith.constant 5.000000e-01 : f32
    %187 = vector.broadcast %cst_76 : f32 to vector<24x128xf32>
    %188 = arith.addf %186, %187 : vector<24x128xf32>
    %189 = vector.extract_strided_slice %172 {offsets = [0, 256], sizes = [24, 128], strides = [1, 1]} : vector<24x512xf32> to vector<24x128xf32>
    %190 = math.tanh %189 : vector<24x128xf32>
    %191 = vector.extract_strided_slice %172 {offsets = [0, 384], sizes = [24, 128], strides = [1, 1]} : vector<24x512xf32> to vector<24x128xf32>
    %cst_77 = arith.constant 5.000000e-01 : f32
    %192 = vector.broadcast %cst_77 : f32 to vector<24x128xf32>
    %193 = arith.mulf %192, %191 : vector<24x128xf32>
    %194 = math.tanh %193 : vector<24x128xf32>
    %cst_78 = arith.constant 5.000000e-01 : f32
    %195 = vector.broadcast %cst_78 : f32 to vector<24x128xf32>
    %196 = arith.mulf %195, %194 : vector<24x128xf32>
    %cst_79 = arith.constant 5.000000e-01 : f32
    %197 = vector.broadcast %cst_79 : f32 to vector<24x128xf32>
    %198 = arith.addf %196, %197 : vector<24x128xf32>
    %199 = arith.mulf %188, %161 : vector<24x128xf32>
    %200 = arith.mulf %180, %190 : vector<24x128xf32>
    %201 = arith.addf %199, %200 : vector<24x128xf32>
    %202 = math.tanh %201 : vector<24x128xf32>
    %203 = arith.mulf %198, %202 : vector<24x128xf32>
    %204 = arith.index_cast %167 : i32 to index
    %c0_80 = arith.constant 0 : index
    %205 = vector.load %arg7[%204, %c0_80] : memref<192x128xf32, #tpu.memory_space<vmem>>, vector<24x128xf32>
    tpu.vector_store %arg7[%204, %c0_80], %203 {strides = array<i32>} : memref<192x128xf32, #tpu.memory_space<vmem>>, vector<24x128xf32>,
    %c5_i32 = arith.constant 5 : i32
    %c24_i32_81 = arith.constant 24 : i32
    %206 = arith.muli %c5_i32, %c24_i32_81 : i32
    %207 = tpu.assume_multiple %206, 8 : i32
    %208 = arith.index_cast %207 : i32 to index
    %c0_82 = arith.constant 0 : index
    %209 = vector.load %arg6[%208, %c0_82] : memref<192x512xf32, #tpu.memory_space<vmem>>, vector<24x512xf32>
    %c0_83 = arith.constant 0 : index
    %c0_84 = arith.constant 0 : index
    %210 = vector.load %arg2[%c0_83, %c0_84] : memref<128x512xf32, #tpu.memory_space<vmem>>, vector<128x512xf32>
    %cst_85 = arith.constant dense<0.000000e+00> : vector<24x512xf32>
    %211 = tpu.matmul %203, %210, %cst_85 {dimension_numbers = #tpu.dot_dimension_numbers<[1], [0], [0], [1], [0, 0, 1, 1], [], []>} : vector<24x128xf32>, vector<128x512xf32>, vector<24x512xf32> -> vector<24x512xf32>
    %212 = arith.addf %209, %211 : vector<24x512xf32>
    %213 = vector.extract_strided_slice %212 {offsets = [0, 0], sizes = [24, 128], strides = [1, 1]} : vector<24x512xf32> to vector<24x128xf32>
    %cst_86 = arith.constant 5.000000e-01 : f32
    %214 = vector.broadcast %cst_86 : f32 to vector<24x128xf32>
    %215 = arith.mulf %214, %213 : vector<24x128xf32>
    %216 = math.tanh %215 : vector<24x128xf32>
    %cst_87 = arith.constant 5.000000e-01 : f32
    %217 = vector.broadcast %cst_87 : f32 to vector<24x128xf32>
    %218 = arith.mulf %217, %216 : vector<24x128xf32>
    %cst_88 = arith.constant 5.000000e-01 : f32
    %219 = vector.broadcast %cst_88 : f32 to vector<24x128xf32>
    %220 = arith.addf %218, %219 : vector<24x128xf32>
    %221 = vector.extract_strided_slice %212 {offsets = [0, 128], sizes = [24, 128], strides = [1, 1]} : vector<24x512xf32> to vector<24x128xf32>
    %cst_89 = arith.constant 5.000000e-01 : f32
    %222 = vector.broadcast %cst_89 : f32 to vector<24x128xf32>
    %223 = arith.mulf %222, %221 : vector<24x128xf32>
    %224 = math.tanh %223 : vector<24x128xf32>
    %cst_90 = arith.constant 5.000000e-01 : f32
    %225 = vector.broadcast %cst_90 : f32 to vector<24x128xf32>
    %226 = arith.mulf %225, %224 : vector<24x128xf32>
    %cst_91 = arith.constant 5.000000e-01 : f32
    %227 = vector.broadcast %cst_91 : f32 to vector<24x128xf32>
    %228 = arith.addf %226, %227 : vector<24x128xf32>
    %229 = vector.extract_strided_slice %212 {offsets = [0, 256], sizes = [24, 128], strides = [1, 1]} : vector<24x512xf32> to vector<24x128xf32>
    %230 = math.tanh %229 : vector<24x128xf32>
    %231 = vector.extract_strided_slice %212 {offsets = [0, 384], sizes = [24, 128], strides = [1, 1]} : vector<24x512xf32> to vector<24x128xf32>
    %cst_92 = arith.constant 5.000000e-01 : f32
    %232 = vector.broadcast %cst_92 : f32 to vector<24x128xf32>
    %233 = arith.mulf %232, %231 : vector<24x128xf32>
    %234 = math.tanh %233 : vector<24x128xf32>
    %cst_93 = arith.constant 5.000000e-01 : f32
    %235 = vector.broadcast %cst_93 : f32 to vector<24x128xf32>
    %236 = arith.mulf %235, %234 : vector<24x128xf32>
    %cst_94 = arith.constant 5.000000e-01 : f32
    %237 = vector.broadcast %cst_94 : f32 to vector<24x128xf32>
    %238 = arith.addf %236, %237 : vector<24x128xf32>
    %239 = arith.mulf %228, %201 : vector<24x128xf32>
    %240 = arith.mulf %220, %230 : vector<24x128xf32>
    %241 = arith.addf %239, %240 : vector<24x128xf32>
    %242 = math.tanh %241 : vector<24x128xf32>
    %243 = arith.mulf %238, %242 : vector<24x128xf32>
    %244 = arith.index_cast %207 : i32 to index
    %c0_95 = arith.constant 0 : index
    %245 = vector.load %arg7[%244, %c0_95] : memref<192x128xf32, #tpu.memory_space<vmem>>, vector<24x128xf32>
    tpu.vector_store %arg7[%244, %c0_95], %243 {strides = array<i32>} : memref<192x128xf32, #tpu.memory_space<vmem>>, vector<24x128xf32>,
    %c6_i32 = arith.constant 6 : i32
    %c24_i32_96 = arith.constant 24 : i32
    %246 = arith.muli %c6_i32, %c24_i32_96 : i32
    %247 = tpu.assume_multiple %246, 8 : i32
    %248 = arith.index_cast %247 : i32 to index
    %c0_97 = arith.constant 0 : index
    %249 = vector.load %arg6[%248, %c0_97] : memref<192x512xf32, #tpu.memory_space<vmem>>, vector<24x512xf32>
    %c0_98 = arith.constant 0 : index
    %c0_99 = arith.constant 0 : index
    %250 = vector.load %arg2[%c0_98, %c0_99] : memref<128x512xf32, #tpu.memory_space<vmem>>, vector<128x512xf32>
    %cst_100 = arith.constant dense<0.000000e+00> : vector<24x512xf32>
    %251 = tpu.matmul %243, %250, %cst_100 {dimension_numbers = #tpu.dot_dimension_numbers<[1], [0], [0], [1], [0, 0, 1, 1], [], []>} : vector<24x128xf32>, vector<128x512xf32>, vector<24x512xf32> -> vector<24x512xf32>
    %252 = arith.addf %249, %251 : vector<24x512xf32>
    %253 = vector.extract_strided_slice %252 {offsets = [0, 0], sizes = [24, 128], strides = [1, 1]} : vector<24x512xf32> to vector<24x128xf32>
    %cst_101 = arith.constant 5.000000e-01 : f32
    %254 = vector.broadcast %cst_101 : f32 to vector<24x128xf32>
    %255 = arith.mulf %254, %253 : vector<24x128xf32>
    %256 = math.tanh %255 : vector<24x128xf32>
    %cst_102 = arith.constant 5.000000e-01 : f32
    %257 = vector.broadcast %cst_102 : f32 to vector<24x128xf32>
    %258 = arith.mulf %257, %256 : vector<24x128xf32>
    %cst_103 = arith.constant 5.000000e-01 : f32
    %259 = vector.broadcast %cst_103 : f32 to vector<24x128xf32>
    %260 = arith.addf %258, %259 : vector<24x128xf32>
    %261 = vector.extract_strided_slice %252 {offsets = [0, 128], sizes = [24, 128], strides = [1, 1]} : vector<24x512xf32> to vector<24x128xf32>
    %cst_104 = arith.constant 5.000000e-01 : f32
    %262 = vector.broadcast %cst_104 : f32 to vector<24x128xf32>
    %263 = arith.mulf %262, %261 : vector<24x128xf32>
    %264 = math.tanh %263 : vector<24x128xf32>
    %cst_105 = arith.constant 5.000000e-01 : f32
    %265 = vector.broadcast %cst_105 : f32 to vector<24x128xf32>
    %266 = arith.mulf %265, %264 : vector<24x128xf32>
    %cst_106 = arith.constant 5.000000e-01 : f32
    %267 = vector.broadcast %cst_106 : f32 to vector<24x128xf32>
    %268 = arith.addf %266, %267 : vector<24x128xf32>
    %269 = vector.extract_strided_slice %252 {offsets = [0, 256], sizes = [24, 128], strides = [1, 1]} : vector<24x512xf32> to vector<24x128xf32>
    %270 = math.tanh %269 : vector<24x128xf32>
    %271 = vector.extract_strided_slice %252 {offsets = [0, 384], sizes = [24, 128], strides = [1, 1]} : vector<24x512xf32> to vector<24x128xf32>
    %cst_107 = arith.constant 5.000000e-01 : f32
    %272 = vector.broadcast %cst_107 : f32 to vector<24x128xf32>
    %273 = arith.mulf %272, %271 : vector<24x128xf32>
    %274 = math.tanh %273 : vector<24x128xf32>
    %cst_108 = arith.constant 5.000000e-01 : f32
    %275 = vector.broadcast %cst_108 : f32 to vector<24x128xf32>
    %276 = arith.mulf %275, %274 : vector<24x128xf32>
    %cst_109 = arith.constant 5.000000e-01 : f32
    %277 = vector.broadcast %cst_109 : f32 to vector<24x128xf32>
    %278 = arith.addf %276, %277 : vector<24x128xf32>
    %279 = arith.mulf %268, %241 : vector<24x128xf32>
    %280 = arith.mulf %260, %270 : vector<24x128xf32>
    %281 = arith.addf %279, %280 : vector<24x128xf32>
    %282 = math.tanh %281 : vector<24x128xf32>
    %283 = arith.mulf %278, %282 : vector<24x128xf32>
    %284 = arith.index_cast %247 : i32 to index
    %c0_110 = arith.constant 0 : index
    %285 = vector.load %arg7[%284, %c0_110] : memref<192x128xf32, #tpu.memory_space<vmem>>, vector<24x128xf32>
    tpu.vector_store %arg7[%284, %c0_110], %283 {strides = array<i32>} : memref<192x128xf32, #tpu.memory_space<vmem>>, vector<24x128xf32>,
    %c7_i32 = arith.constant 7 : i32
    %c24_i32_111 = arith.constant 24 : i32
    %286 = arith.muli %c7_i32, %c24_i32_111 : i32
    %287 = tpu.assume_multiple %286, 8 : i32
    %288 = arith.index_cast %287 : i32 to index
    %c0_112 = arith.constant 0 : index
    %289 = vector.load %arg6[%288, %c0_112] : memref<192x512xf32, #tpu.memory_space<vmem>>, vector<24x512xf32>
    %c0_113 = arith.constant 0 : index
    %c0_114 = arith.constant 0 : index
    %290 = vector.load %arg2[%c0_113, %c0_114] : memref<128x512xf32, #tpu.memory_space<vmem>>, vector<128x512xf32>
    %cst_115 = arith.constant dense<0.000000e+00> : vector<24x512xf32>
    %291 = tpu.matmul %283, %290, %cst_115 {dimension_numbers = #tpu.dot_dimension_numbers<[1], [0], [0], [1], [0, 0, 1, 1], [], []>} : vector<24x128xf32>, vector<128x512xf32>, vector<24x512xf32> -> vector<24x512xf32>
    %292 = arith.addf %289, %291 : vector<24x512xf32>
    %293 = vector.extract_strided_slice %292 {offsets = [0, 0], sizes = [24, 128], strides = [1, 1]} : vector<24x512xf32> to vector<24x128xf32>
    %cst_116 = arith.constant 5.000000e-01 : f32
    %294 = vector.broadcast %cst_116 : f32 to vector<24x128xf32>
    %295 = arith.mulf %294, %293 : vector<24x128xf32>
    %296 = math.tanh %295 : vector<24x128xf32>
    %cst_117 = arith.constant 5.000000e-01 : f32
    %297 = vector.broadcast %cst_117 : f32 to vector<24x128xf32>
    %298 = arith.mulf %297, %296 : vector<24x128xf32>
    %cst_118 = arith.constant 5.000000e-01 : f32
    %299 = vector.broadcast %cst_118 : f32 to vector<24x128xf32>
    %300 = arith.addf %298, %299 : vector<24x128xf32>
    %301 = vector.extract_strided_slice %292 {offsets = [0, 128], sizes = [24, 128], strides = [1, 1]} : vector<24x512xf32> to vector<24x128xf32>
    %cst_119 = arith.constant 5.000000e-01 : f32
    %302 = vector.broadcast %cst_119 : f32 to vector<24x128xf32>
    %303 = arith.mulf %302, %301 : vector<24x128xf32>
    %304 = math.tanh %303 : vector<24x128xf32>
    %cst_120 = arith.constant 5.000000e-01 : f32
    %305 = vector.broadcast %cst_120 : f32 to vector<24x128xf32>
    %306 = arith.mulf %305, %304 : vector<24x128xf32>
    %cst_121 = arith.constant 5.000000e-01 : f32
    %307 = vector.broadcast %cst_121 : f32 to vector<24x128xf32>
    %308 = arith.addf %306, %307 : vector<24x128xf32>
    %309 = vector.extract_strided_slice %292 {offsets = [0, 256], sizes = [24, 128], strides = [1, 1]} : vector<24x512xf32> to vector<24x128xf32>
    %310 = math.tanh %309 : vector<24x128xf32>
    %311 = vector.extract_strided_slice %292 {offsets = [0, 384], sizes = [24, 128], strides = [1, 1]} : vector<24x512xf32> to vector<24x128xf32>
    %cst_122 = arith.constant 5.000000e-01 : f32
    %312 = vector.broadcast %cst_122 : f32 to vector<24x128xf32>
    %313 = arith.mulf %312, %311 : vector<24x128xf32>
    %314 = math.tanh %313 : vector<24x128xf32>
    %cst_123 = arith.constant 5.000000e-01 : f32
    %315 = vector.broadcast %cst_123 : f32 to vector<24x128xf32>
    %316 = arith.mulf %315, %314 : vector<24x128xf32>
    %cst_124 = arith.constant 5.000000e-01 : f32
    %317 = vector.broadcast %cst_124 : f32 to vector<24x128xf32>
    %318 = arith.addf %316, %317 : vector<24x128xf32>
    %319 = arith.mulf %308, %281 : vector<24x128xf32>
    %320 = arith.mulf %300, %310 : vector<24x128xf32>
    %321 = arith.addf %319, %320 : vector<24x128xf32>
    %322 = math.tanh %321 : vector<24x128xf32>
    %323 = arith.mulf %318, %322 : vector<24x128xf32>
    %324 = arith.index_cast %287 : i32 to index
    %c0_125 = arith.constant 0 : index
    %325 = vector.load %arg7[%324, %c0_125] : memref<192x128xf32, #tpu.memory_space<vmem>>, vector<24x128xf32>
    tpu.vector_store %arg7[%324, %c0_125], %323 {strides = array<i32>} : memref<192x128xf32, #tpu.memory_space<vmem>>, vector<24x128xf32>,
    %c8_i32 = arith.constant 8 : i32
    %c0_126 = arith.constant 0 : index
    %c0_127 = arith.constant 0 : index
    %326 = vector.load %arg7[%c0_126, %c0_127] : memref<192x128xf32, #tpu.memory_space<vmem>>, vector<192x128xf32>
    %327 = arith.truncf %326 : vector<192x128xf32> to vector<192x128xbf16>
    %c0_128 = arith.constant 0 : index
    %c0_129 = arith.constant 0 : index
    %328 = vector.load %arg3[%c0_128, %c0_129] : memref<128x128xbf16, #tpu.memory_space<vmem>>, vector<128x128xbf16>
    %cst_130 = arith.constant dense<0.000000e+00> : vector<192x128xf32>
    %329 = tpu.matmul %327, %328, %cst_130 {dimension_numbers = #tpu.dot_dimension_numbers<[1], [0], [0], [1], [0, 0, 1, 1], [], []>} : vector<192x128xbf16>, vector<128x128xbf16>, vector<192x128xf32> -> vector<192x128xf32>
    %c0_131 = arith.constant 0 : index
    %c0_132 = arith.constant 0 : index
    %330 = vector.load %arg4[%c0_131, %c0_132] : memref<1x128xf32, #tpu.memory_space<vmem>>, vector<1x128xf32>
    %331 = vector.broadcast %330 : vector<1x128xf32> to vector<192x128xf32>
    %332 = arith.addf %329, %331 : vector<192x128xf32>
    %c0_133 = arith.constant 0 : index
    %c0_134 = arith.constant 0 : index
    %333 = vector.load %arg5[%c0_133, %c0_134] : memref<192x128xf32, #tpu.memory_space<vmem>>, vector<192x128xf32>
    tpu.vector_store %arg5[%c0_133, %c0_134], %332 {strides = array<i32>} : memref<192x128xf32, #tpu.memory_space<vmem>>, vector<192x128xf32>,
    return
  }
}

</mosaic_0001>

<bundles_post_ra>
// kernel: lstm_model_forward.1
= control target key start
LH: loop header
LB: loop body
LE: loop exit
PB: predicated region body
PF: predicated region fallthrough
CT: control target
= control target key end

     0   :  { %10 = vsyncpa [#allocation5], 0  ;;  %s4288_s18 = smov [#allocation4]   ;;  %s6145_s0 = inlined_call_operand.vmem [shape: bf16[192,8], index: 0, kind: input, shape index: {}]   ;;  %s6146_s1 = inlined_call_operand.hbm [shape: bf16[8,512], index: 1, kind: input, shape index: {}]   ;;  %s6147_s2 = inlined_call_operand.vmem [shape: f32[128,512], index: 2, kind: input, shape index: {}]   ;;  %s6148_s3 = inlined_call_operand.vmem [shape: bf16[128,128], index: 3, kind: input, shape index: {}]   ;;  %s6149_s4 = inlined_call_operand.vmem [shape: f32[1,128], index: 4, kind: input, shape index: {}]   ;;  %s6150_s5 = inlined_call_operand.vmem [shape: f32[192,128], index: 5, kind: output, shape index: {}]  }
   0x1   :  { %s19_s19 = sshll.u32 %s4288_s18, 4  ;;  %s4264_s22 = scalar_lea.hbm %s6146_s1, 256  ;;  %s20_s19 = int_to_ptr.vmem [resolvable:$true] %s19_s19 }
   0x2   :  { %p4265_p0 = scmp.ne.s32.totalorder %s6146_s1, %s4264_s22  ;;  %p4268_p1 = scmp.lt.u32.totalorder %s4264_s22, %s6146_s1 }
   0x4   :  { %p4270_p2 = pnand %p4268_p1, %p4265_p0 }
   0x6   :  { %4273 = shalt.err (!%p4270_p2)
}
   0x7   :  { %s4274_s27 = scalar_lea.vmem %s20_s19, 256  ;;  %p4279_p4 = scmp.lt.s32.totalorder %s20_s19, %s20_s19 }
   0x8   :  { %p4275_p3 = scmp.ne.s32.totalorder %s20_s19, %s4274_s27  ;;  %p4280_p5 = scmp.lt.s32.totalorder %s4274_s27, %s4274_s27 }
   0xa   :  { %p4281_p6 = por %p4280_p5, %p4279_p4 }
   0xc   :  { %p4282_p7 = pnand %p4281_p6, %p4275_p3 }
   0xe   :  { %4285 = shalt.err (!%p4282_p7)
}
   0xf   :  { %22 = dma.hbm_to_vmem [thread:$0]  %s6146_s1, 256, %s20_s19, [#allocation5]  }
  0x10   :  { %4286 = dma.done.wait [#allocation5], 256  }
  0x11   :  { %4287 = vsyncadd [#allocation5], 4294967040  ;;  %v4289_v0 = vmov 0   ;;  %v57_v1 = vld [vmem:[#allocation4] sm:$0xff]  ;;  %vm166_vm0 = vcmask 1043456   ;;  %v58_v5 = vld [vmem:[#allocation4 + $0x8] sm:$0xff] }
  0x12   :  { %211 = vmatprep.mubr.bf16.mxu0 %v4289_v0  ;;  %291 = vmatprep.mubr.bf16.mxu1 %v4289_v0  ;;  %v3385_v2 = vcombine.high %v57_v1, %v57_v1  ;;  %v3384_v3 = vcombine.low %v57_v1, %v57_v1  ;;  %v4338_v4 = vld [vmem:[%s6145_s0] sm:$0xff]   ;;  %v3387_v8 = vcombine.high %v58_v5, %v58_v5  ;;  %vm129_vm1 = vcmask 64512   ;;  %v4354_v11 = vld [vmem:[%s6145_s0 + $0x8] sm:$0xff]   ;;  %v599_v14 = vld [vmem:[%s6147_s2 + $0x18] sm:$0xff] }
  0x13   :  { %v4343_v7 = vld [vmem:[%s6145_s0 + $0x40] sm:$0xff]   ;;  %v3386_v9 = vcombine.low %v58_v5, %v58_v5  ;;  %v597_v12 = vld [vmem:[%s6147_s2 + $0x8] sm:$0xff]  ;;  %v603_v15 = vld [vmem:[%s6147_s2 + $0x38] sm:$0xff] }
  0x14   :  { %3388 = vmatprep.subr.msk.bf16.mxu0 %vm166_vm0, %v3385_v2  ;;  %3995 = vmatprep.subr.msk.bf16.mxu1 %vm166_vm0, %v3385_v2  ;;  %v168_v6 = vsel %vm166_vm0, %v3384_v3, 0  ;;  %v601_v13 = vld [vmem:[%s6147_s2 + $0x28] sm:$0xff]  ;;  %v4375_v18 = vpack.c.bf16 %v603_v15, %v599_v14  ;;  %v596_v19 = vld [vmem:[%s6147_s2] sm:$0xff]  ;;  %v4427_v33 = vld [vmem:[%s6145_s0 + $0x10] sm:$0xff]  }
  0x15   :  { %180 = vmatpush1.bf16.msra.mxu0 %v168_v6  ;;  %3996 = vmatpush1.bf16.msra.mxu1 %v168_v6  ;;  %v174_v10 = vsel %vm166_vm0, %v3386_v9, 0  ;;  %v4371_v16 = vld [vmem:[%s6145_s0 + $0x48] sm:$0xff]   ;;  %v4373_v17 = vpack.c.bf16 %v601_v13, %v597_v12  ;;  %v600_v20 = vld [vmem:[%s6147_s2 + $0x20] sm:$0xff]  ;;  %v4432_v34 = vld [vmem:[%s6145_s0 + $0x50] sm:$0xff]  }
  0x16   :  { %3401 = vmatprep.subr.msk.bf16.mxu1 %vm166_vm0, %v3387_v8  ;;  %v4383_v21 = vpack.c.bf16 %v600_v20, %v596_v19  ;;  %v605_v22 = vld [vmem:[%s6147_s2 + $0x48] sm:$0xff]  ;;  %v604_v25 = vld [vmem:[%s6147_s2 + $0x40] sm:$0xff]  ;;  %v4480_v47 = vld [vmem:[%s6145_s0 + $0x18] sm:$0xff]  }
  0x17   :  { %v609_v23 = vld [vmem:[%s6147_s2 + $0x68] sm:$0xff]  ;;  %3484 = vmatprep.subr.bf16.mxu0 %v4373_v17  ;;  %v608_v26 = vld [vmem:[%s6147_s2 + $0x60] sm:$0xff]  ;;  %v4494_v51 = vld [vmem:[%s6145_s0 + $0x58] sm:$0xff]  }
  0x18   :  { %3389 = vmatmul.mubr.msk.bf16.vlgmr.msra.gmra.mrb[0].mxu0 %vm129_vm1, %v4338_v4  ;;  %3397 = vmatmul.mubr.msk.bf16.vlgmr.msra.gmra.mrb[0].mxu1 %vm129_vm1, %v4343_v7  ;;  %v4393_v24 = vpack.c.bf16 %v609_v23, %v605_v22  ;;  %v4402_v27 = vpack.c.bf16 %v608_v26, %v604_v25  ;;  %v613_v28 = vld [vmem:[%s6147_s2 + $0x88] sm:$0xff]  ;;  %v612_v30 = vld [vmem:[%s6147_s2 + $0x80] sm:$0xff]  ;;  %v598_v61 = vld [vmem:[%s6147_s2 + $0x10] sm:$0xff] }
  0x19   :  { %333 = vmatpush1.bf16.msra.mxu1 %v174_v10  ;;  %221 = vmatprep.mubr.bf16.mxu0 %v4289_v0  ;;  %v617_v29 = vld [vmem:[%s6147_s2 + $0xa8] sm:$0xff]  ;;  %v616_v31 = vld [vmem:[%s6147_s2 + $0xa0] sm:$0xff]  ;;  %v602_v62 = vld [vmem:[%s6147_s2 + $0x30] sm:$0xff] }
  0x1a   :  { %301 = vmatprep.mubr.bf16.mxu1 %v4289_v0  ;;  %3516 = vmatprep.subr.bf16.mxu1 %v4375_v18  ;;  %v4422_v32 = vpack.c.bf16 %v617_v29, %v613_v28  ;;  %v4436_v35 = vpack.c.bf16 %v616_v31, %v612_v30  ;;  %v621_v36 = vld [vmem:[%s6147_s2 + $0xc8] sm:$0xff]  ;;  %v620_v38 = vld [vmem:[%s6147_s2 + $0xc0] sm:$0xff]  ;;  %v607_v63 = vld [vmem:[%s6147_s2 + $0x58] sm:$0xff]  ;;  %v4568_v13 = vpack.c.bf16 %v602_v62, %v598_v61 }
  0x1b   :  { %3486 = vmatpush1.bf16.msra.mxu0 %v4383_v21  ;;  %v625_v37 = vld [vmem:[%s6147_s2 + $0xe8] sm:$0xff]  ;;  %v624_v39 = vld [vmem:[%s6147_s2 + $0xe0] sm:$0xff]  ;;  %v611_v2 = vld [vmem:[%s6147_s2 + $0x78] sm:$0xff] }
  0x1c   :  { %3488 = vmatprep.subr.bf16.mxu0 %v4393_v24  ;;  %v629_v40 = vld [vmem:[%s6147_s2 + $0x108] sm:$0xff]  ;;  %v4457_v42 = vpack.c.bf16 %v625_v37, %v621_v36  ;;  %v4460_v43 = vpack.c.bf16 %v624_v39, %v620_v38  ;;  %v628_v45 = vld [vmem:[%s6147_s2 + $0x100] sm:$0xff]  ;;  %v606_v10 = vld [vmem:[%s6147_s2 + $0x50] sm:$0xff]  ;;  %v4576_v19 = vpack.c.bf16 %v611_v2, %v607_v63 }
  0x1d   :  { %v633_v41 = vld [vmem:[%s6147_s2 + $0x128] sm:$0xff]  ;;  %v632_v46 = vld [vmem:[%s6147_s2 + $0x120] sm:$0xff]  ;;  %v610_v12 = vld [vmem:[%s6147_s2 + $0x70] sm:$0xff] }
  0x1e   :  { %v4466_v44 = vpack.c.bf16 %v633_v41, %v629_v40  ;;  %v4483_v48 = vpack.c.bf16 %v632_v46, %v628_v45  ;;  %v637_v49 = vld [vmem:[%s6147_s2 + $0x148] sm:$0xff]  ;;  %v636_v52 = vld [vmem:[%s6147_s2 + $0x140] sm:$0xff]  ;;  %v615_v14 = vld [vmem:[%s6147_s2 + $0x98] sm:$0xff]  ;;  %v4589_v23 = vpack.c.bf16 %v610_v12, %v606_v10 }
  0x1f   :  { %3490 = vmatpush1.bf16.msra.mxu0 %v4402_v27  ;;  %v641_v50 = vld [vmem:[%s6147_s2 + $0x168] sm:$0xff]  ;;  %v640_v53 = vld [vmem:[%s6147_s2 + $0x160] sm:$0xff]  ;;  %v619_v15 = vld [vmem:[%s6147_s2 + $0xb8] sm:$0xff] }
  0x20   :  { %3390 = vmatmul.mubr.msk.bf16.gmra.mrb[4].mxu0 %vm129_vm1, %v4354_v11  ;;  %3398 = vmatmul.mubr.msk.bf16.gmra.mrb[4].mxu1 %vm129_vm1, %v4371_v16  ;;  %v645_v54 = vld [vmem:[%s6147_s2 + $0x188] sm:$0xff]  ;;  %v4509_v56 = vpack.c.bf16 %v641_v50, %v637_v49  ;;  %v4512_v57 = vpack.c.bf16 %v640_v53, %v636_v52  ;;  %v644_v59 = vld [vmem:[%s6147_s2 + $0x180] sm:$0xff]  ;;  %v4593_v25 = vpack.c.bf16 %v619_v15, %v615_v14  ;;  %v614_v26 = vld [vmem:[%s6147_s2 + $0x90] sm:$0xff]  ;;  %v6151_v14 = vmov 0.0  }
  0x21   :  { %231 = vmatprep.mubr.bf16.mxu0 %v4289_v0  ;;  %311 = vmatprep.mubr.bf16.mxu1 %v4289_v0  ;;  %v649_v55 = vld [vmem:[%s6147_s2 + $0x1a8] sm:$0xff]  ;;  %v648_v60 = vld [vmem:[%s6147_s2 + $0x1a0] sm:$0xff]  ;;  %v623_v29 = vld [vmem:[%s6147_s2 + $0xd8] sm:$0xff] }
  0x22   :  { %3492 = vmatprep.subr.bf16.mxu0 %v4422_v32  ;;  %v4518_v58 = vpack.c.bf16 %v649_v55, %v645_v54  ;;  %v4540_v1 = vld [vmem:[%s6145_s0 + $0x20] sm:$0xff]   ;;  %v653_v3 = vld [vmem:[%s6147_s2 + $0x1c8] sm:$0xff]  ;;  %v4553_v6 = vpack.c.bf16 %v648_v60, %v644_v59  ;;  %v627_v30 = vld [vmem:[%s6147_s2 + $0xf8] sm:$0xff] }
  0x23   :  { %3494 = vmatpush1.bf16.msra.mxu0 %v4436_v35  ;;  %v657_v5 = vld [vmem:[%s6147_s2 + $0x1e8] sm:$0xff]  ;;  %v652_v8 = vld [vmem:[%s6147_s2 + $0x1c0] sm:$0xff]  ;;  %v4619_v36 = vpack.c.bf16 %v627_v30, %v623_v29  ;;  %v622_v37 = vld [vmem:[%s6147_s2 + $0xd0] sm:$0xff] }
  0x24   :  { %3496 = vmatprep.subr.bf16.mxu0 %v4457_v42  ;;  %v656_v9 = vld [vmem:[%s6147_s2 + $0x1e0] sm:$0xff]  ;;  %v4579_v20 = vpack.c.bf16 %v657_v5, %v653_v3  ;;  %v4605_v28 = vld [vmem:[%s6145_s0 + $0x28] sm:$0xff]   ;;  %v626_v38 = vld [vmem:[%s6147_s2 + $0xf0] sm:$0xff] }
  0x25   :  { %v4585_v22 = vpack.c.bf16 %v656_v9, %v652_v8  ;;  %v635_v39 = vld [vmem:[%s6147_s2 + $0x138] sm:$0xff]  ;;  %v4640_v40 = vpack.c.bf16 %v626_v38, %v622_v37  ;;  %v634_v45 = vld [vmem:[%s6147_s2 + $0x130] sm:$0xff] }
  0x26   :  { %v4014_v46 = vld [vmem:[%s6145_s0 + $0x30] sm:$0xff]   ;;  %v639_v49 = vld [vmem:[%s6147_s2 + $0x158] sm:$0xff] }
  0x27   :  { %3498 = vmatpush1.bf16.msra.mxu0 %v4460_v43  ;;  %v643_v50 = vld [vmem:[%s6147_s2 + $0x178] sm:$0xff]  ;;  %v638_v54 = vld [vmem:[%s6147_s2 + $0x150] sm:$0xff] }
  0x28   :  { %3391 = vmatmul.mubr.msk.bf16.gmra.mrb[8].mxu0 %vm129_vm1, %v4427_v33  ;;  %3399 = vmatmul.mubr.msk.bf16.gmra.mrb[8].mxu1 %vm129_vm1, %v4432_v34  ;;  %v4664_v53 = vpack.c.bf16 %v643_v50, %v639_v49  ;;  %v642_v55 = vld [vmem:[%s6147_s2 + $0x170] sm:$0xff]  ;;  %v647_v59 = vld [vmem:[%s6147_s2 + $0x198] sm:$0xff] }
  0x29   :  { %241 = vmatprep.mubr.bf16.mxu0 %v4289_v0  ;;  %321 = vmatprep.mubr.bf16.mxu1 %v4289_v0  ;;  %v651_v60 = vld [vmem:[%s6147_s2 + $0x1b8] sm:$0xff]  ;;  %v4684_v61 = vpack.c.bf16 %v642_v55, %v638_v54  ;;  %v650_v63 = vld [vmem:[%s6147_s2 + $0x1b0] sm:$0xff] }
  0x2a   :  { %3500 = vmatprep.subr.bf16.mxu0 %v4466_v44  ;;  %v4687_v62 = vpack.c.bf16 %v651_v60, %v647_v59  ;;  %v4015_v2 = vld [vmem:[%s6145_s0 + $0x38] sm:$0xff]   ;;  %v654_v10 = vld [vmem:[%s6147_s2 + $0x1d0] sm:$0xff] }
  0x2b   :  { %3502 = vmatpush1.bf16.msra.mxu0 %v4483_v48  ;;  %v655_v3 = vld [vmem:[%s6147_s2 + $0x1d8] sm:$0xff]  ;;  %v658_v12 = vld [vmem:[%s6147_s2 + $0x1f0] sm:$0xff] }
  0x2c   :  { %3504 = vmatprep.subr.bf16.mxu0 %v4509_v56  ;;  %v659_v5 = vld [vmem:[%s6147_s2 + $0x1f8] sm:$0xff]  ;;  %v3545_v15 = vpack.c.bf16 %v658_v12, %v654_v10 }
  0x2d   :  { %v4708_v9 = vpack.c.bf16 %v659_v5, %v655_v3 }
  0x2f   :  { %3506 = vmatpush1.bf16.msra.mxu0 %v4512_v57 }
  0x30   :  { %3392 = vmatmul.mubr.msk.bf16.gmra.mrb[12].mxu0 %vm129_vm1, %v4480_v47  ;;  %3400 = vmatmul.mubr.msk.bf16.gmra.mrb[12].mxu1 %vm129_vm1, %v4494_v51 }
  0x31   :  { %251 = vmatprep.mubr.bf16.mxu0 %v4289_v0  ;;  %364 = vmatprep.mubr.bf16.mxu1 %v4289_v0 }
  0x32   :  { %3508 = vmatprep.subr.bf16.mxu0 %v4518_v58 }
  0x33   :  { %3510 = vmatpush1.bf16.msra.mxu0 %v4553_v6 }
  0x34   :  { %3512 = vmatprep.subr.bf16.mxu0 %v4579_v20 }
  0x37   :  { %3514 = vmatpush1.bf16.msra.mxu0 %v4585_v22 }
  0x38   :  { %3393 = vmatmul.mubr.msk.bf16.gmra.mrb[16].mxu0 %vm129_vm1, %v4540_v1  ;;  %3402 = vmatmul.mubr.msk.bf16.vlgmr.msra.gmra.mrb[16].mxu1 %vm129_vm1, %v4338_v4  ;;  %v618_v4 = vld [vmem:[%s6147_s2 + $0xb0] sm:$0xff] }
  0x39   :  { %3518 = vmatpush1.bf16.msra.mxu1 %v4568_v13  ;;  %261 = vmatprep.mubr.bf16.mxu0 %v4289_v0  ;;  %v4617_v31 = vpack.c.bf16 %v618_v4, %v614_v26 }
  0x3a   :  { %374 = vmatprep.mubr.bf16.mxu1 %v4289_v0  ;;  %3520 = vmatprep.subr.bf16.mxu1 %v4576_v19 }
  0x3b   :  { %3548 = vmatprep.subr.bf16.mxu0 %v4373_v17  ;;  %v631_v17 = vld [vmem:[%s6147_s2 + $0x118] sm:$0xff] }
  0x3c   :  { %v4643_v41 = vpack.c.bf16 %v635_v39, %v631_v17 }
  0x3d   :  { %3522 = vmatpush1.bf16.msra.mxu1 %v4589_v23 }
  0x3e   :  { %3524 = vmatprep.subr.bf16.mxu1 %v4593_v25 }
  0x40   :  { %3394 = vmatmul.mubr.msk.bf16.gmra.mrb[20].mxu0 %vm129_vm1, %v4605_v28  ;;  %3403 = vmatmul.mubr.msk.bf16.gmra.mrb[20].mxu1 %vm129_vm1, %v4354_v11  ;;  %v630_v11 = vld [vmem:[%s6147_s2 + $0x110] sm:$0xff] }
  0x41   :  { %271 = vmatprep.mubr.bf16.mxu0 %v4289_v0  ;;  %384 = vmatprep.mubr.bf16.mxu1 %v4289_v0  ;;  %v4661_v52 = vpack.c.bf16 %v634_v45, %v630_v11 }
  0x42   :  { %3526 = vmatpush1.bf16.msra.mxu1 %v4617_v31 }
  0x43   :  { %3528 = vmatprep.subr.bf16.mxu1 %v4619_v36 }
  0x46   :  { %3530 = vmatpush1.bf16.msra.mxu1 %v4640_v40 }
  0x47   :  { %3532 = vmatprep.subr.bf16.mxu1 %v4643_v41 }
  0x48   :  { %3395 = vmatmul.mubr.msk.bf16.gmra.mrb[24].mxu0 %vm129_vm1, %v4014_v46  ;;  %3404 = vmatmul.mubr.msk.bf16.gmra.mrb[24].mxu1 %vm129_vm1, %v4427_v33  ;;  %v646_v33 = vld [vmem:[%s6147_s2 + $0x190] sm:$0xff] }
  0x49   :  { %281 = vmatprep.mubr.bf16.mxu0 %v4289_v0  ;;  %394 = vmatprep.mubr.bf16.mxu1 %v4289_v0  ;;  %v4705_v8 = vpack.c.bf16 %v650_v63, %v646_v33 }
  0x4a   :  { %3534 = vmatpush1.bf16.msra.mxu1 %v4661_v52 }
  0x4b   :  { %3536 = vmatprep.subr.bf16.mxu1 %v4664_v53 }
  0x4e   :  { %3538 = vmatpush1.bf16.msra.mxu1 %v4684_v61 }
  0x4f   :  { %3540 = vmatprep.subr.bf16.mxu1 %v4687_v62 }
  0x50   :  { %3396 = vmatmul.mubr.msk.bf16.gmra.mrb[28].mxu0 %vm129_vm1, %v4015_v2  ;;  %3405 = vmatmul.mubr.msk.bf16.gmra.mrb[28].mxu1 %vm129_vm1, %v4480_v47 }
  0x51   :  { %404 = vmatprep.mubr.bf16.mxu1 %v4289_v0  ;;  %724 = vmatprep.mubr.f32.mxu0 %v6151_v14 }
  0x52   :  { %3542 = vmatpush1.bf16.msra.mxu1 %v4705_v8 }
  0x53   :  { %3544 = vmatprep.subr.bf16.mxu1 %v4708_v9 }
  0x56   :  { %3546 = vmatpush1.bf16.msra.mxu1 %v3545_v15 }
  0x57   :  { %3580 = vmatprep.subr.bf16.mxu1 %v4375_v18 }
  0x58   :  { %3406 = vmatmul.mubr.msk.bf16.gmra.mrb[32].mxu1 %vm129_vm1, %v4540_v1  ;;  %725 = vmatmul.mubr.f32.vlgmr.msra.gmra.mrb[32].mxu0 %v6151_v14 }
  0x59   :  { %730 = vmatprep.mubr.f32.mxu0 %v6151_v14  ;;  %414 = vmatprep.mubr.bf16.mxu1 %v4289_v0 }
  0x5a   :  { %3550 = vmatpush1.bf16.msra.mxu0 %v4383_v21 }
  0x5b   :  { %3552 = vmatprep.subr.bf16.mxu0 %v4393_v24 }
  0x5c   :  { %731 = vmatmul.mubr.f32.gmra.mrb[34].mxu0 %v6151_v14 }
  0x5d   :  { %736 = vmatprep.mubr.f32.mxu0 %v6151_v14 }
  0x5e   :  { %3554 = vmatpush1.bf16.msra.mxu0 %v4402_v27 }
  0x5f   :  { %3556 = vmatprep.subr.bf16.mxu0 %v4422_v32 }
  0x60   :  { %3407 = vmatmul.mubr.msk.bf16.gmra.mrb[36].mxu1 %vm129_vm1, %v4605_v28  ;;  %737 = vmatmul.mubr.f32.gmra.mrb[36].mxu0 %v6151_v14 }
  0x61   :  { %424 = vmatprep.mubr.bf16.mxu1 %v4289_v0  ;;  %1038 = vmatprep.mubr.f32.mxu0 %v6151_v14 }
  0x62   :  { %3558 = vmatpush1.bf16.msra.mxu0 %v4436_v35 }
  0x63   :  { %3560 = vmatprep.subr.bf16.mxu0 %v4457_v42 }
  0x66   :  { %3562 = vmatpush1.bf16.msra.mxu0 %v4460_v43 }
  0x67   :  { %3564 = vmatprep.subr.bf16.mxu0 %v4466_v44 }
  0x68   :  { %3408 = vmatmul.mubr.msk.bf16.gmra.mrb[40].mxu1 %vm129_vm1, %v4014_v46 }
  0x69   :  { %434 = vmatprep.mubr.bf16.mxu1 %v4289_v0 }
  0x6a   :  { %3566 = vmatpush1.bf16.msra.mxu0 %v4483_v48 }
  0x6b   :  { %3568 = vmatprep.subr.bf16.mxu0 %v4509_v56 }
  0x6e   :  { %3570 = vmatpush1.bf16.msra.mxu0 %v4512_v57 }
  0x6f   :  { %3572 = vmatprep.subr.bf16.mxu0 %v4518_v58 }
  0x70   :  { %3409 = vmatmul.mubr.msk.bf16.gmra.mrb[44].mxu1 %vm129_vm1, %v4015_v2 }
  0x71   :  { %444 = vmatprep.mubr.bf16.mxu1 %v4289_v0 }
  0x72   :  { %3574 = vmatpush1.bf16.msra.mxu0 %v4553_v6 }
  0x73   :  { %3576 = vmatprep.subr.bf16.mxu0 %v4579_v20 }
  0x76   :  { %3578 = vmatpush1.bf16.msra.mxu0 %v4585_v22 }
  0x78   :  { %3410 = vmatmul.mubr.msk.bf16.gmra.mrb[48].mxu1 %vm129_vm1, %v4343_v7 }
  0x79   :  { %454 = vmatprep.mubr.bf16.mxu1 %v4289_v0 }
  0x80   :  { %3411 = vmatmul.mubr.msk.bf16.gmra.mrb[52].mxu1 %vm129_vm1, %v4371_v16 }
  0x81   :  { %464 = vmatprep.mubr.bf16.mxu1 %v4289_v0 }
  0x88   :  { %3412 = vmatmul.mubr.msk.bf16.gmra.mrb[56].mxu1 %vm129_vm1, %v4432_v34 }
  0x89   :  { %474 = vmatprep.mubr.bf16.mxu1 %v4289_v0 }
  0x90   :  { %3413 = vmatmul.mubr.msk.bf16.gmra.mrb[60].mxu1 %vm129_vm1, %v4494_v51 }
  0x91   :  { %807 = vmatprep.mubr.f32.mxu1 %v6151_v14 }
  0x98   :  { %808 = vmatmul.mubr.f32.vlgmr.msra.gmra.mrb[64].mxu1 %v6151_v14 }
  0x99   :  { %813 = vmatprep.mubr.f32.mxu1 %v6151_v14  ;;  %3582 = vmatpush1.bf16.msra.mxu1 %v4568_v13 }
  0x9a   :  { %3584 = vmatprep.subr.bf16.mxu1 %v4576_v19 }
  0x9c   :  { %814 = vmatmul.mubr.f32.gmra.mrb[66].mxu1 %v6151_v14 }
  0x9d   :  { %819 = vmatprep.mubr.f32.mxu1 %v6151_v14  ;;  %3586 = vmatpush1.bf16.msra.mxu1 %v4589_v23 }
  0x9e   :  { %3588 = vmatprep.subr.bf16.mxu1 %v4593_v25 }
  0xa0   :  { %820 = vmatmul.mubr.f32.gmra.mrb[68].mxu1 %v6151_v14 }
  0xa1   :  { %3590 = vmatpush1.bf16.msra.mxu1 %v4617_v31  ;;  %1121 = vmatprep.mubr.f32.mxu1 %v6151_v14 }
  0xa2   :  { %3592 = vmatprep.subr.bf16.mxu1 %v4619_v36 }
  0xa5   :  { %3594 = vmatpush1.bf16.msra.mxu1 %v4640_v40 }
  0xa6   :  { %3596 = vmatprep.subr.bf16.mxu1 %v4643_v41 }
  0xa9   :  { %3598 = vmatpush1.bf16.msra.mxu1 %v4661_v52 }
  0xaa   :  { %3600 = vmatprep.subr.bf16.mxu1 %v4664_v53 }
  0xad   :  { %3602 = vmatpush1.bf16.msra.mxu1 %v4684_v61 }
  0xae   :  { %3604 = vmatprep.subr.bf16.mxu1 %v4687_v62 }
  0xb1   :  { %3606 = vmatpush1.bf16.msra.mxu1 %v4705_v8 }
  0xb2   :  { %3608 = vmatprep.subr.bf16.mxu1 %v4708_v9 }
  0xb5   :  { %3610 = vmatpush1.bf16.msra.mxu1 %v3545_v15 }
  0xeb   :  { %v4787_v0 = vpop.f32.mrb[0].mxu1  ;;  %v4789_v7 = vpop.f32.mrb[0].mxu0 }
  0xec   :  { %6162 = vst [vmem:[#allocation7_spill] sm:$0xff] %v4787_v0  ;;  %v4791_v16 = vpop.f32.mrb[1].mxu1  ;;  %v4793_v18 = vpop.f32.mrb[1].mxu0 }
  0xed   :  { %6163 = vst [vmem:[#allocation8_spill] sm:$0xff] %v4791_v16  ;;  %v4795_v21 = vpop.f32.mrb[2].mxu1  ;;  %v4797_v24 = vpop.f32.mrb[2].mxu0 }
  0xee   :  { %6164 = vst [vmem:[#allocation9_spill] sm:$0xff] %v4795_v21  ;;  %v4799_v27 = vpop.f32.mrb[3].mxu1  ;;  %v4801_v32 = vpop.f32.mrb[3].mxu0 }
  0xef   :  { %6165 = vst [vmem:[#allocation10_spill] sm:$0xff] %v4799_v27 }
  0xf3   :  { %v4803_v34 = vpop.f32.mrb[4].mxu1  ;;  %v4805_v35 = vpop.f32.mrb[4].mxu0 }
  0xf4   :  { %6166 = vst [vmem:[#allocation11_spill] sm:$0xff] %v4803_v34  ;;  %v4807_v42 = vpop.f32.mrb[5].mxu1  ;;  %v4809_v43 = vpop.f32.mrb[5].mxu0 }
  0xf5   :  { %6167 = vst [vmem:[#allocation12_spill] sm:$0xff] %v4807_v42  ;;  %v4811_v44 = vpop.f32.mrb[6].mxu1  ;;  %v4813_v47 = vpop.f32.mrb[6].mxu0 }
  0xf6   :  { %6168 = vst [vmem:[#allocation13_spill] sm:$0xff] %v4811_v44  ;;  %v4815_v48 = vpop.f32.mrb[7].mxu1  ;;  %v4817_v51 = vpop.f32.mrb[7].mxu0 }
  0xf7   :  { %6169 = vst [vmem:[#allocation14_spill] sm:$0xff] %v4815_v48 }
  0xfb   :  { %v4819_v56 = vpop.f32.mrb[8].mxu1  ;;  %v4821_v57 = vpop.f32.mrb[8].mxu0 }
  0xfc   :  { %6170 = vst [vmem:[#allocation15_spill] sm:$0xff] %v4819_v56  ;;  %v4823_v58 = vpop.f32.mrb[9].mxu1  ;;  %v4825_v1 = vpop.f32.mrb[9].mxu0 }
  0xfd   :  { %6171 = vst [vmem:[#allocation16_spill] sm:$0xff] %v4823_v58  ;;  %v4827_v6 = vpop.f32.mrb[10].mxu1  ;;  %v4829_v13 = vpop.f32.mrb[10].mxu0 }
  0xfe   :  { %6172 = vst [vmem:[#allocation17_spill] sm:$0xff] %v4827_v6  ;;  %v4831_v19 = vpop.f32.mrb[11].mxu1  ;;  %v4833_v20 = vpop.f32.mrb[11].mxu0 }
  0xff   :  { %6173 = vst [vmem:[#allocation18_spill] sm:$0xff] %v4831_v19 }
 0x103   :  { %v4835_v22 = vpop.f32.mrb[12].mxu1  ;;  %v4837_v23 = vpop.f32.mrb[12].mxu0 }
 0x104   :  { %6174 = vst [vmem:[#allocation19_spill] sm:$0xff] %v4835_v22  ;;  %v4839_v25 = vpop.f32.mrb[13].mxu1  ;;  %v4841_v26 = vpop.f32.mrb[13].mxu0 }
 0x105   :  { %6175 = vst [vmem:[#allocation20_spill] sm:$0xff] %v4839_v25  ;;  %v4843_v4 = vpop.f32.mrb[14].mxu1  ;;  %v4845_v28 = vpop.f32.mrb[14].mxu0 }
 0x106   :  { %6176 = vst [vmem:[#allocation21_spill] sm:$0xff] %v4843_v4  ;;  %6177 = vst [vmem:[#allocation22_spill] sm:$0xff] %v4845_v28  ;;  %v4847_v29 = vpop.f32.mrb[15].mxu1  ;;  %v4849_v30 = vpop.f32.mrb[15].mxu0 }
 0x107   :  { %6178 = vst [vmem:[#allocation23_spill] sm:$0xff] %v4847_v29  ;;  %6179 = vst [vmem:[#allocation24_spill] sm:$0xff] %v4849_v30 }
 0x10b   :  { %v4851_v31 = vpop.f32.mrb[16].mxu1  ;;  %v4853_v37 = vpop.f32.mrb[16].mxu0 }
 0x10c   :  { %6180 = vst [vmem:[#allocation25_spill] sm:$0xff] %v4853_v37  ;;  %v4855_v38 = vpop.f32.mrb[17].mxu1  ;;  %v4857_v17 = vpop.f32.mrb[17].mxu0 }
 0x10d   :  { %6181 = vst [vmem:[#allocation26_spill] sm:$0xff] %v4857_v17  ;;  %v4859_v39 = vpop.f32.mrb[18].mxu1  ;;  %v4861_v11 = vpop.f32.mrb[18].mxu0 }
 0x10e   :  { %6182 = vst [vmem:[#allocation27_spill] sm:$0xff] %v4861_v11  ;;  %v4863_v45 = vpop.f32.mrb[19].mxu1  ;;  %v4865_v46 = vpop.f32.mrb[19].mxu0 }
 0x10f   :  { %6183 = vst [vmem:[#allocation28_spill] sm:$0xff] %v4865_v46 }
 0x113   :  { %v4867_v49 = vpop.f32.mrb[20].mxu1  ;;  %v4869_v50 = vpop.f32.mrb[20].mxu0 }
 0x114   :  { %6184 = vst [vmem:[#allocation29_spill] sm:$0xff] %v4869_v50  ;;  %v4871_v53 = vpop.f32.mrb[21].mxu1  ;;  %v4873_v54 = vpop.f32.mrb[21].mxu0 }
 0x115   :  { %6185 = vst [vmem:[#allocation30_spill] sm:$0xff] %v4873_v54  ;;  %v4875_v55 = vpop.f32.mrb[22].mxu1  ;;  %v4877_v59 = vpop.f32.mrb[22].mxu0 }
 0x116   :  { %6186 = vst [vmem:[#allocation31_spill] sm:$0xff] %v4877_v59  ;;  %v4879_v60 = vpop.f32.mrb[23].mxu1  ;;  %v4881_v61 = vpop.f32.mrb[23].mxu0 }
 0x117   :  { %6187 = vst [vmem:[#allocation32_spill] sm:$0xff] %v4881_v61 }
 0x11b   :  { %v4883_v62 = vpop.f32.mrb[24].mxu1  ;;  %v4885_v33 = vpop.f32.mrb[24].mxu0 }
 0x11c   :  { %6188 = vst [vmem:[#allocation33_spill] sm:$0xff] %v4885_v33  ;;  %v4887_v63 = vpop.f32.mrb[25].mxu1  ;;  %v4889_v2 = vpop.f32.mrb[25].mxu0 }
 0x11d   :  { %6189 = vst [vmem:[#allocation34_spill] sm:$0xff] %v4889_v2  ;;  %v4891_v3 = vpop.f32.mrb[26].mxu1  ;;  %v4893_v5 = vpop.f32.mrb[26].mxu0 }
 0x11e   :  { %6190 = vst [vmem:[#allocation35_spill] sm:$0xff] %v4893_v5  ;;  %v4895_v8 = vpop.f32.mrb[27].mxu1  ;;  %v4897_v9 = vpop.f32.mrb[27].mxu0 }
 0x11f   :  { %6191 = vst [vmem:[#allocation36_spill] sm:$0xff] %v4897_v9 }
 0x123   :  { %v4899_v10 = vpop.f32.mrb[28].mxu1  ;;  %v4901_v12 = vpop.f32.mrb[28].mxu0 }
 0x124   :  { %6192 = vst [vmem:[#allocation37_spill] sm:$0xff] %v4901_v12  ;;  %v4903_v15 = vpop.f32.mrb[29].mxu1  ;;  %v4905_v14 = vpop.f32.mrb[29].mxu0 }
 0x125   :  { %6193 = vst [vmem:[#allocation38_spill] sm:$0xff] %v4905_v14  ;;  %v4907_v29 = vpop.f32.mrb[30].mxu1  ;;  %v4909_v4 = vpop.f32.mrb[30].mxu0 }
 0x126   :  { %6194 = vst [vmem:[#allocation39_spill] sm:$0xff] %v4907_v29  ;;  %6195 = vst [vmem:[#allocation40_spill] sm:$0xff] %v4909_v4  ;;  %v4911_v25 = vpop.f32.mrb[31].mxu1  ;;  %v4913_v22 = vpop.f32.mrb[31].mxu0 }
 0x127   :  { %6196 = vst [vmem:[#allocation41_spill] sm:$0xff] %v4911_v25  ;;  %6197 = vst [vmem:[#allocation42_spill] sm:$0xff] %v4913_v22 }
 0x12b   :  { %v4915_v19 = vpop.f32.mrb[32].mxu1  ;;  %v726_v6 = vpop.f32.mrb[32].mxu0 }
 0x12c   :  { %6198 = vst [vmem:[#allocation43_spill] sm:$0xff] %v4915_v19  ;;  %v826_v58 = vadd.f32 %v726_v6, %v4789_v7  ;;  %v4918_v56 = vpop.f32.mrb[33].mxu1  ;;  %v728_v48 = vpop.f32.mrb[33].mxu0 }
 0x12d   :  { %6199 = vst [vmem:[#allocation44_spill] sm:$0xff] %v4918_v56  ;;  %v827_v44 = vadd.f32 %v728_v48, %v4793_v18  ;;  %v4921_v42 = vpop.f32.mrb[34].mxu1 }
 0x12e   :  { %6200 = vst [vmem:[#allocation45_spill] sm:$0xff] %v4921_v42  ;;  %v4923_v34 = vpop.f32.mrb[35].mxu1 }
 0x12f   :  { %6201 = vst [vmem:[#allocation46_spill] sm:$0xff] %v4923_v34  ;;  %v732_v27 = vpop.f32.mrb[34].mxu0 }
 0x130   :  { %v830_v21 = vadd.f32 %v732_v27, %v4797_v24  ;;  %v734_v16 = vpop.f32.mrb[35].mxu0 }
 0x131   :  { %v831_v0 = vadd.f32 %v734_v16, %v4801_v32 }
 0x133   :  { %v4927_v22 = vpop.f32.mrb[36].mxu1  ;;  %v738_v4 = vpop.f32.mrb[36].mxu0 }
 0x134   :  { %6202 = vst [vmem:[#allocation47_spill] sm:$0xff] %v4927_v22  ;;  %v834_v7 = vadd.f32 %v738_v4, %v4805_v35  ;;  %v4930_v6 = vpop.f32.mrb[37].mxu1  ;;  %v740_v14 = vpop.f32.mrb[37].mxu0  ;;  %v1285_v22 = vld [vmem:[%s6147_s2 + $0x1e0] sm:$0xff] }
 0x135   :  { %6203 = vst [vmem:[#allocation48_spill] sm:$0xff] %v4930_v6  ;;  %v835_v18 = vadd.f32 %v740_v14, %v4809_v43  ;;  %v4933_v48 = vpop.f32.mrb[38].mxu1 }
 0x136   :  { %6204 = vst [vmem:[#allocation49_spill] sm:$0xff] %v4933_v48  ;;  %v4935_v12 = vpop.f32.mrb[39].mxu1  ;;  %v1277_v48 = vld [vmem:[%s6147_s2 + $0x1a0] sm:$0xff] }
 0x137   :  { %6205 = vst [vmem:[#allocation50_spill] sm:$0xff] %v4935_v12 }
 0x13b   :  { %v4937_v9 = vpop.f32.mrb[40].mxu1 }
 0x13c   :  { %6206 = vst [vmem:[#allocation51_spill] sm:$0xff] %v4937_v9  ;;  %v4939_v24 = vpop.f32.mrb[41].mxu1 }
 0x13d   :  { %6207 = vst [vmem:[#allocation52_spill] sm:$0xff] %v4939_v24  ;;  %v4941_v27 = vpop.f32.mrb[42].mxu1 }
 0x13e   :  { %6208 = vst [vmem:[#allocation53_spill] sm:$0xff] %v4941_v27  ;;  %v4943_v16 = vpop.f32.mrb[43].mxu1 }
 0x13f   :  { %6209 = vst [vmem:[#allocation54_spill] sm:$0xff] %v4943_v16 }
 0x143   :  { %v4945_v32 = vpop.f32.mrb[44].mxu1 }
 0x144   :  { %6210 = vst [vmem:[#allocation55_spill] sm:$0xff] %v4945_v32  ;;  %v4947_v35 = vpop.f32.mrb[45].mxu1 }
 0x145   :  { %6211 = vst [vmem:[#allocation56_spill] sm:$0xff] %v4947_v35  ;;  %v4949_v4 = vpop.f32.mrb[46].mxu1 }
 0x146   :  { %6212 = vst [vmem:[#allocation57_spill] sm:$0xff] %v4949_v4  ;;  %v4951_v5 = vpop.f32.mrb[47].mxu1 }
 0x147   :  { %6213 = vst [vmem:[#allocation58_spill] sm:$0xff] %v4951_v5 }
 0x14b   :  { %v4953_v14 = vpop.f32.mrb[48].mxu1 }
 0x14c   :  { %6214 = vst [vmem:[#allocation59_spill] sm:$0xff] %v4953_v14  ;;  %v4955_v43 = vpop.f32.mrb[49].mxu1 }
 0x14d   :  { %6215 = vst [vmem:[#allocation60_spill] sm:$0xff] %v4955_v43  ;;  %v4957_v2 = vpop.f32.mrb[50].mxu1  ;;  %v850_v43 = vmul.f32 0.5, %v827_v44 }
 0x14e   :  { %6216 = vst [vmem:[#allocation61_spill] sm:$0xff] %v4957_v2  ;;  %v4959_v9 = vpop.f32.mrb[51].mxu1  ;;  %v838_v2 = vmul.f32 0.5, %v826_v58 }
 0x14f   :  { %6217 = vst [vmem:[#allocation62_spill] sm:$0xff] %v4959_v9  ;;  %4024 = vtanh.f32 %v850_v43 }
 0x150   :  { %4026 = vtanh.f32 %v838_v2 }
 0x153   :  { %v4961_v24 = vpop.f32.mrb[52].mxu1 }
 0x154   :  { %6218 = vst [vmem:[#allocation63_spill] sm:$0xff] %v4961_v24  ;;  %v4963_v27 = vpop.f32.mrb[53].mxu1  ;;  %v851_v24 = vmul.f32 0.5, %v831_v0 }
 0x155   :  { %6219 = vst [vmem:[#allocation64_spill] sm:$0xff] %v4963_v27  ;;  %v4965_v16 = vpop.f32.mrb[54].mxu1 }
 0x156   :  { %6220 = vst [vmem:[#allocation65_spill] sm:$0xff] %v4965_v16  ;;  %v4967_v32 = vpop.f32.mrb[55].mxu1  ;;  %4028 = vtanh.f32 %v851_v24 }
 0x157   :  { %6221 = vst [vmem:[#allocation66_spill] sm:$0xff] %v4967_v32  ;;  %v839_v32 = vmul.f32 0.5, %v830_v21 }
 0x159   :  { %4030 = vtanh.f32 %v839_v32  ;;  %v4025_v43 = vpop.eup %4024 }
 0x15a   :  { %v856_v2 = vmul.f32 0.5, %v4025_v43 }
 0x15b   :  { %v4969_v35 = vpop.f32.mrb[56].mxu1 }
 0x15c   :  { %6222 = vst [vmem:[#allocation67_spill] sm:$0xff] %v4969_v35  ;;  %v4971_v4 = vpop.f32.mrb[57].mxu1  ;;  %v840_v35 = vmul.f32 0.5, %v834_v7 }
 0x15d   :  { %6223 = vst [vmem:[#allocation68_spill] sm:$0xff] %v4971_v4  ;;  %v4973_v5 = vpop.f32.mrb[58].mxu1  ;;  %v852_v4 = vmul.f32 0.5, %v835_v18 }
 0x15e   :  { %6224 = vst [vmem:[#allocation69_spill] sm:$0xff] %v4973_v5  ;;  %v4975_v14 = vpop.f32.mrb[59].mxu1 }
 0x15f   :  { %6225 = vst [vmem:[#allocation70_spill] sm:$0xff] %v4975_v14  ;;  %4032 = vtanh.f32 %v852_v4 }
 0x160   :  { %4034 = vtanh.f32 %v840_v35 }
 0x163   :  { %v4977_v9 = vpop.f32.mrb[60].mxu1 }
 0x164   :  { %6226 = vst [vmem:[#allocation71_spill] sm:$0xff] %v4977_v9  ;;  %v4979_v33 = vpop.f32.mrb[61].mxu1 }
 0x165   :  { %6227 = vst [vmem:[#allocation72_spill] sm:$0xff] %v4979_v33  ;;  %v4981_v27 = vpop.f32.mrb[62].mxu1 }
 0x166   :  { %6228 = vst [vmem:[#allocation73_spill] sm:$0xff] %v4981_v27  ;;  %v4983_v16 = vpop.f32.mrb[63].mxu1  ;;  %v4027_v27 = vpop.eup %4026 }
 0x167   :  { %6229 = vst [vmem:[#allocation74_spill] sm:$0xff] %v4983_v16  ;;  %v4029_v18 = vpop.eup %4028  ;;  %v844_v32 = vmul.f32 0.5, %v4027_v27 }
 0x16b   :  { %v809_v5 = vpop.f32.mrb[64].mxu1 }
 0x16c   :  { %v828_v44 = vadd.f32 %v809_v5, %v4851_v31  ;;  %v811_v58 = vpop.f32.mrb[65].mxu1  ;;  %v4031_v31 = vpop.eup %4030  ;;  %v859_v5 = vadd.f32 0.5, %v856_v2 }
 0x16d   :  { %v829_v0 = vadd.f32 %v811_v58, %v4855_v38  ;;  %v857_v38 = vmul.f32 0.5, %v4029_v18  ;;  %v4033_v43 = vpop.eup %4032 }
 0x16e   :  { %4036 = vtanh.f32 %v828_v44  ;;  %v858_v14 = vmul.f32 0.5, %v4033_v43 }
 0x16f   :  { %v815_v33 = vpop.f32.mrb[66].mxu1  ;;  %v865_v24 = vmul.f32 0.5, %v829_v0  ;;  %v845_v0 = vmul.f32 0.5, %v4031_v31  ;;  %v860_v27 = vadd.f32 0.5, %v857_v38 }
 0x170   :  { %v832_v21 = vadd.f32 %v815_v33, %v4859_v39  ;;  %v817_v16 = vpop.f32.mrb[67].mxu1  ;;  %v4035_v39 = vpop.eup %4034  ;;  %v847_v33 = vadd.f32 0.5, %v844_v32 }
 0x171   :  { %v833_v7 = vadd.f32 %v817_v16, %v4863_v45  ;;  %v877_v16 = vmul.f32 0.0, %v859_v5  ;;  %v848_v2 = vadd.f32 0.5, %v845_v0 }
 0x172   :  { %4038 = vtanh.f32 %v832_v21 }
 0x173   :  { %v821_v4 = vpop.f32.mrb[68].mxu1  ;;  %4040 = vtanh.f32 %v865_v24  ;;  %v866_v44 = vmul.f32 0.5, %v833_v7  ;;  %v878_v7 = vmul.f32 0.0, %v860_v27  ;;  %v6231_v27 = vmov 0.0  }
 0x174   :  { %v836_v35 = vadd.f32 %v821_v4, %v4867_v49  ;;  %v823_v9 = vpop.f32.mrb[69].mxu1  ;;  %v846_v49 = vmul.f32 0.5, %v4035_v39 }
 0x175   :  { %v837_v58 = vadd.f32 %v823_v9, %v4871_v53  ;;  %v861_v53 = vadd.f32 0.5, %v858_v14 }
 0x176   :  { %4042 = vtanh.f32 %v836_v35  ;;  %v849_v32 = vadd.f32 0.5, %v846_v49 }
 0x177   :  { %v867_v21 = vmul.f32 0.5, %v837_v58  ;;  %4044 = vtanh.f32 %v866_v44  ;;  %v879_v35 = vmul.f32 0.0, %v861_v53 }
 0x178   :  { %v4037_v45 = vpop.eup %4036 }
 0x179   :  { %v880_v12 = vmul.f32 %v4037_v45, %v847_v33  ;;  %4046 = vtanh.f32 %v867_v21 }
 0x17b   :  { %v4991_v4 = vadd.f32 %v880_v12, %v877_v16 }
 0x17c   :  { %v4039_v24 = vpop.eup %4038 }
 0x17d   :  { %4048 = vtanh.f32 %v4991_v4  ;;  %v881_v9 = vmul.f32 %v4039_v24, %v848_v2  ;;  %v4041_v18 = vpop.eup %4040 }
 0x17e   :  { %v871_v44 = vmul.f32 0.5, %v4041_v18  ;;  %v1230_v18 = vld [vmem:[%s6147_s2 + $0x28] sm:$0xff] }
 0x17f   :  { %v4994_v31 = vadd.f32 %v881_v9, %v878_v7  ;;  %v1226_v9 = vld [vmem:[%s6147_s2 + $0x8] sm:$0xff] }
 0x180   :  { %v4043_v5 = vpop.eup %4042  ;;  %v874_v14 = vadd.f32 0.5, %v871_v44  ;;  %v1229_v44 = vld [vmem:[%s6147_s2 + $0x20] sm:$0xff] }
 0x181   :  { %v882_v38 = vmul.f32 %v4043_v5, %v849_v32  ;;  %4050 = vtanh.f32 %v4994_v31  ;;  %v4045_v58 = vpop.eup %4044  ;;  %v1228_v32 = vld [vmem:[%s6147_s2 + $0x18] sm:$0xff]  ;;  %v5029_v5 = vpack.c.bf16 %v1230_v18, %v1226_v9  ;;  %v1233_v9 = vld [vmem:[%s6147_s2 + $0x40] sm:$0xff] }
 0x182   :  { %v872_v39 = vmul.f32 0.5, %v4045_v58  ;;  %v1237_v18 = vld [vmem:[%s6147_s2 + $0x60] sm:$0xff] }
 0x183   :  { %v4997_v12 = vadd.f32 %v882_v38, %v879_v35  ;;  %v4047_v43 = vpop.eup %4046  ;;  %v1232_v35 = vld [vmem:[%s6147_s2 + $0x38] sm:$0xff]  ;;  %v1225_v38 = vld [vmem:[%s6147_s2] sm:$0xff]  ;;  %3612 = vmatprep.subr.bf16.mxu0 %v5029_v5 }
 0x184   :  { %v875_v45 = vadd.f32 0.5, %v872_v39  ;;  %v873_v16 = vmul.f32 0.5, %v4047_v43  ;;  %v5040_v58 = vpack.c.bf16 %v1232_v35, %v1228_v32  ;;  %v5042_v43 = vpack.c.bf16 %v1229_v44, %v1225_v38  ;;  %v1231_v39 = vld [vmem:[%s6147_s2 + $0x30] sm:$0xff] }
 0x185   :  { %4052 = vtanh.f32 %v4997_v12  ;;  %v5078_v35 = vpack.c.bf16 %v1237_v18, %v1233_v9  ;;  %v1235_v38 = vld [vmem:[%s6147_s2 + $0x50] sm:$0xff]  ;;  %v1241_v9 = vld [vmem:[%s6147_s2 + $0x80] sm:$0xff] }
 0x186   :  { %v876_v49 = vadd.f32 0.5, %v873_v16  ;;  %3644 = vmatprep.subr.bf16.mxu1 %v5040_v58  ;;  %v1238_v16 = vld [vmem:[%s6147_s2 + $0x68] sm:$0xff]  ;;  %v1239_v44 = vld [vmem:[%s6147_s2 + $0x70] sm:$0xff]  ;;  %v1245_v18 = vld [vmem:[%s6147_s2 + $0xa0] sm:$0xff] }
 0x187   :  { %v4049_v33 = vpop.eup %4048 }
 0x188   :  { %v5000_v0 = vmul.f32 %v4049_v33, %v874_v14  ;;  %v1227_v14 = vld [vmem:[%s6147_s2 + $0x10] sm:$0xff] }
 0x189   :  { %v5051_v33 = vpack.c.bf16 %v1231_v39, %v1227_v14  ;;  %v5087_v14 = vpack.c.bf16 %v1239_v44, %v1235_v38  ;;  %v1242_v39 = vld [vmem:[%s6147_s2 + $0x88] sm:$0xff]  ;;  %v5114_v44 = vpack.c.bf16 %v1245_v18, %v1241_v9  ;;  %v1249_v18 = vld [vmem:[%s6147_s2 + $0xc0] sm:$0xff] }
 0x18a   :  { %6230 = vst [vmem:[#allocation75_spill] sm:$0xff] %v5000_v0  ;;  %1039 = vmatmul.mubr.f32.vlgmr.msra.gmra.mrb[38].mxu0 %v5000_v0  ;;  %1122 = vmatmul.mubr.f32.vlgmr.msra.gmra.mrb[70].mxu1 %v5000_v0  ;;  %v1269_v0 = vld [vmem:[%s6147_s2 + $0x160] sm:$0xff] }
 0x18b   :  { %v4051_v21 = vpop.eup %4050  ;;  %1044 = vmatprep.mubr.f32.mxu0 %v6231_v27  ;;  %1127 = vmatprep.mubr.f32.mxu1 %v6231_v27 }
 0x18c   :  { %v5006_v2 = vmul.f32 %v4051_v21, %v875_v45  ;;  %3614 = vmatpush1.bf16.msra.mxu0 %v5042_v43  ;;  %v1234_v45 = vld [vmem:[%s6147_s2 + $0x48] sm:$0xff]  ;;  %v1236_v21 = vld [vmem:[%s6147_s2 + $0x58] sm:$0xff]  ;;  %3646 = vmatpush1.bf16.msra.mxu1 %v5051_v33 }
 0x18e   :  { %6232 = vst [vmem:[#allocation76_spill] sm:$0xff] %v5006_v2  ;;  %1045 = vmatmul.mubr.f32.gmra.mrb[40].mxu0 %v5006_v2  ;;  %1128 = vmatmul.mubr.f32.gmra.mrb[72].mxu1 %v5006_v2 }
 0x18f   :  { %v4053_v7 = vpop.eup %4052  ;;  %1050 = vmatprep.mubr.f32.mxu0 %v6231_v27  ;;  %1133 = vmatprep.mubr.f32.mxu1 %v6231_v27 }
 0x190   :  { %v5014_v53 = vmul.f32 %v4053_v7, %v876_v49  ;;  %v5065_v49 = vpack.c.bf16 %v1238_v16, %v1234_v45  ;;  %v1240_v7 = vld [vmem:[%s6147_s2 + $0x78] sm:$0xff]  ;;  %v1246_v45 = vld [vmem:[%s6147_s2 + $0xa8] sm:$0xff] }
 0x191   :  { %v5076_v32 = vpack.c.bf16 %v1240_v7, %v1236_v21  ;;  %v1244_v16 = vld [vmem:[%s6147_s2 + $0x98] sm:$0xff]  ;;  %v5101_v21 = vpack.c.bf16 %v1246_v45, %v1242_v39  ;;  %v1243_v39 = vld [vmem:[%s6147_s2 + $0x90] sm:$0xff] }
 0x192   :  { %6233 = vst [vmem:[#allocation77_spill] sm:$0xff] %v5014_v53  ;;  %1051 = vmatmul.mubr.f32.gmra.mrb[42].mxu0 %v5014_v53  ;;  %1134 = vmatmul.mubr.f32.gmra.mrb[74].mxu1 %v5014_v53  ;;  %v1248_v7 = vld [vmem:[%s6147_s2 + $0xb8] sm:$0xff]  ;;  %v1247_v45 = vld [vmem:[%s6147_s2 + $0xb0] sm:$0xff] }
 0x193   :  { %1353 = vmatprep.mubr.f32.mxu0 %v6231_v27  ;;  %1436 = vmatprep.mubr.f32.mxu1 %v6231_v27  ;;  %v5112_v38 = vpack.c.bf16 %v1248_v7, %v1244_v16  ;;  %v5123_v24 = vpack.c.bf16 %v1247_v45, %v1243_v39  ;;  %v1250_v16 = vld [vmem:[%s6147_s2 + $0xc8] sm:$0xff]  ;;  %v1253_v39 = vld [vmem:[%s6147_s2 + $0xe0] sm:$0xff] }
 0x194   :  { %3616 = vmatprep.subr.bf16.mxu0 %v5065_v49  ;;  %3648 = vmatprep.subr.bf16.mxu1 %v5076_v32  ;;  %v1254_v7 = vld [vmem:[%s6147_s2 + $0xe8] sm:$0xff]  ;;  %v5143_v45 = vpack.c.bf16 %v1253_v39, %v1249_v18  ;;  %v1261_v18 = vld [vmem:[%s6147_s2 + $0x120] sm:$0xff] }
 0x195   :  { %3618 = vmatpush1.bf16.msra.mxu0 %v5078_v35  ;;  %3650 = vmatpush1.bf16.msra.mxu1 %v5087_v14  ;;  %v5134_v9 = vpack.c.bf16 %v1254_v7, %v1250_v16  ;;  %v1258_v16 = vld [vmem:[%s6147_s2 + $0x108] sm:$0xff] }
 0x196   :  { %3620 = vmatprep.subr.bf16.mxu0 %v5101_v21  ;;  %3652 = vmatprep.subr.bf16.mxu1 %v5112_v38  ;;  %v1262_v7 = vld [vmem:[%s6147_s2 + $0x128] sm:$0xff] }
 0x197   :  { %v5154_v53 = vpack.c.bf16 %v1262_v7, %v1258_v16  ;;  %v1270_v16 = vld [vmem:[%s6147_s2 + $0x168] sm:$0xff]  ;;  %v1268_v7 = vld [vmem:[%s6147_s2 + $0x158] sm:$0xff] }
 0x199   :  { %3622 = vmatpush1.bf16.msra.mxu0 %v5114_v44  ;;  %3654 = vmatpush1.bf16.msra.mxu1 %v5123_v24 }
 0x19a   :  { %3656 = vmatprep.subr.bf16.mxu1 %v4619_v36  ;;  %3624 = vmatprep.subr.bf16.mxu0 %v5134_v9  ;;  %v1257_v36 = vld [vmem:[%s6147_s2 + $0x100] sm:$0xff] }
 0x19b   :  { %v5163_v39 = vpack.c.bf16 %v1261_v18, %v1257_v36  ;;  %v1272_v36 = vld [vmem:[%s6147_s2 + $0x178] sm:$0xff]  ;;  %v1265_v18 = vld [vmem:[%s6147_s2 + $0x140] sm:$0xff] }
 0x19c   :  { %v5188_v2 = vpack.c.bf16 %v1272_v36, %v1268_v7  ;;  %v5190_v61 = vpack.c.bf16 %v1269_v0, %v1265_v18  ;;  %v1274_v0 = vld [vmem:[%s6147_s2 + $0x188] sm:$0xff]  ;;  %v1276_v36 = vld [vmem:[%s6147_s2 + $0x198] sm:$0xff] }
 0x19d   :  { %3626 = vmatpush1.bf16.msra.mxu0 %v5143_v45  ;;  %3658 = vmatpush1.bf16.msra.mxu1 %v4640_v40  ;;  %v1266_v40 = vld [vmem:[%s6147_s2 + $0x148] sm:$0xff] }
 0x19e   :  { %3660 = vmatprep.subr.bf16.mxu1 %v4643_v41  ;;  %3628 = vmatprep.subr.bf16.mxu0 %v5154_v53  ;;  %v5177_v41 = vpack.c.bf16 %v1270_v16, %v1266_v40  ;;  %v1271_v40 = vld [vmem:[%s6147_s2 + $0x170] sm:$0xff]  ;;  %v1278_v7 = vld [vmem:[%s6147_s2 + $0x1a8] sm:$0xff] }
 0x19f   :  { %v5213_v18 = vpack.c.bf16 %v1278_v7, %v1274_v0  ;;  %v1275_v0 = vld [vmem:[%s6147_s2 + $0x190] sm:$0xff] }
 0x1a0   :  { %v1279_v7 = vld [vmem:[%s6147_s2 + $0x1b0] sm:$0xff] }
 0x1a1   :  { %3630 = vmatpush1.bf16.msra.mxu0 %v5163_v39  ;;  %3662 = vmatpush1.bf16.msra.mxu1 %v4661_v52  ;;  %v1267_v52 = vld [vmem:[%s6147_s2 + $0x150] sm:$0xff]  ;;  %v5235_v54 = vpack.c.bf16 %v1279_v7, %v1275_v0  ;;  %v1288_v0 = vld [vmem:[%s6147_s2 + $0x1f8] sm:$0xff]  ;;  %v1281_v7 = vld [vmem:[%s6147_s2 + $0x1c0] sm:$0xff] }
 0x1a2   :  { %3632 = vmatprep.subr.bf16.mxu0 %v5177_v41  ;;  %v5199_v16 = vpack.c.bf16 %v1271_v40, %v1267_v52  ;;  %3664 = vmatprep.subr.bf16.mxu1 %v5188_v2  ;;  %v1280_v52 = vld [vmem:[%s6147_s2 + $0x1b8] sm:$0xff]  ;;  %v1273_v40 = vld [vmem:[%s6147_s2 + $0x180] sm:$0xff]  ;;  %v5262_v34 = vpack.c.bf16 %v1285_v22, %v1281_v7 }
 0x1a3   :  { %v5224_v59 = vpack.c.bf16 %v1280_v52, %v1276_v36  ;;  %v5226_v6 = vpack.c.bf16 %v1277_v48, %v1273_v40  ;;  %v1282_v48 = vld [vmem:[%s6147_s2 + $0x1c8] sm:$0xff]  ;;  %v1284_v52 = vld [vmem:[%s6147_s2 + $0x1d8] sm:$0xff] }
 0x1a4   :  { %v1286_v36 = vld [vmem:[%s6147_s2 + $0x1e8] sm:$0xff]  ;;  %v5260_v50 = vpack.c.bf16 %v1288_v0, %v1284_v52 }
 0x1a5   :  { %3634 = vmatpush1.bf16.msra.mxu0 %v5190_v61  ;;  %3666 = vmatpush1.bf16.msra.mxu1 %v5199_v16  ;;  %v5249_v40 = vpack.c.bf16 %v1286_v36, %v1282_v48  ;;  %v1283_v48 = vld [vmem:[%s6147_s2 + $0x1d0] sm:$0xff] }
 0x1a6   :  { %3636 = vmatprep.subr.bf16.mxu0 %v5213_v18  ;;  %3668 = vmatprep.subr.bf16.mxu1 %v5224_v59  ;;  %v1287_v36 = vld [vmem:[%s6147_s2 + $0x1f0] sm:$0xff] }
 0x1a7   :  { %v5271_v46 = vpack.c.bf16 %v1287_v36, %v1283_v48 }
 0x1a9   :  { %3638 = vmatpush1.bf16.msra.mxu0 %v5226_v6  ;;  %3670 = vmatpush1.bf16.msra.mxu1 %v5235_v54 }
 0x1aa   :  { %3640 = vmatprep.subr.bf16.mxu0 %v5249_v40  ;;  %3672 = vmatprep.subr.bf16.mxu1 %v5260_v50 }
 0x1ad   :  { %3642 = vmatpush1.bf16.msra.mxu0 %v5262_v34  ;;  %3674 = vmatpush1.bf16.msra.mxu1 %v5271_v46 }
 0x1ae   :  { %3676 = vmatprep.subr.bf16.mxu0 %v5029_v5  ;;  %3708 = vmatprep.subr.bf16.mxu1 %v5040_v58 }
 0x25d   :  { %v1040_v22 = vpop.f32.mrb[38].mxu0  ;;  %v1123_v52 = vpop.f32.mrb[70].mxu1 }
 0x25e   :  { %v1140_v0 = vadd.f32 %v1040_v22, %v4813_v47  ;;  %v1142_v7 = vadd.f32 %v1123_v52, %v4875_v55  ;;  %v1042_v42 = vpop.f32.mrb[39].mxu0  ;;  %v1125_v11 = vpop.f32.mrb[71].mxu1 }
 0x25f   :  { %v1141_v48 = vadd.f32 %v1042_v42, %v4817_v51  ;;  %v1143_v36 = vadd.f32 %v1125_v11, %v4879_v60 }
 0x260   :  { %v1152_v56 = vmul.f32 0.5, %v1140_v0 }
 0x261   :  { %v1164_v17 = vmul.f32 0.5, %v1141_v48  ;;  %v1046_v19 = vpop.f32.mrb[40].mxu0  ;;  %v1129_v37 = vpop.f32.mrb[72].mxu1 }
 0x262   :  { %4054 = vtanh.f32 %v1152_v56  ;;  %v1144_v25 = vadd.f32 %v1046_v19, %v4821_v57  ;;  %v1146_v30 = vadd.f32 %v1129_v37, %v4883_v62  ;;  %v1048_v29 = vpop.f32.mrb[41].mxu0  ;;  %v1131_v28 = vpop.f32.mrb[73].mxu1 }
 0x263   :  { %4056 = vtanh.f32 %v1164_v17  ;;  %v1145_v47 = vadd.f32 %v1048_v29, %v4825_v1  ;;  %v1147_v55 = vadd.f32 %v1131_v28, %v4887_v63  ;;  %v1179_v29 = vmul.f32 0.5, %v1143_v36 }
 0x264   :  { %v1153_v22 = vmul.f32 0.5, %v1144_v25  ;;  %4058 = vtanh.f32 %v1142_v7 }
 0x265   :  { %v1165_v42 = vmul.f32 0.5, %v1145_v47  ;;  %v1052_v51 = vpop.f32.mrb[42].mxu0  ;;  %v1135_v11 = vpop.f32.mrb[74].mxu1  ;;  %v1180_v52 = vmul.f32 0.5, %v1147_v55 }
 0x266   :  { %4060 = vtanh.f32 %v1153_v22  ;;  %v1148_v60 = vadd.f32 %v1052_v51, %v4829_v13  ;;  %v1150_v56 = vadd.f32 %v1135_v11, %v4891_v3  ;;  %v1054_v57 = vpop.f32.mrb[43].mxu0  ;;  %v1137_v19 = vpop.f32.mrb[75].mxu1 }
 0x267   :  { %4062 = vtanh.f32 %v1165_v42  ;;  %v1149_v37 = vadd.f32 %v1054_v57, %v4833_v20  ;;  %v1151_v17 = vadd.f32 %v1137_v19, %v4895_v8 }
 0x268   :  { %v1154_v1 = vmul.f32 0.5, %v1148_v60  ;;  %4064 = vtanh.f32 %v1146_v30 }
 0x269   :  { %v1166_v25 = vmul.f32 0.5, %v1149_v37  ;;  %v1181_v22 = vmul.f32 0.5, %v1151_v17 }
 0x26a   :  { %4066 = vtanh.f32 %v1154_v1 }
 0x26b   :  { %4068 = vtanh.f32 %v1166_v25 }
 0x26c   :  { %v4055_v28 = vpop.eup %4054  ;;  %4070 = vtanh.f32 %v1179_v29 }
 0x26d   :  { %v4057_v62 = vpop.eup %4056  ;;  %v1158_v63 = vmul.f32 0.5, %v4055_v28  ;;  %4072 = vtanh.f32 %v1150_v56 }
 0x26e   :  { %v1170_v13 = vmul.f32 0.5, %v4057_v62  ;;  %v4059_v3 = vpop.eup %4058  ;;  %4074 = vtanh.f32 %v1180_v52 }
 0x26f   :  { %v1161_v0 = vadd.f32 0.5, %v1158_v63  ;;  %4076 = vtanh.f32 %v1181_v22 }
 0x270   :  { %v4061_v7 = vpop.eup %4060  ;;  %v1173_v48 = vadd.f32 0.5, %v1170_v13 }
 0x271   :  { %v4063_v20 = vpop.eup %4062  ;;  %v1194_v47 = vmul.f32 %v4059_v3, %v1161_v0  ;;  %v1159_v8 = vmul.f32 0.5, %v4061_v7 }
 0x272   :  { %v1191_v30 = vmul.f32 %v1173_v48, %v4991_v4  ;;  %v1171_v36 = vmul.f32 0.5, %v4063_v20  ;;  %v4065_v42 = vpop.eup %4064 }
 0x273   :  { %v1162_v51 = vadd.f32 0.5, %v1159_v8 }
 0x274   :  { %v4067_v11 = vpop.eup %4066  ;;  %v5291_v60 = vadd.f32 %v1194_v47, %v1191_v30  ;;  %v1174_v57 = vadd.f32 0.5, %v1171_v36 }
 0x275   :  { %v4069_v55 = vpop.eup %4068  ;;  %v1195_v56 = vmul.f32 %v4065_v42, %v1162_v51  ;;  %v1160_v19 = vmul.f32 0.5, %v4067_v11  ;;  %v1567_v11 = vld [vmem:[%s6147_s2 + $0xd8] sm:$0xff] }
 0x276   :  { %4078 = vtanh.f32 %v5291_v60  ;;  %v1192_v37 = vmul.f32 %v1174_v57, %v4994_v31  ;;  %v1172_v1 = vmul.f32 0.5, %v4069_v55  ;;  %v4071_v17 = vpop.eup %4070  ;;  %v1571_v57 = vld [vmem:[%s6147_s2 + $0xf8] sm:$0xff] }
 0x277   :  { %v1163_v29 = vadd.f32 0.5, %v1160_v19  ;;  %v4073_v4 = vpop.eup %4072  ;;  %v1185_v13 = vmul.f32 0.5, %v4071_v17  ;;  %v5349_v55 = vpack.c.bf16 %v1571_v57, %v1567_v11  ;;  %v1570_v19 = vld [vmem:[%s6147_s2 + $0xf0] sm:$0xff] }
 0x278   :  { %v5295_v25 = vadd.f32 %v1195_v56, %v1192_v37  ;;  %v1175_v28 = vadd.f32 0.5, %v1172_v1  ;;  %v4075_v52 = vpop.eup %4074  ;;  %v1566_v56 = vld [vmem:[%s6147_s2 + $0xd0] sm:$0xff]  ;;  %v1579_v1 = vld [vmem:[%s6147_s2 + $0x138] sm:$0xff] }
 0x279   :  { %v1196_v62 = vmul.f32 %v4073_v4, %v1163_v29  ;;  %v4077_v0 = vpop.eup %4076  ;;  %v1188_v31 = vadd.f32 0.5, %v1185_v13  ;;  %v1186_v7 = vmul.f32 0.5, %v4075_v52  ;;  %v5357_v37 = vpack.c.bf16 %v1570_v19, %v1566_v56  ;;  %v1574_v29 = vld [vmem:[%s6147_s2 + $0x110] sm:$0xff] }
 0x27a   :  { %4080 = vtanh.f32 %v5295_v25  ;;  %v1193_v63 = vmul.f32 %v1175_v28, %v4997_v12  ;;  %v1187_v8 = vmul.f32 0.5, %v4077_v0  ;;  %v1578_v4 = vld [vmem:[%s6147_s2 + $0x130] sm:$0xff] }
 0x27b   :  { %v1189_v47 = vadd.f32 0.5, %v1186_v7  ;;  %v5375_v28 = vpack.c.bf16 %v1578_v4, %v1574_v29 }
 0x27c   :  { %v5299_v3 = vadd.f32 %v1196_v62, %v1193_v63  ;;  %v1190_v30 = vadd.f32 0.5, %v1187_v8 }
 0x27e   :  { %4082 = vtanh.f32 %v5299_v3 }
 0x280   :  { %v4079_v48 = vpop.eup %4078 }
 0x281   :  { %v5302_v20 = vmul.f32 %v4079_v48, %v1188_v31 }
 0x283   :  { %1354 = vmatmul.mubr.f32.vlgmr.msra.gmra.mrb[44].mxu0 %v5302_v20  ;;  %1437 = vmatmul.mubr.f32.vlgmr.msra.gmra.mrb[76].mxu1 %v5302_v20 }
 0x284   :  { %v4081_v22 = vpop.eup %4080  ;;  %1359 = vmatprep.mubr.f32.mxu0 %v6231_v27  ;;  %1442 = vmatprep.mubr.f32.mxu1 %v6231_v27 }
 0x285   :  { %v5308_v12 = vmul.f32 %v4081_v22, %v1189_v47  ;;  %3678 = vmatpush1.bf16.msra.mxu0 %v5042_v43  ;;  %3710 = vmatpush1.bf16.msra.mxu1 %v5051_v33 }
 0x286   :  { %3680 = vmatprep.subr.bf16.mxu0 %v5065_v49  ;;  %3712 = vmatprep.subr.bf16.mxu1 %v5076_v32 }
 0x287   :  { %1360 = vmatmul.mubr.f32.gmra.mrb[46].mxu0 %v5308_v12  ;;  %1443 = vmatmul.mubr.f32.gmra.mrb[78].mxu1 %v5308_v12 }
 0x288   :  { %v4083_v36 = vpop.eup %4082  ;;  %1365 = vmatprep.mubr.f32.mxu0 %v6231_v27  ;;  %1448 = vmatprep.mubr.f32.mxu1 %v6231_v27 }
 0x289   :  { %v5318_v42 = vmul.f32 %v4083_v36, %v1190_v30  ;;  %3682 = vmatpush1.bf16.msra.mxu0 %v5078_v35  ;;  %3714 = vmatpush1.bf16.msra.mxu1 %v5087_v14  ;;  %v6234_v36 = vld [vmem:[#allocation22_spill] sm:$0xff] }
 0x28a   :  { %3684 = vmatprep.subr.bf16.mxu0 %v5101_v21  ;;  %3716 = vmatprep.subr.bf16.mxu1 %v5112_v38 }
 0x28b   :  { %1366 = vmatmul.mubr.f32.gmra.mrb[48].mxu0 %v5318_v42  ;;  %1449 = vmatmul.mubr.f32.gmra.mrb[80].mxu1 %v5318_v42 }
 0x28c   :  { %1668 = vmatprep.mubr.f32.mxu0 %v6231_v27  ;;  %1751 = vmatprep.mubr.f32.mxu1 %v6231_v27 }
 0x28d   :  { %3686 = vmatpush1.bf16.msra.mxu0 %v5114_v44  ;;  %3718 = vmatpush1.bf16.msra.mxu1 %v5123_v24 }
 0x28e   :  { %3688 = vmatprep.subr.bf16.mxu0 %v5134_v9  ;;  %3720 = vmatprep.subr.bf16.mxu1 %v5349_v55 }
 0x291   :  { %3690 = vmatpush1.bf16.msra.mxu0 %v5143_v45  ;;  %3722 = vmatpush1.bf16.msra.mxu1 %v5357_v37 }
 0x292   :  { %3692 = vmatprep.subr.bf16.mxu0 %v5154_v53 }
 0x295   :  { %3694 = vmatpush1.bf16.msra.mxu0 %v5163_v39 }
 0x296   :  { %3696 = vmatprep.subr.bf16.mxu0 %v5177_v41 }
 0x299   :  { %3698 = vmatpush1.bf16.msra.mxu0 %v5190_v61 }
 0x29a   :  { %3700 = vmatprep.subr.bf16.mxu0 %v5213_v18 }
 0x29d   :  { %3702 = vmatpush1.bf16.msra.mxu0 %v5226_v6 }
 0x29e   :  { %3704 = vmatprep.subr.bf16.mxu0 %v5249_v40 }
 0x2a1   :  { %3706 = vmatpush1.bf16.msra.mxu0 %v5262_v34 }
 0x2a2   :  { %3740 = vmatprep.subr.bf16.mxu0 %v5029_v5  ;;  %v1575_v5 = vld [vmem:[%s6147_s2 + $0x118] sm:$0xff] }
 0x2a3   :  { %v5367_v17 = vpack.c.bf16 %v1579_v1, %v1575_v5  ;;  %v6237_v5 = vld [vmem:[#allocation41_spill] sm:$0xff] }
 0x2a5   :  { %3724 = vmatprep.subr.bf16.mxu1 %v5367_v17 }
 0x2a6   :  { %3726 = vmatpush1.bf16.msra.mxu1 %v5375_v28 }
 0x2a7   :  { %3728 = vmatprep.subr.bf16.mxu1 %v5188_v2 }
 0x2aa   :  { %3730 = vmatpush1.bf16.msra.mxu1 %v5199_v16 }
 0x2ab   :  { %3732 = vmatprep.subr.bf16.mxu1 %v5224_v59 }
 0x2ae   :  { %3734 = vmatpush1.bf16.msra.mxu1 %v5235_v54 }
 0x2af   :  { %3736 = vmatprep.subr.bf16.mxu1 %v5260_v50 }
 0x2b2   :  { %3738 = vmatpush1.bf16.msra.mxu1 %v5271_v46 }
 0x2b3   :  { %3772 = vmatprep.subr.bf16.mxu1 %v5040_v58  ;;  %v6235_v58 = vld [vmem:[#allocation39_spill] sm:$0xff] }
 0x356   :  { %v1355_v62 = vpop.f32.mrb[44].mxu0  ;;  %v1438_v63 = vpop.f32.mrb[76].mxu1 }
 0x357   :  { %v1455_v13 = vadd.f32 %v1355_v62, %v4837_v23  ;;  %v1457_v52 = vadd.f32 %v1438_v63, %v4899_v10  ;;  %v1357_v0 = vpop.f32.mrb[45].mxu0  ;;  %v1440_v31 = vpop.f32.mrb[77].mxu1  ;;  %v6236_v23 = vld [vmem:[#allocation24_spill] sm:$0xff]  ;;  %v6238_v62 = vld [vmem:[#allocation25_spill] sm:$0xff] }
 0x358   :  { %v1456_v7 = vadd.f32 %v1357_v0, %v4841_v26  ;;  %v1458_v48 = vadd.f32 %v1440_v31, %v4903_v15 }
 0x359   :  { %v1467_v47 = vmul.f32 0.5, %v1455_v13  ;;  %v6239_v13 = vld [vmem:[#allocation43_spill] sm:$0xff] }
 0x35a   :  { %v1479_v8 = vmul.f32 0.5, %v1456_v7  ;;  %v1361_v22 = vpop.f32.mrb[46].mxu0  ;;  %v1444_v30 = vpop.f32.mrb[78].mxu1 }
 0x35b   :  { %4084 = vtanh.f32 %v1467_v47  ;;  %v1459_v11 = vadd.f32 %v1361_v22, %v6234_v36  ;;  %v1461_v57 = vadd.f32 %v1444_v30, %v6235_v58  ;;  %v1363_v56 = vpop.f32.mrb[47].mxu0  ;;  %v1446_v19 = vpop.f32.mrb[79].mxu1  ;;  %v6240_v47 = vld [vmem:[#allocation26_spill] sm:$0xff]  ;;  %v1494_v58 = vmul.f32 0.5, %v1458_v48 }
 0x35c   :  { %4086 = vtanh.f32 %v1479_v8  ;;  %v1460_v10 = vadd.f32 %v1363_v56, %v6236_v23  ;;  %v1462_v1 = vadd.f32 %v1446_v19, %v6237_v5  ;;  %v6241_v8 = vld [vmem:[#allocation44_spill] sm:$0xff] }
 0x35d   :  { %v1468_v29 = vmul.f32 0.5, %v1459_v11  ;;  %4088 = vtanh.f32 %v1457_v52 }
 0x35e   :  { %v1480_v26 = vmul.f32 0.5, %v1460_v10  ;;  %v1367_v15 = vpop.f32.mrb[48].mxu0  ;;  %v1450_v4 = vpop.f32.mrb[80].mxu1  ;;  %v1495_v10 = vmul.f32 0.5, %v1462_v1 }
 0x35f   :  { %4090 = vtanh.f32 %v1468_v29  ;;  %v1463_v63 = vadd.f32 %v1367_v15, %v6238_v62  ;;  %v1465_v0 = vadd.f32 %v1450_v4, %v6239_v13  ;;  %v1369_v31 = vpop.f32.mrb[49].mxu0  ;;  %v1452_v7 = vpop.f32.mrb[81].mxu1 }
 0x360   :  { %4092 = vtanh.f32 %v1480_v26  ;;  %v1464_v22 = vadd.f32 %v1369_v31, %v6240_v47  ;;  %v1466_v30 = vadd.f32 %v1452_v7, %v6241_v8 }
 0x361   :  { %v1469_v36 = vmul.f32 0.5, %v1463_v63  ;;  %4094 = vtanh.f32 %v1461_v57 }
 0x362   :  { %v1481_v11 = vmul.f32 0.5, %v1464_v22  ;;  %v1496_v63 = vmul.f32 0.5, %v1466_v30 }
 0x363   :  { %4096 = vtanh.f32 %v1469_v36 }
 0x364   :  { %4098 = vtanh.f32 %v1481_v11 }
 0x365   :  { %v4085_v52 = vpop.eup %4084  ;;  %4100 = vtanh.f32 %v1494_v58 }
 0x366   :  { %v4087_v56 = vpop.eup %4086  ;;  %v1473_v19 = vmul.f32 0.5, %v4085_v52  ;;  %4102 = vtanh.f32 %v1465_v0 }
 0x367   :  { %v1485_v23 = vmul.f32 0.5, %v4087_v56  ;;  %v4089_v5 = vpop.eup %4088  ;;  %4104 = vtanh.f32 %v1495_v10 }
 0x368   :  { %v1476_v29 = vadd.f32 0.5, %v1473_v19  ;;  %4106 = vtanh.f32 %v1496_v63 }
 0x369   :  { %v4091_v26 = vpop.eup %4090  ;;  %v1488_v15 = vadd.f32 0.5, %v1485_v23 }
 0x36a   :  { %v4093_v4 = vpop.eup %4092  ;;  %v1509_v62 = vmul.f32 %v4089_v5, %v1476_v29  ;;  %v1474_v13 = vmul.f32 0.5, %v4091_v26 }
 0x36b   :  { %v1506_v48 = vmul.f32 %v1488_v15, %v5291_v60  ;;  %v1486_v57 = vmul.f32 0.5, %v4093_v4  ;;  %v4095_v31 = vpop.eup %4094 }
 0x36c   :  { %v1477_v7 = vadd.f32 0.5, %v1474_v13 }
 0x36d   :  { %v4097_v47 = vpop.eup %4096  ;;  %v5399_v22 = vadd.f32 %v1509_v62, %v1506_v48  ;;  %v1489_v8 = vadd.f32 0.5, %v1486_v57 }
 0x36e   :  { %v4099_v1 = vpop.eup %4098  ;;  %v1510_v0 = vmul.f32 %v4095_v31, %v1477_v7  ;;  %v1475_v36 = vmul.f32 0.5, %v4097_v47 }
 0x36f   :  { %4108 = vtanh.f32 %v5399_v22  ;;  %v1507_v58 = vmul.f32 %v1489_v8, %v5295_v25  ;;  %v1487_v11 = vmul.f32 0.5, %v4099_v1  ;;  %v4101_v30 = vpop.eup %4100 }
 0x370   :  { %v1478_v52 = vadd.f32 0.5, %v1475_v36  ;;  %v4103_v60 = vpop.eup %4102  ;;  %v1500_v5 = vmul.f32 0.5, %v4101_v30 }
 0x371   :  { %v5403_v56 = vadd.f32 %v1510_v0, %v1507_v58  ;;  %v1490_v19 = vadd.f32 0.5, %v1487_v11  ;;  %v4105_v29 = vpop.eup %4104  ;;  %v6251_v11 = vld [vmem:[#allocation31_spill] sm:$0xff] }
 0x372   :  { %v1511_v23 = vmul.f32 %v4103_v60, %v1478_v52  ;;  %v4107_v15 = vpop.eup %4106  ;;  %v1503_v25 = vadd.f32 0.5, %v1500_v5  ;;  %v1501_v4 = vmul.f32 0.5, %v4105_v29  ;;  %v6252_v52 = vld [vmem:[#allocation49_spill] sm:$0xff]  ;;  %v6254_v29 = vld [vmem:[#allocation50_spill] sm:$0xff] }
 0x373   :  { %4110 = vtanh.f32 %v5403_v56  ;;  %v1508_v10 = vmul.f32 %v1490_v19, %v5299_v3  ;;  %v1502_v48 = vmul.f32 0.5, %v4107_v15 }
 0x374   :  { %v1504_v63 = vadd.f32 0.5, %v1501_v4 }
 0x375   :  { %v5407_v26 = vadd.f32 %v1511_v23, %v1508_v10  ;;  %v1505_v31 = vadd.f32 0.5, %v1502_v48  ;;  %v6253_v10 = vld [vmem:[#allocation32_spill] sm:$0xff] }
 0x377   :  { %4112 = vtanh.f32 %v5407_v26 }
 0x379   :  { %v4109_v62 = vpop.eup %4108 }
 0x37a   :  { %v5410_v13 = vmul.f32 %v4109_v62, %v1503_v25 }
 0x37c   :  { %6242 = vst [vmem:[#allocation22_spill] sm:$0xff] %v5410_v13  ;;  %1669 = vmatmul.mubr.f32.vlgmr.msra.gmra.mrb[50].mxu0 %v5410_v13  ;;  %1752 = vmatmul.mubr.f32.vlgmr.msra.gmra.mrb[82].mxu1 %v5410_v13 }
 0x37d   :  { %v4111_v57 = vpop.eup %4110  ;;  %1674 = vmatprep.mubr.f32.mxu0 %v6231_v27  ;;  %1757 = vmatprep.mubr.f32.mxu1 %v6231_v27 }
 0x37e   :  { %v5416_v3 = vmul.f32 %v4111_v57, %v1504_v63  ;;  %3742 = vmatpush1.bf16.msra.mxu0 %v5042_v43  ;;  %3774 = vmatpush1.bf16.msra.mxu1 %v5051_v33  ;;  %v6244_v33 = vld [vmem:[#allocation45_spill] sm:$0xff] }
 0x37f   :  { %3744 = vmatprep.subr.bf16.mxu0 %v5065_v49  ;;  %3776 = vmatprep.subr.bf16.mxu1 %v5076_v32 }
 0x380   :  { %1675 = vmatmul.mubr.f32.gmra.mrb[52].mxu0 %v5416_v3  ;;  %1758 = vmatmul.mubr.f32.gmra.mrb[84].mxu1 %v5416_v3 }
 0x381   :  { %v4113_v47 = vpop.eup %4112  ;;  %1680 = vmatprep.mubr.f32.mxu0 %v6231_v27  ;;  %1763 = vmatprep.mubr.f32.mxu1 %v6231_v27 }
 0x382   :  { %v5428_v43 = vmul.f32 %v4113_v47, %v1505_v31  ;;  %3746 = vmatpush1.bf16.msra.mxu0 %v5078_v35  ;;  %3778 = vmatpush1.bf16.msra.mxu1 %v5087_v14  ;;  %v6245_v35 = vld [vmem:[#allocation28_spill] sm:$0xff]  ;;  %v6246_v14 = vld [vmem:[#allocation46_spill] sm:$0xff] }
 0x383   :  { %3748 = vmatprep.subr.bf16.mxu0 %v5101_v21  ;;  %3780 = vmatprep.subr.bf16.mxu1 %v5112_v38 }
 0x384   :  { %1681 = vmatmul.mubr.f32.gmra.mrb[54].mxu0 %v5428_v43  ;;  %1764 = vmatmul.mubr.f32.gmra.mrb[86].mxu1 %v5428_v43 }
 0x385   :  { %1983 = vmatprep.mubr.f32.mxu0 %v6231_v27  ;;  %2066 = vmatprep.mubr.f32.mxu1 %v6231_v27 }
 0x386   :  { %3750 = vmatpush1.bf16.msra.mxu0 %v5114_v44  ;;  %3782 = vmatpush1.bf16.msra.mxu1 %v5123_v24  ;;  %v6243_v24 = vld [vmem:[#allocation27_spill] sm:$0xff] }
 0x387   :  { %3752 = vmatprep.subr.bf16.mxu0 %v5134_v9  ;;  %3784 = vmatprep.subr.bf16.mxu1 %v5349_v55 }
 0x38a   :  { %3754 = vmatpush1.bf16.msra.mxu0 %v5143_v45  ;;  %3786 = vmatpush1.bf16.msra.mxu1 %v5357_v37 }
 0x38b   :  { %3756 = vmatprep.subr.bf16.mxu0 %v5154_v53  ;;  %3788 = vmatprep.subr.bf16.mxu1 %v5367_v17 }
 0x38e   :  { %3758 = vmatpush1.bf16.msra.mxu0 %v5163_v39  ;;  %3790 = vmatpush1.bf16.msra.mxu1 %v5375_v28 }
 0x38f   :  { %3760 = vmatprep.subr.bf16.mxu0 %v5177_v41  ;;  %3792 = vmatprep.subr.bf16.mxu1 %v5188_v2 }
 0x392   :  { %3762 = vmatpush1.bf16.msra.mxu0 %v5190_v61  ;;  %3794 = vmatpush1.bf16.msra.mxu1 %v5199_v16  ;;  %v6249_v16 = vld [vmem:[#allocation30_spill] sm:$0xff] }
 0x393   :  { %3764 = vmatprep.subr.bf16.mxu0 %v5213_v18  ;;  %3796 = vmatprep.subr.bf16.mxu1 %v5224_v59 }
 0x396   :  { %3766 = vmatpush1.bf16.msra.mxu0 %v5226_v6  ;;  %3798 = vmatpush1.bf16.msra.mxu1 %v5235_v54 }
 0x397   :  { %3768 = vmatprep.subr.bf16.mxu0 %v5249_v40  ;;  %3800 = vmatprep.subr.bf16.mxu1 %v5260_v50  ;;  %v6250_v40 = vld [vmem:[#allocation48_spill] sm:$0xff] }
 0x39a   :  { %3770 = vmatpush1.bf16.msra.mxu0 %v5262_v34  ;;  %3802 = vmatpush1.bf16.msra.mxu1 %v5271_v46  ;;  %v6247_v34 = vld [vmem:[#allocation29_spill] sm:$0xff]  ;;  %v6248_v46 = vld [vmem:[#allocation47_spill] sm:$0xff] }
 0x44f   :  { %v1670_v2 = vpop.f32.mrb[50].mxu0  ;;  %v1753_v61 = vpop.f32.mrb[82].mxu1 }
 0x450   :  { %v1770_v53 = vadd.f32 %v1670_v2, %v6243_v24  ;;  %v1772_v49 = vadd.f32 %v1753_v61, %v6244_v33  ;;  %v1672_v32 = vpop.f32.mrb[51].mxu0  ;;  %v1755_v59 = vpop.f32.mrb[83].mxu1 }
 0x451   :  { %v1771_v6 = vadd.f32 %v1672_v32, %v6245_v35  ;;  %v1773_v54 = vadd.f32 %v1755_v59, %v6246_v14 }
 0x452   :  { %v1782_v21 = vmul.f32 0.5, %v1770_v53 }
 0x453   :  { %v1794_v38 = vmul.f32 0.5, %v1771_v6  ;;  %v1676_v44 = vpop.f32.mrb[52].mxu0  ;;  %v1759_v50 = vpop.f32.mrb[84].mxu1  ;;  %v1809_v4 = vmul.f32 0.5, %v1773_v54 }
 0x454   :  { %4114 = vtanh.f32 %v1782_v21  ;;  %v1774_v9 = vadd.f32 %v1676_v44, %v6247_v34  ;;  %v1776_v45 = vadd.f32 %v1759_v50, %v6248_v46  ;;  %v1678_v39 = vpop.f32.mrb[53].mxu0  ;;  %v1761_v41 = vpop.f32.mrb[85].mxu1 }
 0x455   :  { %4116 = vtanh.f32 %v1794_v38  ;;  %v1775_v18 = vadd.f32 %v1678_v39, %v6249_v16  ;;  %v1777_v8 = vadd.f32 %v1761_v41, %v6250_v40 }
 0x456   :  { %v1783_v1 = vmul.f32 0.5, %v1774_v9  ;;  %4118 = vtanh.f32 %v1772_v49 }
 0x457   :  { %v1795_v0 = vmul.f32 0.5, %v1775_v18  ;;  %v1682_v36 = vpop.f32.mrb[54].mxu0  ;;  %v1765_v58 = vpop.f32.mrb[86].mxu1  ;;  %v1810_v47 = vmul.f32 0.5, %v1777_v8 }
 0x458   :  { %4120 = vtanh.f32 %v1783_v1  ;;  %v1778_v30 = vadd.f32 %v1682_v36, %v6251_v11  ;;  %v1780_v60 = vadd.f32 %v1765_v58, %v6252_v52  ;;  %v1684_v19 = vpop.f32.mrb[55].mxu0  ;;  %v1767_v23 = vpop.f32.mrb[87].mxu1 }
 0x459   :  { %4122 = vtanh.f32 %v1795_v0  ;;  %v1779_v5 = vadd.f32 %v1684_v19, %v6253_v10  ;;  %v1781_v15 = vadd.f32 %v1767_v23, %v6254_v29 }
 0x45a   :  { %v1784_v25 = vmul.f32 0.5, %v1778_v30  ;;  %4124 = vtanh.f32 %v1776_v45 }
 0x45b   :  { %v1796_v62 = vmul.f32 0.5, %v1779_v5  ;;  %v1811_v59 = vmul.f32 0.5, %v1781_v15 }
 0x45c   :  { %4126 = vtanh.f32 %v1784_v25  ;;  %v2171_v25 = vld [vmem:[%s6147_s2 + $0x8] sm:$0xff] }
 0x45d   :  { %4128 = vtanh.f32 %v1796_v62  ;;  %v2173_v62 = vld [vmem:[%s6147_s2 + $0x18] sm:$0xff] }
 0x45e   :  { %v4115_v63 = vpop.eup %4114  ;;  %4130 = vtanh.f32 %v1809_v4  ;;  %v2175_v4 = vld [vmem:[%s6147_s2 + $0x28] sm:$0xff] }
 0x45f   :  { %v4117_v48 = vpop.eup %4116  ;;  %v1788_v57 = vmul.f32 0.5, %v4115_v63  ;;  %4132 = vtanh.f32 %v1780_v60  ;;  %v5513_v63 = vpack.c.bf16 %v2175_v4, %v2171_v25  ;;  %v2206_v4 = vld [vmem:[%s6147_s2 + $0x120] sm:$0xff] }
 0x460   :  { %v1800_v31 = vmul.f32 0.5, %v4117_v48  ;;  %v4119_v2 = vpop.eup %4118  ;;  %4134 = vtanh.f32 %v1810_v47  ;;  %v2177_v48 = vld [vmem:[%s6147_s2 + $0x38] sm:$0xff] }
 0x461   :  { %v1791_v61 = vadd.f32 0.5, %v1788_v57  ;;  %4136 = vtanh.f32 %v1811_v59  ;;  %v2170_v57 = vld [vmem:[%s6147_s2] sm:$0xff]  ;;  %v5524_v47 = vpack.c.bf16 %v2177_v48, %v2173_v62  ;;  %3804 = vmatprep.subr.bf16.mxu0 %v5513_v63  ;;  %v2215_v48 = vld [vmem:[%s6147_s2 + $0x168] sm:$0xff] }
 0x462   :  { %v4121_v24 = vpop.eup %4120  ;;  %v1803_v53 = vadd.f32 0.5, %v1800_v31  ;;  %v2174_v31 = vld [vmem:[%s6147_s2 + $0x20] sm:$0xff] }
 0x463   :  { %v4123_v33 = vpop.eup %4122  ;;  %v1824_v49 = vmul.f32 %v4119_v2, %v1791_v61  ;;  %v1789_v32 = vmul.f32 0.5, %v4121_v24  ;;  %v5526_v2 = vpack.c.bf16 %v2174_v31, %v2170_v57  ;;  %v2172_v61 = vld [vmem:[%s6147_s2 + $0x10] sm:$0xff]  ;;  %3836 = vmatprep.subr.bf16.mxu1 %v5524_v47  ;;  %v2213_v57 = vld [vmem:[%s6147_s2 + $0x158] sm:$0xff] }
 0x464   :  { %v1821_v35 = vmul.f32 %v1803_v53, %v5399_v22  ;;  %v1801_v6 = vmul.f32 0.5, %v4123_v33  ;;  %v4125_v14 = vpop.eup %4124  ;;  %v2176_v24 = vld [vmem:[%s6147_s2 + $0x30] sm:$0xff]  ;;  %v2179_v33 = vld [vmem:[%s6147_s2 + $0x48] sm:$0xff]  ;;  %v2217_v31 = vld [vmem:[%s6147_s2 + $0x178] sm:$0xff] }
 0x465   :  { %v1792_v54 = vadd.f32 0.5, %v1789_v32  ;;  %v5535_v53 = vpack.c.bf16 %v2176_v24, %v2172_v61  ;;  %v2181_v32 = vld [vmem:[%s6147_s2 + $0x58] sm:$0xff]  ;;  %v2210_v61 = vld [vmem:[%s6147_s2 + $0x140] sm:$0xff] }
 0x466   :  { %v4127_v21 = vpop.eup %4126  ;;  %v5473_v38 = vadd.f32 %v1824_v49, %v1821_v35  ;;  %v1804_v44 = vadd.f32 0.5, %v1801_v6  ;;  %v2183_v49 = vld [vmem:[%s6147_s2 + $0x68] sm:$0xff]  ;;  %v2185_v35 = vld [vmem:[%s6147_s2 + $0x78] sm:$0xff]  ;;  %v2178_v6 = vld [vmem:[%s6147_s2 + $0x40] sm:$0xff] }
 0x467   :  { %v4129_v50 = vpop.eup %4128  ;;  %v1825_v34 = vmul.f32 %v4125_v14, %v1792_v54  ;;  %v1790_v9 = vmul.f32 0.5, %v4127_v21  ;;  %v5549_v59 = vpack.c.bf16 %v2183_v49, %v2179_v33  ;;  %v2182_v14 = vld [vmem:[%s6147_s2 + $0x60] sm:$0xff]  ;;  %v5560_v54 = vpack.c.bf16 %v2185_v35, %v2181_v32  ;;  %v2216_v32 = vld [vmem:[%s6147_s2 + $0x170] sm:$0xff] }
 0x468   :  { %4138 = vtanh.f32 %v5473_v38  ;;  %v1822_v46 = vmul.f32 %v1804_v44, %v5403_v56  ;;  %v1802_v45 = vmul.f32 0.5, %v4129_v50  ;;  %v4131_v39 = vpop.eup %4130  ;;  %v5562_v21 = vpack.c.bf16 %v2182_v14, %v2178_v6  ;;  %v2180_v44 = vld [vmem:[%s6147_s2 + $0x50] sm:$0xff]  ;;  %v2214_v24 = vld [vmem:[%s6147_s2 + $0x160] sm:$0xff]  ;;  %v2219_v6 = vld [vmem:[%s6147_s2 + $0x188] sm:$0xff] }
 0x469   :  { %v1793_v41 = vadd.f32 0.5, %v1790_v9  ;;  %v4133_v22 = vpop.eup %4132  ;;  %v1815_v1 = vmul.f32 0.5, %v4131_v39  ;;  %v2184_v50 = vld [vmem:[%s6147_s2 + $0x70] sm:$0xff]  ;;  %v2187_v9 = vld [vmem:[%s6147_s2 + $0x88] sm:$0xff]  ;;  %v5672_v33 = vpack.c.bf16 %v2217_v31, %v2213_v57  ;;  %v5674_v49 = vpack.c.bf16 %v2214_v24, %v2210_v61 }
 0x46a   :  { %v5477_v16 = vadd.f32 %v1825_v34, %v1822_v46  ;;  %v1805_v18 = vadd.f32 0.5, %v1802_v45  ;;  %v4135_v0 = vpop.eup %4134  ;;  %v5571_v34 = vpack.c.bf16 %v2184_v50, %v2180_v44  ;;  %v2191_v46 = vld [vmem:[%s6147_s2 + $0xa8] sm:$0xff]  ;;  %v2189_v45 = vld [vmem:[%s6147_s2 + $0x98] sm:$0xff]  ;;  %v2232_v57 = vld [vmem:[%s6147_s2 + $0x1f0] sm:$0xff] }
 0x46b   :  { %v1826_v40 = vmul.f32 %v4133_v22, %v1793_v41  ;;  %v4137_v58 = vpop.eup %4136  ;;  %v1818_v56 = vadd.f32 0.5, %v1815_v1  ;;  %v1816_v11 = vmul.f32 0.5, %v4135_v0  ;;  %v5585_v39 = vpack.c.bf16 %v2191_v46, %v2187_v9  ;;  %v2193_v41 = vld [vmem:[%s6147_s2 + $0xb8] sm:$0xff]  ;;  %v2186_v22 = vld [vmem:[%s6147_s2 + $0x80] sm:$0xff]  ;;  %v2188_v1 = vld [vmem:[%s6147_s2 + $0x90] sm:$0xff] }
 0x46c   :  { %4140 = vtanh.f32 %v5477_v16  ;;  %v1823_v8 = vmul.f32 %v1805_v18, %v5407_v26  ;;  %v1817_v19 = vmul.f32 0.5, %v4137_v58  ;;  %v2190_v18 = vld [vmem:[%s6147_s2 + $0xa0] sm:$0xff]  ;;  %v2192_v0 = vld [vmem:[%s6147_s2 + $0xb0] sm:$0xff]  ;;  %v2223_v14 = vld [vmem:[%s6147_s2 + $0x1a8] sm:$0xff] }
 0x46d   :  { %v1819_v60 = vadd.f32 0.5, %v1816_v11  ;;  %v5607_v58 = vpack.c.bf16 %v2192_v0, %v2188_v1  ;;  %v2199_v11 = vld [vmem:[%s6147_s2 + $0xe8] sm:$0xff]  ;;  %v2221_v44 = vld [vmem:[%s6147_s2 + $0x198] sm:$0xff]  ;;  %v5697_v50 = vpack.c.bf16 %v2223_v14, %v2219_v6  ;;  %v2218_v46 = vld [vmem:[%s6147_s2 + $0x180] sm:$0xff] }
 0x46e   :  { %v5481_v36 = vadd.f32 %v1826_v40, %v1823_v8  ;;  %v1820_v10 = vadd.f32 0.5, %v1817_v19  ;;  %v5596_v40 = vpack.c.bf16 %v2193_v41, %v2189_v45  ;;  %v5598_v8 = vpack.c.bf16 %v2190_v18, %v2186_v22  ;;  %v2198_v19 = vld [vmem:[%s6147_s2 + $0xe0] sm:$0xff]  ;;  %v2225_v9 = vld [vmem:[%s6147_s2 + $0x1b8] sm:$0xff]  ;;  %v2220_v18 = vld [vmem:[%s6147_s2 + $0x190] sm:$0xff] }
 0x46f   :  { %v2222_v45 = vld [vmem:[%s6147_s2 + $0x1a0] sm:$0xff]  ;;  %v5708_v41 = vpack.c.bf16 %v2225_v9, %v2221_v44  ;;  %v2224_v1 = vld [vmem:[%s6147_s2 + $0x1b0] sm:$0xff] }
 0x470   :  { %4142 = vtanh.f32 %v5481_v36  ;;  %v5710_v22 = vpack.c.bf16 %v2222_v45, %v2218_v46  ;;  %v5719_v0 = vpack.c.bf16 %v2224_v1, %v2220_v18  ;;  %v6258_v6 = vld [vmem:[#allocation51_spill] sm:$0xff]  ;;  %v6259_v46 = vld [vmem:[#allocation34_spill] sm:$0xff]  ;;  %v6260_v18 = vld [vmem:[#allocation52_spill] sm:$0xff] }
 0x472   :  { %v4139_v30 = vpop.eup %4138 }
 0x473   :  { %v5484_v52 = vmul.f32 %v4139_v30, %v1818_v56  ;;  %v2195_v56 = vld [vmem:[%s6147_s2 + $0xc8] sm:$0xff] }
 0x474   :  { %v5618_v30 = vpack.c.bf16 %v2199_v11, %v2195_v56  ;;  %v2227_v56 = vld [vmem:[%s6147_s2 + $0x1c8] sm:$0xff] }
 0x475   :  { %1984 = vmatmul.mubr.f32.vlgmr.msra.gmra.mrb[56].mxu0 %v5484_v52  ;;  %2067 = vmatmul.mubr.f32.vlgmr.msra.gmra.mrb[88].mxu1 %v5484_v52  ;;  %v2231_v11 = vld [vmem:[%s6147_s2 + $0x1e8] sm:$0xff] }
 0x476   :  { %v4141_v23 = vpop.eup %4140  ;;  %1989 = vmatprep.mubr.f32.mxu0 %v6231_v27  ;;  %2072 = vmatprep.mubr.f32.mxu1 %v6231_v27 }
 0x477   :  { %v5490_v26 = vmul.f32 %v4141_v23, %v1819_v60  ;;  %3806 = vmatpush1.bf16.msra.mxu0 %v5526_v2  ;;  %3838 = vmatpush1.bf16.msra.mxu1 %v5535_v53  ;;  %v2194_v60 = vld [vmem:[%s6147_s2 + $0xc0] sm:$0xff] }
 0x478   :  { %3808 = vmatprep.subr.bf16.mxu0 %v5549_v59  ;;  %3840 = vmatprep.subr.bf16.mxu1 %v5560_v54  ;;  %v5627_v23 = vpack.c.bf16 %v2198_v19, %v2194_v60  ;;  %v2229_v60 = vld [vmem:[%s6147_s2 + $0x1d8] sm:$0xff]  ;;  %v5733_v19 = vpack.c.bf16 %v2231_v11, %v2227_v56 }
 0x479   :  { %6255 = vst [vmem:[#allocation39_spill] sm:$0xff] %v5490_v26  ;;  %1990 = vmatmul.mubr.f32.gmra.mrb[58].mxu0 %v5490_v26  ;;  %2073 = vmatmul.mubr.f32.gmra.mrb[90].mxu1 %v5490_v26 }
 0x47a   :  { %v4143_v5 = vpop.eup %4142  ;;  %1995 = vmatprep.mubr.f32.mxu0 %v6231_v27  ;;  %2078 = vmatprep.mubr.f32.mxu1 %v6231_v27 }
 0x47b   :  { %v5496_v29 = vmul.f32 %v4143_v5, %v1820_v10  ;;  %3810 = vmatpush1.bf16.msra.mxu0 %v5562_v21  ;;  %3842 = vmatpush1.bf16.msra.mxu1 %v5571_v34  ;;  %v2203_v10 = vld [vmem:[%s6147_s2 + $0x108] sm:$0xff] }
 0x47c   :  { %3812 = vmatprep.subr.bf16.mxu0 %v5585_v39  ;;  %3844 = vmatprep.subr.bf16.mxu1 %v5596_v40  ;;  %v2207_v5 = vld [vmem:[%s6147_s2 + $0x128] sm:$0xff] }
 0x47d   :  { %6256 = vst [vmem:[#allocation24_spill] sm:$0xff] %v5496_v29  ;;  %1996 = vmatmul.mubr.f32.gmra.mrb[60].mxu0 %v5496_v29  ;;  %2079 = vmatmul.mubr.f32.gmra.mrb[92].mxu1 %v5496_v29  ;;  %v5638_v25 = vpack.c.bf16 %v2207_v5, %v2203_v10  ;;  %v2233_v10 = vld [vmem:[%s6147_s2 + $0x1f8] sm:$0xff]  ;;  %v2226_v5 = vld [vmem:[%s6147_s2 + $0x1c0] sm:$0xff] }
 0x47e   :  { %2298 = vmatprep.mubr.f32.mxu0 %v6231_v27  ;;  %2381 = vmatprep.mubr.f32.mxu1 %v6231_v27 }
 0x47f   :  { %3814 = vmatpush1.bf16.msra.mxu0 %v5598_v8  ;;  %3846 = vmatpush1.bf16.msra.mxu1 %v5607_v58 }
 0x480   :  { %3848 = vmatprep.subr.bf16.mxu1 %v5349_v55  ;;  %3816 = vmatprep.subr.bf16.mxu0 %v5618_v30  ;;  %v2202_v55 = vld [vmem:[%s6147_s2 + $0x100] sm:$0xff] }
 0x481   :  { %v5647_v62 = vpack.c.bf16 %v2206_v4, %v2202_v55  ;;  %v2230_v55 = vld [vmem:[%s6147_s2 + $0x1e0] sm:$0xff]  ;;  %v5744_v4 = vpack.c.bf16 %v2233_v10, %v2229_v60 }
 0x483   :  { %3818 = vmatpush1.bf16.msra.mxu0 %v5627_v23  ;;  %3850 = vmatpush1.bf16.msra.mxu1 %v5357_v37  ;;  %v2211_v37 = vld [vmem:[%s6147_s2 + $0x148] sm:$0xff] }
 0x484   :  { %3852 = vmatprep.subr.bf16.mxu1 %v5367_v17  ;;  %3820 = vmatprep.subr.bf16.mxu0 %v5638_v25  ;;  %v5661_v17 = vpack.c.bf16 %v2215_v48, %v2211_v37  ;;  %v5746_v37 = vpack.c.bf16 %v2230_v55, %v2226_v5  ;;  %v2228_v48 = vld [vmem:[%s6147_s2 + $0x1d0] sm:$0xff] }
 0x485   :  { %v5755_v31 = vpack.c.bf16 %v2232_v57, %v2228_v48  ;;  %v6261_v5 = vld [vmem:[#allocation35_spill] sm:$0xff]  ;;  %v6262_v48 = vld [vmem:[#allocation53_spill] sm:$0xff] }
 0x487   :  { %3822 = vmatpush1.bf16.msra.mxu0 %v5647_v62  ;;  %3854 = vmatpush1.bf16.msra.mxu1 %v5375_v28  ;;  %v2212_v28 = vld [vmem:[%s6147_s2 + $0x150] sm:$0xff] }
 0x488   :  { %3824 = vmatprep.subr.bf16.mxu0 %v5661_v17  ;;  %v5683_v35 = vpack.c.bf16 %v2216_v32, %v2212_v28  ;;  %3856 = vmatprep.subr.bf16.mxu1 %v5672_v33  ;;  %v6257_v28 = vld [vmem:[#allocation33_spill] sm:$0xff] }
 0x48b   :  { %3826 = vmatpush1.bf16.msra.mxu0 %v5674_v49  ;;  %3858 = vmatpush1.bf16.msra.mxu1 %v5683_v35 }
 0x48c   :  { %3828 = vmatprep.subr.bf16.mxu0 %v5697_v50  ;;  %3860 = vmatprep.subr.bf16.mxu1 %v5708_v41 }
 0x48f   :  { %3830 = vmatpush1.bf16.msra.mxu0 %v5710_v22  ;;  %3862 = vmatpush1.bf16.msra.mxu1 %v5719_v0 }
 0x490   :  { %3832 = vmatprep.subr.bf16.mxu0 %v5733_v19  ;;  %3864 = vmatprep.subr.bf16.mxu1 %v5744_v4 }
 0x493   :  { %3834 = vmatpush1.bf16.msra.mxu0 %v5746_v37  ;;  %3866 = vmatpush1.bf16.msra.mxu1 %v5755_v31 }
 0x494   :  { %3868 = vmatprep.subr.bf16.mxu0 %v5513_v63  ;;  %3900 = vmatprep.subr.bf16.mxu1 %v5524_v47 }
 0x548   :  { %v1985_v61 = vpop.f32.mrb[56].mxu0  ;;  %v2068_v24 = vpop.f32.mrb[88].mxu1 }
 0x549   :  { %v2085_v32 = vadd.f32 %v1985_v61, %v6257_v28  ;;  %v2087_v14 = vadd.f32 %v2068_v24, %v6258_v6  ;;  %v1987_v44 = vpop.f32.mrb[57].mxu0  ;;  %v2070_v9 = vpop.f32.mrb[89].mxu1  ;;  %v6263_v61 = vld [vmem:[#allocation36_spill] sm:$0xff]  ;;  %v6264_v28 = vld [vmem:[#allocation54_spill] sm:$0xff] }
 0x54a   :  { %v2086_v45 = vadd.f32 %v1987_v44, %v6259_v46  ;;  %v2088_v1 = vadd.f32 %v2070_v9, %v6260_v18  ;;  %v6265_v46 = vld [vmem:[#allocation37_spill] sm:$0xff]  ;;  %v6266_v18 = vld [vmem:[#allocation55_spill] sm:$0xff] }
 0x54b   :  { %v2097_v56 = vmul.f32 0.5, %v2085_v32 }
 0x54c   :  { %v2109_v11 = vmul.f32 0.5, %v2086_v45  ;;  %v1991_v60 = vpop.f32.mrb[58].mxu0  ;;  %v2074_v10 = vpop.f32.mrb[90].mxu1 }
 0x54d   :  { %4144 = vtanh.f32 %v2097_v56  ;;  %v2089_v55 = vadd.f32 %v1991_v60, %v6261_v5  ;;  %v2091_v57 = vadd.f32 %v2074_v10, %v6262_v48  ;;  %v1993_v15 = vpop.f32.mrb[59].mxu0  ;;  %v2076_v7 = vpop.f32.mrb[91].mxu1  ;;  %v6267_v10 = vld [vmem:[#allocation38_spill] sm:$0xff] }
 0x54e   :  { %4146 = vtanh.f32 %v2109_v11  ;;  %v2090_v24 = vadd.f32 %v1993_v15, %v6263_v61  ;;  %v2092_v6 = vadd.f32 %v2076_v7, %v6264_v28  ;;  %v6268_v11 = vld [vmem:[#allocation56_spill] sm:$0xff]  ;;  %v2124_v61 = vmul.f32 0.5, %v2088_v1 }
 0x54f   :  { %v2098_v51 = vmul.f32 0.5, %v2089_v55  ;;  %4148 = vtanh.f32 %v2087_v14 }
 0x550   :  { %v2110_v44 = vmul.f32 0.5, %v2090_v24  ;;  %v1997_v9 = vpop.f32.mrb[60].mxu0  ;;  %v2080_v32 = vpop.f32.mrb[92].mxu1  ;;  %v2125_v28 = vmul.f32 0.5, %v2092_v6 }
 0x551   :  { %4150 = vtanh.f32 %v2098_v51  ;;  %v2093_v45 = vadd.f32 %v1997_v9, %v6265_v46  ;;  %v2095_v56 = vadd.f32 %v2080_v32, %v6266_v18  ;;  %v1999_v60 = vpop.f32.mrb[61].mxu0  ;;  %v2082_v5 = vpop.f32.mrb[93].mxu1 }
 0x552   :  { %4152 = vtanh.f32 %v2110_v44  ;;  %v2094_v48 = vadd.f32 %v1999_v60, %v6267_v10  ;;  %v2096_v26 = vadd.f32 %v2082_v5, %v6268_v11 }
 0x553   :  { %v2099_v15 = vmul.f32 0.5, %v2093_v45  ;;  %4154 = vtanh.f32 %v2091_v57 }
 0x554   :  { %v2111_v7 = vmul.f32 0.5, %v2094_v48  ;;  %v2126_v45 = vmul.f32 0.5, %v2096_v26 }
 0x555   :  { %4156 = vtanh.f32 %v2099_v15 }
 0x556   :  { %4158 = vtanh.f32 %v2111_v7 }
 0x557   :  { %v4145_v14 = vpop.eup %4144  ;;  %4160 = vtanh.f32 %v2124_v61 }
 0x558   :  { %v4147_v55 = vpop.eup %4146  ;;  %v2103_v51 = vmul.f32 0.5, %v4145_v14  ;;  %4162 = vtanh.f32 %v2095_v56 }
 0x559   :  { %v2115_v24 = vmul.f32 0.5, %v4147_v55  ;;  %v4149_v9 = vpop.eup %4148  ;;  %4164 = vtanh.f32 %v2125_v28 }
 0x55a   :  { %v2106_v32 = vadd.f32 0.5, %v2103_v51  ;;  %4166 = vtanh.f32 %v2126_v45 }
 0x55b   :  { %v4151_v44 = vpop.eup %4150  ;;  %v2118_v46 = vadd.f32 0.5, %v2115_v24 }
 0x55c   :  { %v4153_v18 = vpop.eup %4152  ;;  %v2139_v60 = vmul.f32 %v4149_v9, %v2106_v32  ;;  %v2104_v5 = vmul.f32 0.5, %v4151_v44 }
 0x55d   :  { %v2136_v1 = vmul.f32 %v2118_v46, %v5473_v38  ;;  %v2116_v57 = vmul.f32 0.5, %v4153_v18  ;;  %v4155_v10 = vpop.eup %4154 }
 0x55e   :  { %v2107_v48 = vadd.f32 0.5, %v2104_v5 }
 0x55f   :  { %v4157_v11 = vpop.eup %4156  ;;  %v5775_v15 = vadd.f32 %v2139_v60, %v2136_v1  ;;  %v2119_v61 = vadd.f32 0.5, %v2116_v57 }
 0x560   :  { %v4159_v6 = vpop.eup %4158  ;;  %v2140_v56 = vmul.f32 %v4155_v10, %v2107_v48  ;;  %v2105_v7 = vmul.f32 0.5, %v4157_v11 }
 0x561   :  { %4168 = vtanh.f32 %v5775_v15  ;;  %v2137_v14 = vmul.f32 %v2119_v61, %v5477_v16  ;;  %v2117_v55 = vmul.f32 0.5, %v4159_v6  ;;  %v4161_v26 = vpop.eup %4160 }
 0x562   :  { %v2108_v51 = vadd.f32 0.5, %v2105_v7  ;;  %v4163_v38 = vpop.eup %4162  ;;  %v2130_v44 = vmul.f32 0.5, %v4161_v26  ;;  %v2512_v7 = vld [vmem:[%s6147_s2 + $0xd8] sm:$0xff]  ;;  %v2511_v26 = vld [vmem:[%s6147_s2 + $0xd0] sm:$0xff] }
 0x563   :  { %v5779_v24 = vadd.f32 %v2140_v56, %v2137_v14  ;;  %v2120_v28 = vadd.f32 0.5, %v2117_v55  ;;  %v4165_v46 = vpop.eup %4164  ;;  %v2516_v14 = vld [vmem:[%s6147_s2 + $0xf8] sm:$0xff] }
 0x564   :  { %v2141_v9 = vmul.f32 %v4163_v38, %v2108_v51  ;;  %v4167_v60 = vpop.eup %4166  ;;  %v2133_v16 = vadd.f32 0.5, %v2130_v44  ;;  %v2131_v5 = vmul.f32 0.5, %v4165_v46  ;;  %v5833_v55 = vpack.c.bf16 %v2516_v14, %v2512_v7  ;;  %v2515_v51 = vld [vmem:[%s6147_s2 + $0xf0] sm:$0xff]  ;;  %v6275_v14 = vld [vmem:[#allocation58_spill] sm:$0xff] }
 0x565   :  { %4170 = vtanh.f32 %v5779_v24  ;;  %v2138_v32 = vmul.f32 %v2120_v28, %v5481_v36  ;;  %v2132_v10 = vmul.f32 0.5, %v4167_v60  ;;  %v5841_v38 = vpack.c.bf16 %v2515_v51, %v2511_v26  ;;  %v2524_v28 = vld [vmem:[%s6147_s2 + $0x138] sm:$0xff]  ;;  %v2523_v44 = vld [vmem:[%s6147_s2 + $0x130] sm:$0xff] }
 0x566   :  { %v2134_v57 = vadd.f32 0.5, %v2131_v5  ;;  %v6272_v5 = vld [vmem:[#allocation40_spill] sm:$0xff] }
 0x567   :  { %v5783_v18 = vadd.f32 %v2141_v9, %v2138_v32  ;;  %v2135_v11 = vadd.f32 0.5, %v2132_v10  ;;  %v2519_v32 = vld [vmem:[%s6147_s2 + $0x110] sm:$0xff] }
 0x568   :  { %v5859_v46 = vpack.c.bf16 %v2523_v44, %v2519_v32  ;;  %v6276_v44 = vld [vmem:[#allocation7_spill] sm:$0xff] }
 0x569   :  { %4172 = vtanh.f32 %v5783_v18 }
 0x56b   :  { %v4169_v45 = vpop.eup %4168 }
 0x56c   :  { %v5786_v1 = vmul.f32 %v4169_v45, %v2133_v16 }
 0x56e   :  { %6269 = vst [vmem:[#allocation41_spill] sm:$0xff] %v5786_v1  ;;  %2299 = vmatmul.mubr.f32.vlgmr.msra.gmra.mrb[62].mxu0 %v5786_v1  ;;  %2382 = vmatmul.mubr.f32.vlgmr.msra.gmra.mrb[94].mxu1 %v5786_v1 }
 0x56f   :  { %v4171_v48 = vpop.eup %4170  ;;  %2304 = vmatprep.mubr.f32.mxu0 %v6231_v27  ;;  %2387 = vmatprep.mubr.f32.mxu1 %v6231_v27 }
 0x570   :  { %v5792_v36 = vmul.f32 %v4171_v48, %v2134_v57  ;;  %3870 = vmatpush1.bf16.msra.mxu0 %v5526_v2  ;;  %3902 = vmatpush1.bf16.msra.mxu1 %v5535_v53  ;;  %v6273_v57 = vld [vmem:[#allocation57_spill] sm:$0xff] }
 0x571   :  { %3872 = vmatprep.subr.bf16.mxu0 %v5549_v59  ;;  %3904 = vmatprep.subr.bf16.mxu1 %v5560_v54 }
 0x572   :  { %6270 = vst [vmem:[#allocation25_spill] sm:$0xff] %v5792_v36  ;;  %2305 = vmatmul.mubr.f32.gmra.mrb[64].mxu0 %v5792_v36  ;;  %2388 = vmatmul.mubr.f32.gmra.mrb[96].mxu1 %v5792_v36 }
 0x573   :  { %v4173_v6 = vpop.eup %4172  ;;  %2310 = vmatprep.mubr.f32.mxu0 %v6231_v27  ;;  %2393 = vmatprep.mubr.f32.mxu1 %v6231_v27 }
 0x574   :  { %v5804_v56 = vmul.f32 %v4173_v6, %v2135_v11  ;;  %3874 = vmatpush1.bf16.msra.mxu0 %v5562_v21  ;;  %3906 = vmatpush1.bf16.msra.mxu1 %v5571_v34  ;;  %v6274_v6 = vld [vmem:[#allocation42_spill] sm:$0xff] }
 0x575   :  { %3876 = vmatprep.subr.bf16.mxu0 %v5585_v39  ;;  %3908 = vmatprep.subr.bf16.mxu1 %v5596_v40 }
 0x576   :  { %6271 = vst [vmem:[#allocation43_spill] sm:$0xff] %v5804_v56  ;;  %2311 = vmatmul.mubr.f32.gmra.mrb[66].mxu0 %v5804_v56  ;;  %2394 = vmatmul.mubr.f32.gmra.mrb[98].mxu1 %v5804_v56 }
 0x577   :  { %2613 = vmatprep.mubr.f32.mxu0 %v6231_v27  ;;  %2696 = vmatprep.mubr.f32.mxu1 %v6231_v27 }
 0x578   :  { %3878 = vmatpush1.bf16.msra.mxu0 %v5598_v8  ;;  %3910 = vmatpush1.bf16.msra.mxu1 %v5607_v58 }
 0x579   :  { %3880 = vmatprep.subr.bf16.mxu0 %v5618_v30  ;;  %3912 = vmatprep.subr.bf16.mxu1 %v5833_v55 }
 0x57c   :  { %3882 = vmatpush1.bf16.msra.mxu0 %v5627_v23  ;;  %3914 = vmatpush1.bf16.msra.mxu1 %v5841_v38 }
 0x57d   :  { %3884 = vmatprep.subr.bf16.mxu0 %v5638_v25 }
 0x580   :  { %3886 = vmatpush1.bf16.msra.mxu0 %v5647_v62 }
 0x581   :  { %3888 = vmatprep.subr.bf16.mxu0 %v5661_v17 }
 0x584   :  { %3890 = vmatpush1.bf16.msra.mxu0 %v5674_v49 }
 0x585   :  { %3892 = vmatprep.subr.bf16.mxu0 %v5697_v50 }
 0x588   :  { %3894 = vmatpush1.bf16.msra.mxu0 %v5710_v22 }
 0x589   :  { %3896 = vmatprep.subr.bf16.mxu0 %v5733_v19 }
 0x58c   :  { %3898 = vmatpush1.bf16.msra.mxu0 %v5746_v37 }
 0x58d   :  { %3932 = vmatprep.subr.bf16.mxu0 %v5513_v63  ;;  %v2520_v63 = vld [vmem:[%s6147_s2 + $0x118] sm:$0xff] }
 0x58e   :  { %v5851_v9 = vpack.c.bf16 %v2524_v28, %v2520_v63 }
 0x590   :  { %3916 = vmatprep.subr.bf16.mxu1 %v5851_v9 }
 0x591   :  { %3918 = vmatpush1.bf16.msra.mxu1 %v5859_v46 }
 0x592   :  { %3920 = vmatprep.subr.bf16.mxu1 %v5672_v33 }
 0x595   :  { %3922 = vmatpush1.bf16.msra.mxu1 %v5683_v35 }
 0x596   :  { %3924 = vmatprep.subr.bf16.mxu1 %v5708_v41 }
 0x599   :  { %3926 = vmatpush1.bf16.msra.mxu1 %v5719_v0 }
 0x59a   :  { %3928 = vmatprep.subr.bf16.mxu1 %v5744_v4 }
 0x59d   :  { %3930 = vmatpush1.bf16.msra.mxu1 %v5755_v31 }
 0x59e   :  { %3964 = vmatprep.subr.bf16.mxu1 %v5524_v47  ;;  %v6277_v47 = vld [vmem:[#allocation59_spill] sm:$0xff] }
 0x641   :  { %v2300_v60 = vpop.f32.mrb[62].mxu0  ;;  %v2383_v16 = vpop.f32.mrb[94].mxu1 }
 0x642   :  { %v2400_v45 = vadd.f32 %v2300_v60, %v6272_v5  ;;  %v2402_v10 = vadd.f32 %v2383_v16, %v6273_v57  ;;  %v2302_v48 = vpop.f32.mrb[63].mxu0  ;;  %v2385_v11 = vpop.f32.mrb[95].mxu1  ;;  %v6278_v60 = vld [vmem:[#allocation8_spill] sm:$0xff] }
 0x643   :  { %v2401_v7 = vadd.f32 %v2302_v48, %v6274_v6  ;;  %v2403_v26 = vadd.f32 %v2385_v11, %v6275_v14  ;;  %v6279_v5 = vld [vmem:[#allocation60_spill] sm:$0xff]  ;;  %v6280_v6 = vld [vmem:[#allocation9_spill] sm:$0xff] }
 0x644   :  { %v2412_v51 = vmul.f32 0.5, %v2400_v45  ;;  %v6281_v14 = vld [vmem:[#allocation61_spill] sm:$0xff] }
 0x645   :  { %v2424_v63 = vmul.f32 0.5, %v2401_v7  ;;  %v2306_v28 = vpop.f32.mrb[64].mxu0  ;;  %v2389_v32 = vpop.f32.mrb[96].mxu1 }
 0x646   :  { %4174 = vtanh.f32 %v2412_v51  ;;  %v2404_v61 = vadd.f32 %v2306_v28, %v6276_v44  ;;  %v2406_v56 = vadd.f32 %v2389_v32, %v6277_v47  ;;  %v2308_v1 = vpop.f32.mrb[65].mxu0  ;;  %v2391_v36 = vpop.f32.mrb[97].mxu1  ;;  %v6282_v32 = vld [vmem:[#allocation10_spill] sm:$0xff] }
 0x647   :  { %4176 = vtanh.f32 %v2424_v63  ;;  %v2405_v16 = vadd.f32 %v2308_v1, %v6278_v60  ;;  %v2407_v57 = vadd.f32 %v2391_v36, %v6279_v5  ;;  %v6283_v63 = vld [vmem:[#allocation62_spill] sm:$0xff]  ;;  %v2439_v60 = vmul.f32 0.5, %v2403_v26 }
 0x648   :  { %v2413_v29 = vmul.f32 0.5, %v2404_v61  ;;  %4178 = vtanh.f32 %v2402_v10 }
 0x649   :  { %v2425_v48 = vmul.f32 0.5, %v2405_v16  ;;  %v2312_v11 = vpop.f32.mrb[66].mxu0  ;;  %v2395_v45 = vpop.f32.mrb[98].mxu1  ;;  %v2440_v5 = vmul.f32 0.5, %v2407_v57 }
 0x64a   :  { %4180 = vtanh.f32 %v2413_v29  ;;  %v2408_v7 = vadd.f32 %v2312_v11, %v6280_v6  ;;  %v2410_v51 = vadd.f32 %v2395_v45, %v6281_v14  ;;  %v2314_v28 = vpop.f32.mrb[67].mxu0  ;;  %v2397_v44 = vpop.f32.mrb[99].mxu1 }
 0x64b   :  { %4182 = vtanh.f32 %v2425_v48  ;;  %v2409_v47 = vadd.f32 %v2314_v28, %v6282_v32  ;;  %v2411_v13 = vadd.f32 %v2397_v44, %v6283_v63 }
 0x64c   :  { %v2414_v1 = vmul.f32 0.5, %v2408_v7  ;;  %4184 = vtanh.f32 %v2406_v56 }
 0x64d   :  { %v2426_v36 = vmul.f32 0.5, %v2409_v47  ;;  %v2441_v7 = vmul.f32 0.5, %v2411_v13 }
 0x64e   :  { %4186 = vtanh.f32 %v2414_v1 }
 0x64f   :  { %4188 = vtanh.f32 %v2426_v36 }
 0x650   :  { %v4175_v61 = vpop.eup %4174  ;;  %4190 = vtanh.f32 %v2439_v60 }
 0x651   :  { %v4177_v10 = vpop.eup %4176  ;;  %v2418_v29 = vmul.f32 0.5, %v4175_v61  ;;  %4192 = vtanh.f32 %v2410_v51 }
 0x652   :  { %v2430_v16 = vmul.f32 0.5, %v4177_v10  ;;  %v4179_v11 = vpop.eup %4178  ;;  %4194 = vtanh.f32 %v2440_v5 }
 0x653   :  { %v2421_v45 = vadd.f32 0.5, %v2418_v29  ;;  %4196 = vtanh.f32 %v2441_v7 }
 0x654   :  { %v4181_v48 = vpop.eup %4180  ;;  %v2433_v6 = vadd.f32 0.5, %v2430_v16 }
 0x655   :  { %v4183_v14 = vpop.eup %4182  ;;  %v2454_v28 = vmul.f32 %v4179_v11, %v2421_v45  ;;  %v2419_v44 = vmul.f32 0.5, %v4181_v48 }
 0x656   :  { %v2451_v56 = vmul.f32 %v2433_v6, %v5775_v15  ;;  %v2431_v26 = vmul.f32 0.5, %v4183_v14  ;;  %v4185_v32 = vpop.eup %4184 }
 0x657   :  { %v2422_v47 = vadd.f32 0.5, %v2419_v44 }
 0x658   :  { %v4187_v63 = vpop.eup %4186  ;;  %v5883_v1 = vadd.f32 %v2454_v28, %v2451_v56  ;;  %v2434_v60 = vadd.f32 0.5, %v2431_v26 }
 0x659   :  { %v4189_v57 = vpop.eup %4188  ;;  %v2455_v51 = vmul.f32 %v4185_v32, %v2422_v47  ;;  %v2420_v36 = vmul.f32 0.5, %v4187_v63 }
 0x65a   :  { %4198 = vtanh.f32 %v5883_v1  ;;  %v2452_v61 = vmul.f32 %v2434_v60, %v5779_v24  ;;  %v2432_v10 = vmul.f32 0.5, %v4189_v57  ;;  %v4191_v13 = vpop.eup %4190 }
 0x65b   :  { %v2423_v29 = vadd.f32 0.5, %v2420_v36  ;;  %v4193_v15 = vpop.eup %4192  ;;  %v2445_v48 = vmul.f32 0.5, %v4191_v13  ;;  %v6293_v13 = vld [vmem:[#allocation67_spill] sm:$0xff] }
 0x65c   :  { %v5887_v16 = vadd.f32 %v2455_v51, %v2452_v61  ;;  %v2435_v5 = vadd.f32 0.5, %v2432_v10  ;;  %v4195_v6 = vpop.eup %4194  ;;  %v6292_v61 = vld [vmem:[#allocation15_spill] sm:$0xff] }
 0x65d   :  { %v2456_v11 = vmul.f32 %v4193_v15, %v2423_v29  ;;  %v4197_v28 = vpop.eup %4196  ;;  %v2448_v24 = vadd.f32 0.5, %v2445_v48  ;;  %v2446_v44 = vmul.f32 0.5, %v4195_v6  ;;  %v6295_v48 = vld [vmem:[#allocation68_spill] sm:$0xff] }
 0x65e   :  { %4200 = vtanh.f32 %v5887_v16  ;;  %v2453_v45 = vmul.f32 %v2435_v5, %v5783_v18  ;;  %v2447_v32 = vmul.f32 0.5, %v4197_v28 }
 0x65f   :  { %v2449_v26 = vadd.f32 0.5, %v2446_v44 }
 0x660   :  { %v5891_v14 = vadd.f32 %v2456_v11, %v2453_v45  ;;  %v2450_v63 = vadd.f32 0.5, %v2447_v32  ;;  %v6294_v11 = vld [vmem:[#allocation16_spill] sm:$0xff] }
 0x662   :  { %4202 = vtanh.f32 %v5891_v14 }
 0x664   :  { %v4199_v7 = vpop.eup %4198 }
 0x665   :  { %v5894_v56 = vmul.f32 %v4199_v7, %v2448_v24 }
 0x667   :  { %2614 = vmatmul.mubr.f32.vlgmr.msra.gmra.mrb[68].mxu0 %v5894_v56  ;;  %2697 = vmatmul.mubr.f32.vlgmr.msra.gmra.mrb[100].mxu1 %v5894_v56 }
 0x668   :  { %v4201_v47 = vpop.eup %4200  ;;  %2619 = vmatprep.mubr.f32.mxu0 %v6231_v27  ;;  %2702 = vmatprep.mubr.f32.mxu1 %v6231_v27 }
 0x669   :  { %v5900_v18 = vmul.f32 %v4201_v47, %v2449_v26  ;;  %3934 = vmatpush1.bf16.msra.mxu0 %v5526_v2  ;;  %3966 = vmatpush1.bf16.msra.mxu1 %v5535_v53  ;;  %v5947_v53 = vld [vmem:[%s6148_s3] sm:$0xff]  }
 0x66a   :  { %3936 = vmatprep.subr.bf16.mxu0 %v5549_v59  ;;  %3968 = vmatprep.subr.bf16.mxu1 %v5560_v54 }
 0x66b   :  { %2620 = vmatmul.mubr.f32.gmra.mrb[70].mxu0 %v5900_v18  ;;  %2703 = vmatmul.mubr.f32.gmra.mrb[102].mxu1 %v5900_v18 }
 0x66c   :  { %v4203_v60 = vpop.eup %4202  ;;  %2625 = vmatprep.mubr.f32.mxu0 %v6231_v27  ;;  %2708 = vmatprep.mubr.f32.mxu1 %v6231_v27 }
 0x66d   :  { %v5910_v57 = vmul.f32 %v4203_v60, %v2450_v63  ;;  %3938 = vmatpush1.bf16.msra.mxu0 %v5562_v21  ;;  %3970 = vmatpush1.bf16.msra.mxu1 %v5571_v34  ;;  %v6284_v21 = vld [vmem:[#allocation11_spill] sm:$0xff] }
 0x66e   :  { %3940 = vmatprep.subr.bf16.mxu0 %v5585_v39  ;;  %3972 = vmatprep.subr.bf16.mxu1 %v5596_v40  ;;  %v6285_v39 = vld [vmem:[#allocation63_spill] sm:$0xff] }
 0x66f   :  { %2626 = vmatmul.mubr.f32.gmra.mrb[72].mxu0 %v5910_v57  ;;  %2709 = vmatmul.mubr.f32.gmra.mrb[104].mxu1 %v5910_v57  ;;  %v3132_v2 = vpack.c.bf16 %v5910_v57, %v5900_v18  ;;  %v6314_v18 = vld [vmem:[#allocation19_spill] sm:$0xff] }
 0x670   :  { %2928 = vmatprep.mubr.f32.mxu0 %v6231_v27  ;;  %3011 = vmatprep.mubr.f32.mxu1 %v6231_v27 }
 0x671   :  { %3942 = vmatpush1.bf16.msra.mxu0 %v5598_v8  ;;  %3974 = vmatpush1.bf16.msra.mxu1 %v5607_v58 }
 0x672   :  { %3944 = vmatprep.subr.bf16.mxu0 %v5618_v30  ;;  %3976 = vmatprep.subr.bf16.mxu1 %v5833_v55  ;;  %v6286_v30 = vld [vmem:[#allocation12_spill] sm:$0xff]  ;;  %v6291_v55 = vld [vmem:[#allocation66_spill] sm:$0xff] }
 0x675   :  { %3946 = vmatpush1.bf16.msra.mxu0 %v5627_v23  ;;  %3978 = vmatpush1.bf16.msra.mxu1 %v5841_v38 }
 0x676   :  { %3948 = vmatprep.subr.bf16.mxu0 %v5638_v25  ;;  %3980 = vmatprep.subr.bf16.mxu1 %v5851_v9  ;;  %v6287_v25 = vld [vmem:[#allocation64_spill] sm:$0xff] }
 0x679   :  { %3950 = vmatpush1.bf16.msra.mxu0 %v5647_v62  ;;  %3982 = vmatpush1.bf16.msra.mxu1 %v5859_v46 }
 0x67a   :  { %3952 = vmatprep.subr.bf16.mxu0 %v5661_v17  ;;  %3984 = vmatprep.subr.bf16.mxu1 %v5672_v33 }
 0x67d   :  { %3954 = vmatpush1.bf16.msra.mxu0 %v5674_v49  ;;  %3986 = vmatpush1.bf16.msra.mxu1 %v5683_v35 }
 0x67e   :  { %3956 = vmatprep.subr.bf16.mxu0 %v5697_v50  ;;  %3988 = vmatprep.subr.bf16.mxu1 %v5708_v41  ;;  %v6288_v50 = vld [vmem:[#allocation13_spill] sm:$0xff] }
 0x681   :  { %3958 = vmatpush1.bf16.msra.mxu0 %v5710_v22  ;;  %3990 = vmatpush1.bf16.msra.mxu1 %v5719_v0  ;;  %v6289_v22 = vld [vmem:[#allocation65_spill] sm:$0xff] }
 0x682   :  { %3960 = vmatprep.subr.bf16.mxu0 %v5733_v19  ;;  %3992 = vmatprep.subr.bf16.mxu1 %v5744_v4 }
 0x685   :  { %3962 = vmatpush1.bf16.msra.mxu0 %v5746_v37  ;;  %3994 = vmatpush1.bf16.msra.mxu1 %v5755_v31  ;;  %v6290_v37 = vld [vmem:[#allocation14_spill] sm:$0xff] }
 0x686   :  { %3443 = vmatprep.subr.bf16.mxu0 %v5947_v53 }
 0x73a   :  { %v2615_v59 = vpop.f32.mrb[68].mxu0  ;;  %v2698_v54 = vpop.f32.mrb[100].mxu1 }
 0x73b   :  { %v2715_v34 = vadd.f32 %v2615_v59, %v6284_v21  ;;  %v2717_v40 = vadd.f32 %v2698_v54, %v6285_v39  ;;  %v2617_v8 = vpop.f32.mrb[69].mxu0  ;;  %v2700_v58 = vpop.f32.mrb[101].mxu1 }
 0x73c   :  { %v2716_v23 = vadd.f32 %v2617_v8, %v6286_v30  ;;  %v2718_v62 = vadd.f32 %v2700_v58, %v6287_v25 }
 0x73d   :  { %v2727_v17 = vmul.f32 0.5, %v2715_v34 }
 0x73e   :  { %v2739_v33 = vmul.f32 0.5, %v2716_v23  ;;  %v2621_v49 = vpop.f32.mrb[70].mxu0  ;;  %v2704_v35 = vpop.f32.mrb[102].mxu1  ;;  %v2754_v24 = vmul.f32 0.5, %v2718_v62 }
 0x73f   :  { %4204 = vtanh.f32 %v2727_v17  ;;  %v2719_v41 = vadd.f32 %v2621_v49, %v6288_v50  ;;  %v2721_v0 = vadd.f32 %v2704_v35, %v6289_v22  ;;  %v2623_v19 = vpop.f32.mrb[71].mxu0  ;;  %v2706_v4 = vpop.f32.mrb[103].mxu1 }
 0x740   :  { %4206 = vtanh.f32 %v2739_v33  ;;  %v2720_v31 = vadd.f32 %v2623_v19, %v6290_v37  ;;  %v2722_v38 = vadd.f32 %v2706_v4, %v6291_v55 }
 0x741   :  { %v2728_v9 = vmul.f32 0.5, %v2719_v41  ;;  %4208 = vtanh.f32 %v2717_v40 }
 0x742   :  { %v2740_v46 = vmul.f32 0.5, %v2720_v31  ;;  %v2627_v51 = vpop.f32.mrb[72].mxu0  ;;  %v2710_v36 = vpop.f32.mrb[104].mxu1  ;;  %v2755_v63 = vmul.f32 0.5, %v2722_v38 }
 0x743   :  { %4210 = vtanh.f32 %v2728_v9  ;;  %v2723_v10 = vadd.f32 %v2627_v51, %v6292_v61  ;;  %v2725_v29 = vadd.f32 %v2710_v36, %v6293_v13  ;;  %v2629_v15 = vpop.f32.mrb[73].mxu0  ;;  %v2712_v5 = vpop.f32.mrb[105].mxu1  ;;  %v4017_v13 = vld [vmem:[%s6148_s3 + $0x8] sm:$0xff]  }
 0x744   :  { %4212 = vtanh.f32 %v2740_v46  ;;  %v2724_v45 = vadd.f32 %v2629_v15, %v6294_v11  ;;  %v2726_v6 = vadd.f32 %v2712_v5, %v6295_v48  ;;  %v4018_v11 = vld [vmem:[%s6148_s3 + $0x10] sm:$0xff]  }
 0x745   :  { %v2729_v28 = vmul.f32 0.5, %v2723_v10  ;;  %4214 = vtanh.f32 %v2721_v0 }
 0x746   :  { %v2741_v44 = vmul.f32 0.5, %v2724_v45  ;;  %v2756_v8 = vmul.f32 0.5, %v2726_v6 }
 0x747   :  { %4216 = vtanh.f32 %v2729_v28  ;;  %v4019_v28 = vld [vmem:[%s6148_s3 + $0x18] sm:$0xff]  }
 0x748   :  { %4218 = vtanh.f32 %v2741_v44  ;;  %v6297_v44 = vld [vmem:[#allocation75_spill] sm:$0xff] }
 0x749   :  { %v4205_v7 = vpop.eup %4204  ;;  %4220 = vtanh.f32 %v2754_v24  ;;  %v6296_v24 = vld [vmem:[#allocation76_spill] sm:$0xff] }
 0x74a   :  { %v4207_v26 = vpop.eup %4206  ;;  %v2733_v32 = vmul.f32 0.5, %v4205_v7  ;;  %4222 = vtanh.f32 %v2725_v29  ;;  %v6298_v7 = vpack.c.bf16 %v6296_v24, %v6297_v44 }
 0x74b   :  { %v2745_v47 = vmul.f32 0.5, %v4207_v26  ;;  %v4209_v60 = vpop.eup %4208  ;;  %4224 = vtanh.f32 %v2755_v63  ;;  %v4021_v26 = vld [vmem:[%s6148_s3 + $0x28] sm:$0xff]   ;;  %v6299_v63 = vld [vmem:[#allocation77_spill] sm:$0xff] }
 0x74c   :  { %v2736_v59 = vadd.f32 0.5, %v2733_v32  ;;  %4226 = vtanh.f32 %v2756_v8  ;;  %v4022_v32 = vld [vmem:[%s6148_s3 + $0x30] sm:$0xff]  }
 0x74d   :  { %v4211_v54 = vpop.eup %4210  ;;  %v2748_v21 = vadd.f32 0.5, %v2745_v47  ;;  %v4023_v47 = vld [vmem:[%s6148_s3 + $0x38] sm:$0xff]  }
 0x74e   :  { %v4213_v34 = vpop.eup %4212  ;;  %v2769_v39 = vmul.f32 %v4209_v60, %v2736_v59  ;;  %v2734_v40 = vmul.f32 0.5, %v4211_v54  ;;  %v3125_v60 = vpack.c.bf16 %v5302_v20, %v6299_v63  ;;  %v6300_v59 = vpack.c.bf16 %v5318_v42, %v5308_v12 }
 0x74f   :  { %v2766_v58 = vmul.f32 %v2748_v21, %v5883_v1  ;;  %v2746_v30 = vmul.f32 0.5, %v4213_v34  ;;  %v4215_v23 = vpop.eup %4214  ;;  %v3128_v54 = vpack.c.bf16 %v5484_v52, %v5428_v43  ;;  %v6301_v21 = vld [vmem:[#allocation22_spill] sm:$0xff]  ;;  %v6310_v43 = vld [vmem:[#allocation17_spill] sm:$0xff] }
 0x750   :  { %v2737_v25 = vadd.f32 0.5, %v2734_v40  ;;  %v6302_v34 = vpack.c.bf16 %v5416_v3, %v6301_v21  ;;  %v6304_v40 = vld [vmem:[#allocation39_spill] sm:$0xff] }
 0x751   :  { %v4217_v62 = vpop.eup %4216  ;;  %v5963_v17 = vadd.f32 %v2769_v39, %v2766_v58  ;;  %v2749_v33 = vadd.f32 0.5, %v2746_v30  ;;  %v6303_v39 = vld [vmem:[#allocation24_spill] sm:$0xff]  ;;  %v6306_v58 = vld [vmem:[#allocation25_spill] sm:$0xff] }
 0x752   :  { %v4219_v49 = vpop.eup %4218  ;;  %v2770_v35 = vmul.f32 %v4215_v23, %v2737_v25  ;;  %v2735_v50 = vmul.f32 0.5, %v4217_v62  ;;  %v6305_v8 = vpack.c.bf16 %v6303_v39, %v6304_v40  ;;  %v6307_v30 = vld [vmem:[#allocation41_spill] sm:$0xff]  ;;  %v6309_v23 = vld [vmem:[#allocation43_spill] sm:$0xff] }
 0x753   :  { %4228 = vtanh.f32 %v5963_v17  ;;  %v2767_v41 = vmul.f32 %v2749_v33, %v5887_v16  ;;  %v2747_v22 = vmul.f32 0.5, %v4219_v49  ;;  %v4221_v0 = vpop.eup %4220  ;;  %v6308_v20 = vpack.c.bf16 %v6306_v58, %v6307_v30  ;;  %v6311_v25 = vld [vmem:[#allocation69_spill] sm:$0xff] }
 0x754   :  { %v2738_v19 = vadd.f32 0.5, %v2735_v50  ;;  %v4223_v1 = vpop.eup %4222  ;;  %v2760_v38 = vmul.f32 0.5, %v4221_v0  ;;  %v3131_v12 = vpack.c.bf16 %v5894_v56, %v6309_v23 }
 0x755   :  { %v5967_v4 = vadd.f32 %v2770_v35, %v2767_v41  ;;  %v2750_v37 = vadd.f32 0.5, %v2747_v22  ;;  %v4225_v9 = vpop.eup %4224  ;;  %v6312_v35 = vld [vmem:[#allocation18_spill] sm:$0xff] }
 0x756   :  { %v2771_v31 = vmul.f32 %v4223_v1, %v2738_v19  ;;  %v4227_v51 = vpop.eup %4226  ;;  %v2763_v16 = vadd.f32 0.5, %v2760_v38  ;;  %v2761_v36 = vmul.f32 0.5, %v4225_v9  ;;  %v6313_v41 = vld [vmem:[#allocation70_spill] sm:$0xff]  ;;  %v6316_v38 = vld [vmem:[#allocation20_spill] sm:$0xff] }
 0x757   :  { %4230 = vtanh.f32 %v5967_v4  ;;  %v2768_v55 = vmul.f32 %v2750_v37, %v5891_v14  ;;  %v2762_v15 = vmul.f32 0.5, %v4227_v51  ;;  %v6317_v51 = vld [vmem:[#allocation72_spill] sm:$0xff] }
 0x758   :  { %v2764_v29 = vadd.f32 0.5, %v2761_v36 }
 0x759   :  { %v5971_v46 = vadd.f32 %v2771_v31, %v2768_v55  ;;  %v2765_v45 = vadd.f32 0.5, %v2762_v15 }
 0x75b   :  { %4232 = vtanh.f32 %v5971_v46 }
 0x75d   :  { %v4229_v61 = vpop.eup %4228 }
 0x75e   :  { %v2778_v10 = vmul.f32 %v4229_v61, %v2763_v16 }
 0x760   :  { %2929 = vmatmul.mubr.f32.vlgmr.msra.gmra.mrb[74].mxu0 %v2778_v10  ;;  %3012 = vmatmul.mubr.f32.vlgmr.msra.gmra.mrb[106].mxu1 %v2778_v10 }
 0x761   :  { %v4231_v14 = vpop.eup %4230  ;;  %3444 = vmatpush3.bf16.msra.mxu0 %v5947_v53  ;;  %2934 = vmatprep.mubr.f32.mxu0 %v6231_v27 }
 0x762   :  { %3017 = vmatprep.mubr.f32.mxu1 %v6231_v27  ;;  %3445 = vmatprep.subr.bf16.mxu0 %v4017_v13  ;;  %v2779_v5 = vmul.f32 %v4231_v14, %v2764_v29  ;;  %v6318_v29 = vld [vmem:[#allocation21_spill] sm:$0xff] }
 0x763   :  { %v6319_v14 = vld [vmem:[#allocation73_spill] sm:$0xff] }
 0x764   :  { %2935 = vmatmul.mubr.f32.gmra.mrb[76].mxu0 %v2779_v5  ;;  %3018 = vmatmul.mubr.f32.gmra.mrb[108].mxu1 %v2779_v5  ;;  %v3133_v48 = vpack.c.bf16 %v2779_v5, %v2778_v10 }
 0x765   :  { %v4233_v6 = vpop.eup %4232  ;;  %3446 = vmatpush3.bf16.msra.mxu0 %v4017_v13  ;;  %2940 = vmatprep.mubr.f32.mxu0 %v6231_v27 }
 0x766   :  { %3023 = vmatprep.mubr.f32.mxu1 %v6231_v27  ;;  %3447 = vmatprep.subr.bf16.mxu0 %v4018_v11  ;;  %v5985_v53 = vmul.f32 %v4233_v6, %v2765_v45  ;;  %v4020_v27 = vld [vmem:[%s6148_s3 + $0x20] sm:$0xff]  }
 0x768   :  { %2941 = vmatmul.mubr.f32.gmra.mrb[78].mxu0 %v5985_v53  ;;  %3024 = vmatmul.mubr.f32.gmra.mrb[110].mxu1 %v5985_v53 }
 0x769   :  { %3448 = vmatpush3.bf16.msra.mxu0 %v4018_v11  ;;  %3459 = vmatprep.mubr.bf16.mxu0 %v6298_v7 }
 0x76a   :  { %3449 = vmatprep.subr.bf16.mxu0 %v4019_v28 }
 0x76d   :  { %3450 = vmatpush3.bf16.msra.mxu0 %v4019_v28  ;;  %v6321_v28 = vld [vmem:[#allocation74_spill] sm:$0xff] }
 0x76e   :  { %3451 = vmatprep.subr.bf16.mxu0 %v4020_v27 }
 0x771   :  { %3452 = vmatpush3.bf16.msra.mxu0 %v4020_v27 }
 0x772   :  { %3453 = vmatprep.subr.bf16.mxu0 %v4021_v26 }
 0x775   :  { %3454 = vmatpush3.bf16.msra.mxu0 %v4021_v26 }
 0x776   :  { %3455 = vmatprep.subr.bf16.mxu0 %v4022_v32 }
 0x779   :  { %3456 = vmatpush3.bf16.msra.mxu0 %v4022_v32 }
 0x77a   :  { %3457 = vmatprep.subr.bf16.mxu0 %v4023_v47 }
 0x77d   :  { %3458 = vmatpush3.bf16.msra.mxu0 %v4023_v47 }
 0x780   :  { %3460 = vmatmul.mubr.bf16.vlgmr.msra.gmra.mrb[80].mxu0 %v3125_v60 }
 0x781   :  { %3463 = vmatprep.mubr.bf16.mxu0 %v6300_v59 }
 0x788   :  { %3464 = vmatmul.mubr.bf16.gmra.mrb[84].mxu0 %v6302_v34 }
 0x789   :  { %3467 = vmatprep.mubr.bf16.mxu0 %v3128_v54 }
 0x790   :  { %3468 = vmatmul.mubr.bf16.gmra.mrb[88].mxu0 %v6305_v8 }
 0x791   :  { %3471 = vmatprep.mubr.bf16.mxu0 %v6308_v20 }
 0x798   :  { %3472 = vmatmul.mubr.bf16.gmra.mrb[92].mxu0 %v3131_v12 }
 0x799   :  { %3475 = vmatprep.mubr.bf16.mxu0 %v3132_v2  ;;  %v6315_v2 = vld [vmem:[#allocation71_spill] sm:$0xff] }
 0x7a0   :  { %3476 = vmatmul.mubr.bf16.gmra.mrb[96].mxu0 %v3133_v48  ;;  %v6320_v48 = vld [vmem:[#allocation23_spill] sm:$0xff] }
 0x833   :  { %v2930_v42 = vpop.f32.mrb[74].mxu0  ;;  %v3013_v3 = vpop.f32.mrb[106].mxu1 }
 0x834   :  { %v3030_v52 = vadd.f32 %v2930_v42, %v6310_v43  ;;  %v3032_v62 = vadd.f32 %v3013_v3, %v6311_v25  ;;  %v2932_v33 = vpop.f32.mrb[75].mxu0  ;;  %v3015_v49 = vpop.f32.mrb[107].mxu1 }
 0x835   :  { %v3031_v50 = vadd.f32 %v2932_v33, %v6312_v35  ;;  %v3033_v22 = vadd.f32 %v3015_v49, %v6313_v41 }
 0x836   :  { %v3042_v0 = vmul.f32 0.5, %v3030_v52 }
 0x837   :  { %v3054_v56 = vmul.f32 0.5, %v3031_v50  ;;  %v2936_v19 = vpop.f32.mrb[76].mxu0  ;;  %v3019_v1 = vpop.f32.mrb[108].mxu1  ;;  %v3069_v7 = vmul.f32 0.5, %v3033_v22 }
 0x838   :  { %4234 = vtanh.f32 %v3042_v0  ;;  %v3034_v57 = vadd.f32 %v2936_v19, %v6314_v18  ;;  %v3036_v37 = vadd.f32 %v3019_v1, %v6315_v2  ;;  %v2938_v31 = vpop.f32.mrb[77].mxu0  ;;  %v3021_v55 = vpop.f32.mrb[109].mxu1  ;;  %v6046_v1 = vld [vmem:[%s6149_s4] ss:$0 sm:$0xff] }
 0x839   :  { %4236 = vtanh.f32 %v3054_v56  ;;  %v3035_v9 = vadd.f32 %v2938_v31, %v6316_v38  ;;  %v3037_v16 = vadd.f32 %v3021_v55, %v6317_v51 }
 0x83a   :  { %v3043_v36 = vmul.f32 0.5, %v3034_v57  ;;  %4238 = vtanh.f32 %v3032_v62 }
 0x83b   :  { %v3055_v61 = vmul.f32 0.5, %v3035_v9  ;;  %v2942_v10 = vpop.f32.mrb[78].mxu0  ;;  %v3025_v13 = vpop.f32.mrb[110].mxu1  ;;  %v3070_v60 = vmul.f32 0.5, %v3037_v16 }
 0x83c   :  { %4240 = vtanh.f32 %v3043_v36  ;;  %v3038_v15 = vadd.f32 %v2942_v10, %v6318_v29  ;;  %v3040_v5 = vadd.f32 %v3025_v13, %v6319_v14  ;;  %v2944_v11 = vpop.f32.mrb[79].mxu0  ;;  %v3027_v45 = vpop.f32.mrb[111].mxu1 }
 0x83d   :  { %4242 = vtanh.f32 %v3055_v61  ;;  %v3039_v6 = vadd.f32 %v2944_v11, %v6320_v48  ;;  %v3041_v24 = vadd.f32 %v3027_v45, %v6321_v28 }
 0x83e   :  { %v3044_v44 = vmul.f32 0.5, %v3038_v15  ;;  %4244 = vtanh.f32 %v3036_v37 }
 0x83f   :  { %v3056_v27 = vmul.f32 0.5, %v3039_v6  ;;  %v3071_v58 = vmul.f32 0.5, %v3041_v24 }
 0x840   :  { %4246 = vtanh.f32 %v3044_v44 }
 0x841   :  { %4248 = vtanh.f32 %v3056_v27 }
 0x842   :  { %v4235_v26 = vpop.eup %4234  ;;  %4250 = vtanh.f32 %v3069_v7 }
 0x843   :  { %v4237_v32 = vpop.eup %4236  ;;  %v3048_v47 = vmul.f32 0.5, %v4235_v26  ;;  %4252 = vtanh.f32 %v3040_v5 }
 0x844   :  { %v3060_v63 = vmul.f32 0.5, %v4237_v32  ;;  %v4239_v59 = vpop.eup %4238  ;;  %4254 = vtanh.f32 %v3070_v60 }
 0x845   :  { %v3051_v54 = vadd.f32 0.5, %v3048_v47  ;;  %4256 = vtanh.f32 %v3071_v58 }
 0x846   :  { %v4241_v21 = vpop.eup %4240  ;;  %v3063_v34 = vadd.f32 0.5, %v3060_v63 }
 0x847   :  { %v4243_v39 = vpop.eup %4242  ;;  %v3084_v40 = vmul.f32 %v4239_v59, %v3051_v54  ;;  %v3049_v8 = vmul.f32 0.5, %v4241_v21 }
 0x848   :  { %v3081_v30 = vmul.f32 %v3063_v34, %v5963_v17  ;;  %v3061_v20 = vmul.f32 0.5, %v4243_v39  ;;  %v4245_v23 = vpop.eup %4244 }
 0x849   :  { %v3052_v12 = vadd.f32 0.5, %v3049_v8 }
 0x84a   :  { %v4247_v42 = vpop.eup %4246  ;;  %v3087_v3 = vadd.f32 %v3084_v40, %v3081_v30  ;;  %v3064_v43 = vadd.f32 0.5, %v3061_v20 }
 0x84b   :  { %v4249_v52 = vpop.eup %4248  ;;  %v3085_v25 = vmul.f32 %v4245_v23, %v3052_v12  ;;  %v3050_v62 = vmul.f32 0.5, %v4247_v42 }
 0x84c   :  { %4258 = vtanh.f32 %v3087_v3  ;;  %v3082_v33 = vmul.f32 %v3064_v43, %v5967_v4  ;;  %v3062_v49 = vmul.f32 0.5, %v4249_v52  ;;  %v4251_v35 = vpop.eup %4250 }
 0x84d   :  { %v3053_v50 = vadd.f32 0.5, %v3050_v62  ;;  %v4253_v41 = vpop.eup %4252  ;;  %v3075_v19 = vmul.f32 0.5, %v4251_v35 }
 0x84e   :  { %v3088_v22 = vadd.f32 %v3085_v25, %v3082_v33  ;;  %v3065_v17 = vadd.f32 0.5, %v3062_v49  ;;  %v4255_v18 = vpop.eup %4254 }
 0x84f   :  { %v3086_v0 = vmul.f32 %v4253_v41, %v3053_v50  ;;  %v4257_v31 = vpop.eup %4256  ;;  %v3078_v55 = vadd.f32 0.5, %v3075_v19  ;;  %v3076_v38 = vmul.f32 0.5, %v4255_v18 }
 0x850   :  { %4260 = vtanh.f32 %v3088_v22  ;;  %v3083_v56 = vmul.f32 %v3065_v17, %v5971_v46  ;;  %v3077_v29 = vmul.f32 0.5, %v4257_v31 }
 0x851   :  { %v3079_v13 = vadd.f32 0.5, %v3076_v38 }
 0x852   :  { %v3089_v57 = vadd.f32 %v3086_v0, %v3083_v56  ;;  %v3080_v6 = vadd.f32 0.5, %v3077_v29 }
 0x853   :  { %v3461_v2 = vpop.f32.mrb[80].mxu0 }
 0x854   :  { %4262 = vtanh.f32 %v3089_v57  ;;  %v3250_v4 = vadd.f32 %v3461_v2, %v6046_v1  ;;  %v3241_v37 = vpop.f32.mrb[81].mxu0 }
 0x855   :  { %v3242_v9 = vadd.f32 %v6046_v1, %v3241_v37  ;;  %v3462_v51 = vpop.f32.mrb[82].mxu0 }
 0x856   :  { %v4259_v46 = vpop.eup %4258  ;;  %3338 = vst [vmem:[%s6150_s5 + $0x10] sm:$0xff] %v3250_v4  ;;  %v3253_v16 = vadd.f32 %v3462_v51, %v6046_v1  ;;  %v3244_v36 = vpop.f32.mrb[83].mxu0 }
 0x857   :  { %3336 = vst [vmem:[%s6150_s5] sm:$0xff] %v3242_v9  ;;  %v3245_v61 = vadd.f32 %v6046_v1, %v3244_v36  ;;  %v3093_v10 = vmul.f32 %v4259_v46, %v3078_v55 }
 0x858   :  { %3339 = vst [vmem:[%s6150_s5 + $0x18] sm:$0xff] %v3253_v16 }
 0x859   :  { %3337 = vst [vmem:[%s6150_s5 + $0x8] sm:$0xff] %v3245_v61  ;;  %v3134_v15 = vpack.c.bf16 %v3093_v10, %v5985_v53 }
 0x85a   :  { %v4261_v14 = vpop.eup %4260 }
 0x85b   :  { %v3465_v5 = vpop.f32.mrb[84].mxu0  ;;  %3479 = vmatprep.mubr.bf16.mxu0 %v3134_v15  ;;  %v3094_v11 = vmul.f32 %v4261_v14, %v3079_v13 }
 0x85c   :  { %v3266_v45 = vadd.f32 %v3465_v5, %v6046_v1  ;;  %v3257_v48 = vpop.f32.mrb[85].mxu0 }
 0x85d   :  { %v3258_v28 = vadd.f32 %v6046_v1, %v3257_v48  ;;  %v3466_v24 = vpop.f32.mrb[86].mxu0 }
 0x85e   :  { %v4263_v44 = vpop.eup %4262  ;;  %3342 = vst [vmem:[%s6150_s5 + $0x30] sm:$0xff] %v3266_v45  ;;  %v3269_v7 = vadd.f32 %v3466_v24, %v6046_v1  ;;  %v3260_v27 = vpop.f32.mrb[87].mxu0 }
 0x85f   :  { %3340 = vst [vmem:[%s6150_s5 + $0x20] sm:$0xff] %v3258_v28  ;;  %v3261_v53 = vadd.f32 %v6046_v1, %v3260_v27  ;;  %v3095_v26 = vmul.f32 %v4263_v44, %v3080_v6 }
 0x860   :  { %3343 = vst [vmem:[%s6150_s5 + $0x38] sm:$0xff] %v3269_v7 }
 0x861   :  { %3341 = vst [vmem:[%s6150_s5 + $0x28] sm:$0xff] %v3261_v53  ;;  %v3135_v32 = vpack.c.bf16 %v3095_v26, %v3094_v11 }
 0x863   :  { %v3469_v47 = vpop.f32.mrb[88].mxu0  ;;  %3480 = vmatmul.mubr.bf16.gmra.mrb[100].mxu0 %v3135_v32 }
 0x864   :  { %v3282_v63 = vadd.f32 %v3469_v47, %v6046_v1  ;;  %v3273_v60 = vpop.f32.mrb[89].mxu0 }
 0x865   :  { %v3274_v59 = vadd.f32 %v6046_v1, %v3273_v60  ;;  %v3470_v54 = vpop.f32.mrb[90].mxu0 }
 0x866   :  { %3346 = vst [vmem:[%s6150_s5 + $0x50] sm:$0xff] %v3282_v63  ;;  %v3285_v21 = vadd.f32 %v3470_v54, %v6046_v1  ;;  %v3276_v34 = vpop.f32.mrb[91].mxu0 }
 0x867   :  { %3344 = vst [vmem:[%s6150_s5 + $0x40] sm:$0xff] %v3274_v59  ;;  %v3277_v39 = vadd.f32 %v6046_v1, %v3276_v34 }
 0x868   :  { %3347 = vst [vmem:[%s6150_s5 + $0x58] sm:$0xff] %v3285_v21 }
 0x869   :  { %3345 = vst [vmem:[%s6150_s5 + $0x48] sm:$0xff] %v3277_v39 }
 0x86b   :  { %v3473_v40 = vpop.f32.mrb[92].mxu0 }
 0x86c   :  { %v3298_v8 = vadd.f32 %v3473_v40, %v6046_v1  ;;  %v3289_v58 = vpop.f32.mrb[93].mxu0 }
 0x86d   :  { %v3290_v30 = vadd.f32 %v6046_v1, %v3289_v58  ;;  %v3474_v20 = vpop.f32.mrb[94].mxu0 }
 0x86e   :  { %3350 = vst [vmem:[%s6150_s5 + $0x70] sm:$0xff] %v3298_v8  ;;  %v3301_v23 = vadd.f32 %v3474_v20, %v6046_v1  ;;  %v3292_v12 = vpop.f32.mrb[95].mxu0 }
 0x86f   :  { %3348 = vst [vmem:[%s6150_s5 + $0x60] sm:$0xff] %v3290_v30  ;;  %v3293_v42 = vadd.f32 %v6046_v1, %v3292_v12 }
 0x870   :  { %3351 = vst [vmem:[%s6150_s5 + $0x78] sm:$0xff] %v3301_v23 }
 0x871   :  { %3349 = vst [vmem:[%s6150_s5 + $0x68] sm:$0xff] %v3293_v42 }
 0x873   :  { %v3477_v3 = vpop.f32.mrb[96].mxu0 }
 0x874   :  { %v3314_v43 = vadd.f32 %v3477_v3, %v6046_v1  ;;  %v3305_v52 = vpop.f32.mrb[97].mxu0 }
 0x875   :  { %v3306_v25 = vadd.f32 %v6046_v1, %v3305_v52  ;;  %v3478_v62 = vpop.f32.mrb[98].mxu0 }
 0x876   :  { %3354 = vst [vmem:[%s6150_s5 + $0x90] sm:$0xff] %v3314_v43  ;;  %v3317_v33 = vadd.f32 %v3478_v62, %v6046_v1  ;;  %v3308_v49 = vpop.f32.mrb[99].mxu0 }
 0x877   :  { %3352 = vst [vmem:[%s6150_s5 + $0x80] sm:$0xff] %v3306_v25  ;;  %v3309_v35 = vadd.f32 %v6046_v1, %v3308_v49 }
 0x878   :  { %3355 = vst [vmem:[%s6150_s5 + $0x98] sm:$0xff] %v3317_v33 }
 0x879   :  { %3353 = vst [vmem:[%s6150_s5 + $0x88] sm:$0xff] %v3309_v35 }
 0x936   :  { %v3481_v50 = vpop.f32.mrb[100].mxu0 }
 0x937   :  { %v3330_v41 = vadd.f32 %v3481_v50, %v6046_v1  ;;  %v3321_v22 = vpop.f32.mrb[101].mxu0 }
 0x938   :  { %v3322_v17 = vadd.f32 %v6046_v1, %v3321_v22  ;;  %v3482_v0 = vpop.f32.mrb[102].mxu0 }
 0x939   :  { %3358 = vst [vmem:[%s6150_s5 + $0xb0] sm:$0xff] %v3330_v41  ;;  %v3333_v56 = vadd.f32 %v3482_v0, %v6046_v1  ;;  %v3324_v19 = vpop.f32.mrb[103].mxu0 }
 0x93a   :  { %3356 = vst [vmem:[%s6150_s5 + $0xa0] sm:$0xff] %v3322_v17  ;;  %v3325_v18 = vadd.f32 %v6046_v1, %v3324_v19 }
 0x93b   :  { %3359 = vst [vmem:[%s6150_s5 + $0xb8] sm:$0xff] %v3333_v56 }
 0x93c   :  { %3357 = vst [vmem:[%s6150_s5 + $0xa8] sm:$0xff] %v3325_v18 }
 0x93d   :  { %3364 = vsyncpa [#allocation5], 1 }

</bundles_post_ra>
